<compile_context>
chip_gen: v6e
topology: v6e:2x2x1
jax: 0.10.0
libtpu: 0.0.40
codegen_flags: <defaults>
</compile_context>

<pallas_src>
import jax
import jax.numpy as jnp
from jax import lax
from jax.experimental import pallas as pl
from jax.experimental.pallas import tpu as pltpu

HIDDEN_SIZE = 768
HIDDEN_LAYERS = [512, 256]
NUM_DOGS = 60
OUT_PAD = 128  # lane-dense padded logits width (sliced back to NUM_DOGS in the wrapper)


# ----------------------------------------------------------------------------- tiling helpers
def _vmem_budgets():
    """Feature double-buffer budget + vmem limit derived from the actual chip's VMEM."""
    try:
        cap = int(pltpu.get_tpu_info().vmem_capacity_bytes)
    except Exception:
        cap = 64 << 20  # conservative (v7x-class)
    feat_budget = min(max(cap // 2 - (8 << 20), 12 << 20), 80 << 20)   # 24 MiB on v7x, 56 MiB on v5e/v6e
    vmem_limit = min(cap * 3 // 4, 112 << 20)                          # 48 MiB on v7x, 96 MiB on v5e/v6e
    return feat_budget, vmem_limit


def _pick_batch_block(B):
    """Sublane-aligned batch block; guarantees >= 2 batch blocks when B >= 16 so the
    'parallel' batch grid axis can be split across both v7x TensorCores."""
    if B >= 16:
        for tb in (32, 16, 8):
            if B % tb == 0 and B // tb >= 2:
                return tb
    for tb in (32, 16, 8):
        if B % tb == 0:
            return tb
    return B  # small / odd batch: single batch block (block dim == full array dim is legal)


def _pick_seq_tile(S, tB, itemsize, feat_budget, align, prefer_even_steps):
    """Largest aligned seq tile whose double-buffered feature block fits the budget,
    preferring a tile that divides S (no ragged last tile / no masking)."""
    max_ts = feat_budget // (2 * tB * HIDDEN_SIZE * itemsize)
    max_ts = max(align, (max_ts // align) * align)
    max_ts = min(max_ts, 1024)
    if S <= max_ts:
        return S  # single full block
    candidates = range(max_ts, align - 1, -align)
    if prefer_even_steps:  # so the small-batch sequence-split path can use 2 equal chunks
        for ts in candidates:
            if S % ts == 0 and (S // ts) % 2 == 0:
                return ts
    for ts in candidates:
        if S % ts == 0:
            return ts
    return max_ts  # no aligned divisor: ragged last tile (masked in-kernel, last step only)


# ----------------------------------------------------------------------------- fused path
def _make_fused_kernel(S, tS, inv_S, needs_mask):
    def kernel(feat_ref, w1_ref, b1_ref, w2_ref, b2_ref, w3_ref, b3_ref, out_ref, acc_ref):
        s = pl.program_id(1)
        last = pl.num_programs(1) - 1

        # reset the running sum at the start of each batch block's sequence sweep
        @pl.when(s == 0)
        def _():
            acc_ref[...] = jnp.zeros_like(acc_ref)

        if needs_mask:
            # mask is only semantically needed on the ragged last tile -> gate it
            @pl.when(s != last)
            def _():
                acc_ref[...] += jnp.sum(feat_ref[...].astype(jnp.float32), axis=1)

            @pl.when(s == last)
            def _():
                feat = feat_ref[...].astype(jnp.float32)
                valid = S - s * tS
                row = lax.broadcasted_iota(jnp.int32, feat.shape, 1)
                acc_ref[...] += jnp.sum(jnp.where(row < valid, feat, 0.0), axis=1)
        else:
            acc_ref[...] += jnp.sum(feat_ref[...].astype(jnp.float32), axis=1)  # (tB, 768)

        # epilogue: mean + MLP head, once per batch block
        @pl.when(s == last)
        def _():
            pooled = acc_ref[...] * inv_S  # (tB, 768)

            # feature_projector: Dropout (identity) -> Linear(768, 512) -> ReLU
            h1 = jnp.dot(pooled, w1_ref[...], preferred_element_type=jnp.float32) + b1_ref[...]
            h1 = jnp.maximum(h1, 0.0)

            # middle_layers: Dropout (identity) -> Linear(512, 256) -> ReLU
            h2 = jnp.dot(h1, w2_ref[...], preferred_element_type=jnp.float32) + b2_ref[...]
            h2 = jnp.maximum(h2, 0.0)

            # output_layer: Linear(256, 60), lane-padded to 128
            logits = jnp.dot(h2, w3_ref[...], preferred_element_type=jnp.float32) + b3_ref[...]
            out_ref[...] = logits.astype(out_ref.dtype)

    return kernel


def _fused_forward(features, w1, b1, w2, b2, w3p, b3p, tB, tS, vmem_limit, single_buffer_weights):
    B, S, H = features.shape
    n_b = B // tB
    n_s = pl.cdiv(S, tS)
    needs_mask = (S % tS) != 0
    kernel = _make_fused_kernel(S, tS, 1.0 / S, needs_mask)

    feat_spec = pl.BlockSpec((tB, tS, H), lambda b, s: (b, s, 0))

    def resident(shape):
        # weights/biases are revisited every step; a single VMEM buffer is enough
        if single_buffer_weights and hasattr(pl, "Buffered"):
            try:
                return pl.BlockSpec(shape, lambda b, s: (0, 0), pipeline_mode=pl.Buffered(1))
            except TypeError:
                pass
        return pl.BlockSpec(shape, lambda b, s: (0, 0))

    itemsize = jnp.dtype(features.dtype).itemsize
    bytes_accessed = int(
        B * S * H * itemsize
        + 4 * (w1.size + b1.size + w2.size + b2.size + w3p.size + b3p.size)
        + 4 * B * OUT_PAD
    )
    flops = int(2 * B * S * H + 2 * B * (H * HIDDEN_LAYERS[0]
                                         + HIDDEN_LAYERS[0] * HIDDEN_LAYERS[1]
                                         + HIDDEN_LAYERS[1] * OUT_PAD))

    return pl.pallas_call(
        kernel,
        out_shape=jax.ShapeDtypeStruct((B, OUT_PAD), jnp.float32),
        grid_spec=pltpu.PrefetchScalarGridSpec(
            num_scalar_prefetch=0,
            grid=(n_b, n_s),
            in_specs=[
                feat_spec,
                resident(w1.shape), resident(b1.shape),
                resident(w2.shape), resident(b2.shape),
                resident(w3p.shape), resident(b3p.shape),
            ],
            out_specs=pl.BlockSpec((tB, OUT_PAD), lambda b, s: (b, 0)),
            scratch_shapes=[pltpu.VMEM((tB, HIDDEN_SIZE), jnp.float32)],
        ),
        compiler_params=pltpu.CompilerParams(
            dimension_semantics=("parallel", "arbitrary"),
            vmem_limit_bytes=vmem_limit,
        ),
        cost_estimate=pl.CostEstimate(
            flops=flops, transcendentals=0, bytes_accessed=bytes_accessed
        ),
    )(features, w1, b1, w2, b2, w3p, b3p)


# ----------------------------------------------------------------------------- small-batch split path
def _partial_sum_kernel(feat_ref, psum_ref):
    s = pl.program_id(1)

    @pl.when(s == 0)
    def _():
        psum_ref[...] = jnp.zeros_like(psum_ref)  # output block resident across s -> accumulator

    psum_ref[...] += jnp.sum(feat_ref[...].astype(jnp.float32), axis=1)[None]  # (1, B, 768)


def _make_combine_kernel(inv_S):
    def kernel(psum_ref, w1_ref, b1_ref, w2_ref, b2_ref, w3_ref, b3_ref, out_ref):
        pooled = (psum_ref[0] + psum_ref[1]) * inv_S  # (B, 768)
        h1 = jnp.maximum(jnp.dot(pooled, w1_ref[...], preferred_element_type=jnp.float32) + b1_ref[...], 0.0)
        h2 = jnp.maximum(jnp.dot(h1, w2_ref[...], preferred_element_type=jnp.float32) + b2_ref[...], 0.0)
        logits = jnp.dot(h2, w3_ref[...], preferred_element_type=jnp.float32) + b3_ref[...]
        out_ref[...] = logits.astype(out_ref.dtype)
    return kernel


def _split_forward(features, w1, b1, w2, b2, w3p, b3p, tS, vmem_limit):
    """Small-batch path: split the sequence reduction into two 'parallel' chunks
    (one per v7x TensorCore), then combine + run the MLP head in a tiny second call."""
    B, S, H = features.shape
    n_s = S // tS
    spc = n_s // 2  # steps per chunk

    psum = pl.pallas_call(
        _partial_sum_kernel,
        out_shape=jax.ShapeDtypeStruct((2, B, H), jnp.float32),
        grid_spec=pltpu.PrefetchScalarGridSpec(
            num_scalar_prefetch=0,
            grid=(2, spc),
            in_specs=[pl.BlockSpec((B, tS, H), lambda c, s: (0, c * spc + s, 0))],
            out_specs=pl.BlockSpec((1, B, H), lambda c, s: (c, 0, 0)),
        ),
        compiler_params=pltpu.CompilerParams(
            dimension_semantics=("parallel", "arbitrary"),
            vmem_limit_bytes=vmem_limit,
        ),
        cost_estimate=pl.CostEstimate(
            flops=int(2 * B * S * H), transcendentals=0,
            bytes_accessed=int(B * S * H * jnp.dtype(features.dtype).itemsize + 4 * 2 * B * H),
        ),
    )(features)

    # combine (O(B*768), negligible) + MLP head: everything fits in VMEM in one shot
    return pl.pallas_call(
        _make_combine_kernel(1.0 / S),
        out_shape=jax.ShapeDtypeStruct((B, OUT_PAD), jnp.float32),
    )(psum, w1, b1, w2, b2, w3p, b3p)


# ----------------------------------------------------------------------------- public wrapper
def individual_dog_head_forward(features, params, *, seq_tile=None):
    """features: (B, S, 768), ideally bf16 (streamed; f32 also accepted).
    params: dict of (in, out)-layout weights and (1, out) biases (PyTorch nn.Linear weights
    must be transposed when loading a real checkpoint).  Returns (B, 60) f32 logits."""
    B, S, H = features.shape
    assert H == HIDDEN_SIZE

    w1, b1 = params["w1"], params["b1"]
    w2, b2 = params["w2"], params["b2"]
    w3, b3 = params["w3"], params["b3"]
    # pad final layer to a lane-dense output width (padded columns are zero -> sliced off)
    w3p = jnp.pad(w3, ((0, 0), (0, OUT_PAD - NUM_DOGS)))
    b3p = jnp.pad(b3, ((0, 0), (0, OUT_PAD - NUM_DOGS)))

    feat_budget, vmem_limit = _vmem_budgets()
    itemsize = jnp.dtype(features.dtype).itemsize
    align = 16 if itemsize < 4 else 8  # bf16 packs 16 sublanes per vreg

    tB = _pick_batch_block(B)
    n_b = B // tB
    if seq_tile is not None:
        tS = int(seq_tile)
        assert 0 < tS <= S and (tS == S or tS % align == 0), "seq_tile must be aligned"
    else:
        tS = _pick_seq_tile(S, tB, itemsize, feat_budget, align, prefer_even_steps=(n_b == 1))

    n_s = pl.cdiv(S, tS)
    use_split = (n_b == 1) and (S % tS == 0) and (n_s >= 2) and (n_s % 2 == 0)

    if use_split:
        out = _split_forward(features, w1, b1, w2, b2, w3p, b3p, tS, vmem_limit)
    else:
        try:
            out = _fused_forward(features, w1, b1, w2, b2, w3p, b3p, tB, tS,
                                 vmem_limit, single_buffer_weights=True)
        except Exception:
            # pipeline_mode=pl.Buffered(1) unsupported on this JAX/Mosaic: retry double-buffered
            out = _fused_forward(features, w1, b1, w2, b2, w3p, b3p, tB, tS,
                                 vmem_limit, single_buffer_weights=False)

    return out[:, :NUM_DOGS]


# ----------------------------------------------------------------------------- params / reference
def init_params(key):
    """Deterministic synthetic parameters matching the PyTorch module's shapes."""
    ks = jax.random.split(key, 6)

    def lin(kw, kb, fan_in, fan_out):
        bound = 1.0 / (fan_in ** 0.5)
        w = jax.random.uniform(kw, (fan_in, fan_out), jnp.float32, -bound, bound)
        b = jax.random.uniform(kb, (1, fan_out), jnp.float32, -bound, bound)
        return w, b

    w1, b1 = lin(ks[0], ks[1], HIDDEN_SIZE, HIDDEN_LAYERS[0])
    w2, b2 = lin(ks[2], ks[3], HIDDEN_LAYERS[0], HIDDEN_LAYERS[1])
    w3, b3 = lin(ks[4], ks[5], HIDDEN_LAYERS[1], NUM_DOGS)
    return {"w1": w1, "b1": b1, "w2": w2, "b2": b2, "w3": w3, "b3": b3}


def reference_forward(features, params):
    pooled = jnp.mean(features.astype(jnp.float32), axis=1)
    h1 = jnp.maximum(pooled @ params["w1"] + params["b1"], 0.0)
    h2 = jnp.maximum(h1 @ params["w2"] + params["b2"], 0.0)
    return h2 @ params["w3"] + params["b3"]


if __name__ == "__main__":
    key = jax.random.PRNGKey(0)
    k_feat, k_params = jax.random.split(key)
    params = init_params(k_params)

    # Test 1: tiny fused path (single batch block, single sequence block), bf16 stream.
    B, S = 2, 8
    features = jax.random.normal(k_feat, (B, S, HIDDEN_SIZE), jnp.float32).astype(jnp.bfloat16)
    logits = jax.block_until_ready(individual_dog_head_forward(features, params))
    ref = reference_forward(features, params)
    assert logits.shape == (B, NUM_DOGS), logits.shape
    assert jnp.allclose(logits, ref, atol=1e-3, rtol=1e-3), "mismatch vs JAX reference (fused)"

    # Test 2: small-batch sequence-split path (two parallel chunks + combine call).
    B2, S2 = 2, 64
    features2 = jax.random.normal(jax.random.PRNGKey(1), (B2, S2, HIDDEN_SIZE),
                                  jnp.float32).astype(jnp.bfloat16)
    logits2 = jax.block_until_ready(individual_dog_head_forward(features2, params, seq_tile=16))
    ref2 = reference_forward(features2, params)
    assert logits2.shape == (B2, NUM_DOGS)
    assert jnp.allclose(logits2, ref2, atol=1e-3, rtol=1e-3), "mismatch vs JAX reference (split)"

    # Test 3: multi-batch-block fused path with multi-step sequence accumulation.
    B3, S3 = 16, 32
    features3 = jax.random.normal(jax.random.PRNGKey(2), (B3, S3, HIDDEN_SIZE),
                                  jnp.float32).astype(jnp.bfloat16)
    logits3 = jax.block_until_ready(individual_dog_head_forward(features3, params, seq_tile=16))
    ref3 = reference_forward(features3, params)
    assert logits3.shape == (B3, NUM_DOGS)
    assert jnp.allclose(logits3, ref3, atol=1e-3, rtol=1e-3), "mismatch vs JAX reference (batched)"

    print("KERNEL_OK")
</pallas_src>

<mosaic_0001>
module attributes {stable_mosaic.version = 11 : i64} {
  func.func @kernel(%arg0: i32, %arg1: i32, %arg2: memref<2x8x768xbf16, #tpu.memory_space<vmem>>, %arg3: memref<768x512xf32, #tpu.memory_space<vmem>>, %arg4: memref<1x512xf32, #tpu.memory_space<vmem>>, %arg5: memref<512x256xf32, #tpu.memory_space<vmem>>, %arg6: memref<1x256xf32, #tpu.memory_space<vmem>>, %arg7: memref<256x128xf32, #tpu.memory_space<vmem>>, %arg8: memref<1x128xf32, #tpu.memory_space<vmem>>, %arg9: memref<2x128xf32, #tpu.memory_space<vmem>>, %arg10: memref<2x768xf32, #tpu.memory_space<vmem>>) attributes {dimension_semantics = [#tpu.dimension_semantics<parallel>, #tpu.dimension_semantics<arbitrary>], iteration_bounds = array<i64: 1, 1>, scalar_prefetch = 0 : i64, scratch_operands = 1 : i64, tpu.core_type = #tpu.core_type<tc>, window_params = [{transform_indices = @transform_0, window_bounds = array<i64: 2, 8, 768>}, {pipeline_mode = #tpu.pipeline_mode<synchronous>, transform_indices = @transform_1, window_bounds = array<i64: 768, 512>}, {pipeline_mode = #tpu.pipeline_mode<synchronous>, transform_indices = @transform_2, window_bounds = array<i64: 1, 512>}, {pipeline_mode = #tpu.pipeline_mode<synchronous>, transform_indices = @transform_3, window_bounds = array<i64: 512, 256>}, {pipeline_mode = #tpu.pipeline_mode<synchronous>, transform_indices = @transform_4, window_bounds = array<i64: 1, 256>}, {pipeline_mode = #tpu.pipeline_mode<synchronous>, transform_indices = @transform_5, window_bounds = array<i64: 256, 128>}, {pipeline_mode = #tpu.pipeline_mode<synchronous>, transform_indices = @transform_6, window_bounds = array<i64: 1, 128>}, {transform_indices = @transform_7, window_bounds = array<i64: 2, 128>}]} {
    %c0_i32 = arith.constant 0 : i32
    %0 = arith.cmpi eq, %arg1, %c0_i32 : i32
    %1 = arith.extui %0 : i1 to i32
    %c0_i32_0 = arith.constant 0 : i32
    %2 = arith.cmpi ne, %1, %c0_i32_0 : i32
    scf.if %2 {
      %cst_9 = arith.constant 0.000000e+00 : f32
      %12 = vector.broadcast %cst_9 : f32 to vector<2x768xf32>
      %c0_10 = arith.constant 0 : index
      %c0_11 = arith.constant 0 : index
      %13 = vector.load %arg10[%c0_10, %c0_11] : memref<2x768xf32, #tpu.memory_space<vmem>>, vector<2x768xf32>
      tpu.vector_store %arg10[%c0_10, %c0_11], %12 {strides = array<i32>} : memref<2x768xf32, #tpu.memory_space<vmem>>, vector<2x768xf32>,
    } else {
    }
    %c0 = arith.constant 0 : index
    %c0_1 = arith.constant 0 : index
    %3 = vector.load %arg10[%c0, %c0_1] : memref<2x768xf32, #tpu.memory_space<vmem>>, vector<2x768xf32>
    %c0_2 = arith.constant 0 : index
    %c0_3 = arith.constant 0 : index
    %c0_4 = arith.constant 0 : index
    %4 = vector.load %arg2[%c0_2, %c0_3, %c0_4] : memref<2x8x768xbf16, #tpu.memory_space<vmem>>, vector<2x8x768xbf16>
    %5 = arith.extf %4 : vector<2x8x768xbf16> to vector<2x8x768xf32>
    %cst = arith.constant dense<0.000000e+00> : vector<2x768xf32>
    %6 = vector.multi_reduction <add>, %5, %cst [1] : vector<2x8x768xf32> to vector<2x768xf32>
    %7 = arith.addf %3, %6 : vector<2x768xf32>
    %c0_5 = arith.constant 0 : index
    %c0_6 = arith.constant 0 : index
    %8 = vector.load %arg10[%c0_5, %c0_6] : memref<2x768xf32, #tpu.memory_space<vmem>>, vector<2x768xf32>
    tpu.vector_store %arg10[%c0_5, %c0_6], %7 {strides = array<i32>} : memref<2x768xf32, #tpu.memory_space<vmem>>, vector<2x768xf32>,
    %c0_i32_7 = arith.constant 0 : i32
    %9 = arith.cmpi eq, %arg1, %c0_i32_7 : i32
    %10 = arith.extui %9 : i1 to i32
    %c0_i32_8 = arith.constant 0 : i32
    %11 = arith.cmpi ne, %10, %c0_i32_8 : i32
    scf.if %11 {
      %c0_9 = arith.constant 0 : index
      %c0_10 = arith.constant 0 : index
      %12 = vector.load %arg10[%c0_9, %c0_10] : memref<2x768xf32, #tpu.memory_space<vmem>>, vector<2x768xf32>
      %cst_11 = arith.constant 1.250000e-01 : f32
      %13 = vector.broadcast %cst_11 : f32 to vector<2x768xf32>
      %14 = arith.mulf %12, %13 : vector<2x768xf32>
      %c0_12 = arith.constant 0 : index
      %c0_13 = arith.constant 0 : index
      %15 = vector.load %arg3[%c0_12, %c0_13] : memref<768x512xf32, #tpu.memory_space<vmem>>, vector<768x512xf32>
      %cst_14 = arith.constant dense<0.000000e+00> : vector<2x512xf32>
      %16 = tpu.matmul %14, %15, %cst_14 {dimension_numbers = #tpu.dot_dimension_numbers<[1], [0], [0], [1], [0, 0, 1, 1], [], []>} : vector<2x768xf32>, vector<768x512xf32>, vector<2x512xf32> -> vector<2x512xf32>
      %c0_15 = arith.constant 0 : index
      %c0_16 = arith.constant 0 : index
      %17 = vector.load %arg4[%c0_15, %c0_16] : memref<1x512xf32, #tpu.memory_space<vmem>>, vector<1x512xf32>
      %18 = vector.broadcast %17 : vector<1x512xf32> to vector<2x512xf32>
      %19 = arith.addf %16, %18 : vector<2x512xf32>
      %cst_17 = arith.constant 0.000000e+00 : f32
      %20 = vector.broadcast %cst_17 : f32 to vector<2x512xf32>
      %21 = arith.maximumf %19, %20 : vector<2x512xf32>
      %c0_18 = arith.constant 0 : index
      %c0_19 = arith.constant 0 : index
      %22 = vector.load %arg5[%c0_18, %c0_19] : memref<512x256xf32, #tpu.memory_space<vmem>>, vector<512x256xf32>
      %cst_20 = arith.constant dense<0.000000e+00> : vector<2x256xf32>
      %23 = tpu.matmul %21, %22, %cst_20 {dimension_numbers = #tpu.dot_dimension_numbers<[1], [0], [0], [1], [0, 0, 1, 1], [], []>} : vector<2x512xf32>, vector<512x256xf32>, vector<2x256xf32> -> vector<2x256xf32>
      %c0_21 = arith.constant 0 : index
      %c0_22 = arith.constant 0 : index
      %24 = vector.load %arg6[%c0_21, %c0_22] : memref<1x256xf32, #tpu.memory_space<vmem>>, vector<1x256xf32>
      %25 = vector.broadcast %24 : vector<1x256xf32> to vector<2x256xf32>
      %26 = arith.addf %23, %25 : vector<2x256xf32>
      %cst_23 = arith.constant 0.000000e+00 : f32
      %27 = vector.broadcast %cst_23 : f32 to vector<2x256xf32>
      %28 = arith.maximumf %26, %27 : vector<2x256xf32>
      %c0_24 = arith.constant 0 : index
      %c0_25 = arith.constant 0 : index
      %29 = vector.load %arg7[%c0_24, %c0_25] : memref<256x128xf32, #tpu.memory_space<vmem>>, vector<256x128xf32>
      %cst_26 = arith.constant dense<0.000000e+00> : vector<2x128xf32>
      %30 = tpu.matmul %28, %29, %cst_26 {dimension_numbers = #tpu.dot_dimension_numbers<[1], [0], [0], [1], [0, 0, 1, 1], [], []>} : vector<2x256xf32>, vector<256x128xf32>, vector<2x128xf32> -> vector<2x128xf32>
      %c0_27 = arith.constant 0 : index
      %c0_28 = arith.constant 0 : index
      %31 = vector.load %arg8[%c0_27, %c0_28] : memref<1x128xf32, #tpu.memory_space<vmem>>, vector<1x128xf32>
      %32 = vector.broadcast %31 : vector<1x128xf32> to vector<2x128xf32>
      %33 = arith.addf %30, %32 : vector<2x128xf32>
      %c0_29 = arith.constant 0 : index
      %c0_30 = arith.constant 0 : index
      %34 = vector.load %arg9[%c0_29, %c0_30] : memref<2x128xf32, #tpu.memory_space<vmem>>, vector<2x128xf32>
      tpu.vector_store %arg9[%c0_29, %c0_30], %33 {strides = array<i32>} : memref<2x128xf32, #tpu.memory_space<vmem>>, vector<2x128xf32>,
    } else {
    }
    return
  }
  func.func @transform_0(%arg0: i32, %arg1: i32) -> (i32, i32, i32) {
    %c0_i32 = arith.constant 0 : i32
    %c0_i32_0 = arith.constant 0 : i32
    return %arg0, %arg1, %c0_i32 : i32, i32, i32
  }
  func.func @transform_1(%arg0: i32, %arg1: i32) -> (i32, i32) {
    %c0_i32 = arith.constant 0 : i32
    %c0_i32_0 = arith.constant 0 : i32
    %c0_i32_1 = arith.constant 0 : i32
    return %c0_i32, %c0_i32_0 : i32, i32
  }
  func.func @transform_2(%arg0: i32, %arg1: i32) -> (i32, i32) {
    %c0_i32 = arith.constant 0 : i32
    %c0_i32_0 = arith.constant 0 : i32
    %c0_i32_1 = arith.constant 0 : i32
    return %c0_i32, %c0_i32_0 : i32, i32
  }
  func.func @transform_3(%arg0: i32, %arg1: i32) -> (i32, i32) {
    %c0_i32 = arith.constant 0 : i32
    %c0_i32_0 = arith.constant 0 : i32
    %c0_i32_1 = arith.constant 0 : i32
    return %c0_i32, %c0_i32_0 : i32, i32
  }
  func.func @transform_4(%arg0: i32, %arg1: i32) -> (i32, i32) {
    %c0_i32 = arith.constant 0 : i32
    %c0_i32_0 = arith.constant 0 : i32
    %c0_i32_1 = arith.constant 0 : i32
    return %c0_i32, %c0_i32_0 : i32, i32
  }
  func.func @transform_5(%arg0: i32, %arg1: i32) -> (i32, i32) {
    %c0_i32 = arith.constant 0 : i32
    %c0_i32_0 = arith.constant 0 : i32
    %c0_i32_1 = arith.constant 0 : i32
    return %c0_i32, %c0_i32_0 : i32, i32
  }
  func.func @transform_6(%arg0: i32, %arg1: i32) -> (i32, i32) {
    %c0_i32 = arith.constant 0 : i32
    %c0_i32_0 = arith.constant 0 : i32
    %c0_i32_1 = arith.constant 0 : i32
    return %c0_i32, %c0_i32_0 : i32, i32
  }
  func.func @transform_7(%arg0: i32, %arg1: i32) -> (i32, i32) {
    %c0_i32 = arith.constant 0 : i32
    %c0_i32_0 = arith.constant 0 : i32
    return %arg0, %c0_i32 : i32, i32
  }
}

module attributes {stable_mosaic.version = 11 : i64} {
  func.func @kernel(%arg0: i32, %arg1: i32, %arg2: memref<2x8x768xbf16, #tpu.memory_space<vmem>>, %arg3: memref<768x512xf32, #tpu.memory_space<vmem>>, %arg4: memref<1x512xf32, #tpu.memory_space<vmem>>, %arg5: memref<512x256xf32, #tpu.memory_space<vmem>>, %arg6: memref<1x256xf32, #tpu.memory_space<vmem>>, %arg7: memref<256x128xf32, #tpu.memory_space<vmem>>, %arg8: memref<1x128xf32, #tpu.memory_space<vmem>>, %arg9: memref<2x128xf32, #tpu.memory_space<vmem>>, %arg10: memref<2x768xf32, #tpu.memory_space<vmem>>) attributes {dimension_semantics = [#tpu.dimension_semantics<parallel>, #tpu.dimension_semantics<arbitrary>], iteration_bounds = array<i64: 1, 1>, scalar_prefetch = 0 : i64, scratch_operands = 1 : i64, tpu.core_type = #tpu.core_type<tc>, window_params = [{transform_indices = @transform_0, window_bounds = array<i64: 2, 8, 768>}, {pipeline_mode = #tpu.pipeline_mode<synchronous>, transform_indices = @transform_1, window_bounds = array<i64: 768, 512>}, {pipeline_mode = #tpu.pipeline_mode<synchronous>, transform_indices = @transform_2, window_bounds = array<i64: 1, 512>}, {pipeline_mode = #tpu.pipeline_mode<synchronous>, transform_indices = @transform_3, window_bounds = array<i64: 512, 256>}, {pipeline_mode = #tpu.pipeline_mode<synchronous>, transform_indices = @transform_4, window_bounds = array<i64: 1, 256>}, {pipeline_mode = #tpu.pipeline_mode<synchronous>, transform_indices = @transform_5, window_bounds = array<i64: 256, 128>}, {pipeline_mode = #tpu.pipeline_mode<synchronous>, transform_indices = @transform_6, window_bounds = array<i64: 1, 128>}, {transform_indices = @transform_7, window_bounds = array<i64: 2, 128>}]} {
    %c0_i32 = arith.constant 0 : i32
    %0 = arith.cmpi eq, %arg1, %c0_i32 : i32
    %1 = arith.extui %0 : i1 to i32
    %c0_i32_0 = arith.constant 0 : i32
    %2 = arith.cmpi ne, %1, %c0_i32_0 : i32
    scf.if %2 {
      %cst_9 = arith.constant 0.000000e+00 : f32
      %12 = vector.broadcast %cst_9 : f32 to vector<2x768xf32>
      %c0_10 = arith.constant 0 : index
      %c0_11 = arith.constant 0 : index
      %13 = vector.load %arg10[%c0_10, %c0_11] : memref<2x768xf32, #tpu.memory_space<vmem>>, vector<2x768xf32>
      tpu.vector_store %arg10[%c0_10, %c0_11], %12 {strides = array<i32>} : memref<2x768xf32, #tpu.memory_space<vmem>>, vector<2x768xf32>,
    } else {
    }
    %c0 = arith.constant 0 : index
    %c0_1 = arith.constant 0 : index
    %3 = vector.load %arg10[%c0, %c0_1] : memref<2x768xf32, #tpu.memory_space<vmem>>, vector<2x768xf32>
    %c0_2 = arith.constant 0 : index
    %c0_3 = arith.constant 0 : index
    %c0_4 = arith.constant 0 : index
    %4 = vector.load %arg2[%c0_2, %c0_3, %c0_4] : memref<2x8x768xbf16, #tpu.memory_space<vmem>>, vector<2x8x768xbf16>
    %5 = arith.extf %4 : vector<2x8x768xbf16> to vector<2x8x768xf32>
    %cst = arith.constant dense<0.000000e+00> : vector<2x768xf32>
    %6 = vector.multi_reduction <add>, %5, %cst [1] : vector<2x8x768xf32> to vector<2x768xf32>
    %7 = arith.addf %3, %6 : vector<2x768xf32>
    %c0_5 = arith.constant 0 : index
    %c0_6 = arith.constant 0 : index
    %8 = vector.load %arg10[%c0_5, %c0_6] : memref<2x768xf32, #tpu.memory_space<vmem>>, vector<2x768xf32>
    tpu.vector_store %arg10[%c0_5, %c0_6], %7 {strides = array<i32>} : memref<2x768xf32, #tpu.memory_space<vmem>>, vector<2x768xf32>,
    %c0_i32_7 = arith.constant 0 : i32
    %9 = arith.cmpi eq, %arg1, %c0_i32_7 : i32
    %10 = arith.extui %9 : i1 to i32
    %c0_i32_8 = arith.constant 0 : i32
    %11 = arith.cmpi ne, %10, %c0_i32_8 : i32
    scf.if %11 {
      %c0_9 = arith.constant 0 : index
      %c0_10 = arith.constant 0 : index
      %12 = vector.load %arg10[%c0_9, %c0_10] : memref<2x768xf32, #tpu.memory_space<vmem>>, vector<2x768xf32>
      %cst_11 = arith.constant 1.250000e-01 : f32
      %13 = vector.broadcast %cst_11 : f32 to vector<2x768xf32>
      %14 = arith.mulf %12, %13 : vector<2x768xf32>
      %c0_12 = arith.constant 0 : index
      %c0_13 = arith.constant 0 : index
      %15 = vector.load %arg3[%c0_12, %c0_13] : memref<768x512xf32, #tpu.memory_space<vmem>>, vector<768x512xf32>
      %cst_14 = arith.constant dense<0.000000e+00> : vector<2x512xf32>
      %16 = tpu.matmul %14, %15, %cst_14 {dimension_numbers = #tpu.dot_dimension_numbers<[1], [0], [0], [1], [0, 0, 1, 1], [], []>} : vector<2x768xf32>, vector<768x512xf32>, vector<2x512xf32> -> vector<2x512xf32>
      %c0_15 = arith.constant 0 : index
      %c0_16 = arith.constant 0 : index
      %17 = vector.load %arg4[%c0_15, %c0_16] : memref<1x512xf32, #tpu.memory_space<vmem>>, vector<1x512xf32>
      %18 = vector.broadcast %17 : vector<1x512xf32> to vector<2x512xf32>
      %19 = arith.addf %16, %18 : vector<2x512xf32>
      %cst_17 = arith.constant 0.000000e+00 : f32
      %20 = vector.broadcast %cst_17 : f32 to vector<2x512xf32>
      %21 = arith.maximumf %19, %20 : vector<2x512xf32>
      %c0_18 = arith.constant 0 : index
      %c0_19 = arith.constant 0 : index
      %22 = vector.load %arg5[%c0_18, %c0_19] : memref<512x256xf32, #tpu.memory_space<vmem>>, vector<512x256xf32>
      %cst_20 = arith.constant dense<0.000000e+00> : vector<2x256xf32>
      %23 = tpu.matmul %21, %22, %cst_20 {dimension_numbers = #tpu.dot_dimension_numbers<[1], [0], [0], [1], [0, 0, 1, 1], [], []>} : vector<2x512xf32>, vector<512x256xf32>, vector<2x256xf32> -> vector<2x256xf32>
      %c0_21 = arith.constant 0 : index
      %c0_22 = arith.constant 0 : index
      %24 = vector.load %arg6[%c0_21, %c0_22] : memref<1x256xf32, #tpu.memory_space<vmem>>, vector<1x256xf32>
      %25 = vector.broadcast %24 : vector<1x256xf32> to vector<2x256xf32>
      %26 = arith.addf %23, %25 : vector<2x256xf32>
      %cst_23 = arith.constant 0.000000e+00 : f32
      %27 = vector.broadcast %cst_23 : f32 to vector<2x256xf32>
      %28 = arith.maximumf %26, %27 : vector<2x256xf32>
      %c0_24 = arith.constant 0 : index
      %c0_25 = arith.constant 0 : index
      %29 = vector.load %arg7[%c0_24, %c0_25] : memref<256x128xf32, #tpu.memory_space<vmem>>, vector<256x128xf32>
      %cst_26 = arith.constant dense<0.000000e+00> : vector<2x128xf32>
      %30 = tpu.matmul %28, %29, %cst_26 {dimension_numbers = #tpu.dot_dimension_numbers<[1], [0], [0], [1], [0, 0, 1, 1], [], []>} : vector<2x256xf32>, vector<256x128xf32>, vector<2x128xf32> -> vector<2x128xf32>
      %c0_27 = arith.constant 0 : index
      %c0_28 = arith.constant 0 : index
      %31 = vector.load %arg8[%c0_27, %c0_28] : memref<1x128xf32, #tpu.memory_space<vmem>>, vector<1x128xf32>
      %32 = vector.broadcast %31 : vector<1x128xf32> to vector<2x128xf32>
      %33 = arith.addf %30, %32 : vector<2x128xf32>
      %c0_29 = arith.constant 0 : index
      %c0_30 = arith.constant 0 : index
      %34 = vector.load %arg9[%c0_29, %c0_30] : memref<2x128xf32, #tpu.memory_space<vmem>>, vector<2x128xf32>
      tpu.vector_store %arg9[%c0_29, %c0_30], %33 {strides = array<i32>} : memref<2x128xf32, #tpu.memory_space<vmem>>, vector<2x128xf32>,
    } else {
    }
    return
  }
  func.func @transform_0(%arg0: i32, %arg1: i32) -> (i32, i32, i32) {
    %c0_i32 = arith.constant 0 : i32
    %c0_i32_0 = arith.constant 0 : i32
    return %arg0, %arg1, %c0_i32 : i32, i32, i32
  }
  func.func @transform_1(%arg0: i32, %arg1: i32) -> (i32, i32) {
    %c0_i32 = arith.constant 0 : i32
    %c0_i32_0 = arith.constant 0 : i32
    %c0_i32_1 = arith.constant 0 : i32
    return %c0_i32, %c0_i32_0 : i32, i32
  }
  func.func @transform_2(%arg0: i32, %arg1: i32) -> (i32, i32) {
    %c0_i32 = arith.constant 0 : i32
    %c0_i32_0 = arith.constant 0 : i32
    %c0_i32_1 = arith.constant 0 : i32
    return %c0_i32, %c0_i32_0 : i32, i32
  }
  func.func @transform_3(%arg0: i32, %arg1: i32) -> (i32, i32) {
    %c0_i32 = arith.constant 0 : i32
    %c0_i32_0 = arith.constant 0 : i32
    %c0_i32_1 = arith.constant 0 : i32
    return %c0_i32, %c0_i32_0 : i32, i32
  }
  func.func @transform_4(%arg0: i32, %arg1: i32) -> (i32, i32) {
    %c0_i32 = arith.constant 0 : i32
    %c0_i32_0 = arith.constant 0 : i32
    %c0_i32_1 = arith.constant 0 : i32
    return %c0_i32, %c0_i32_0 : i32, i32
  }
  func.func @transform_5(%arg0: i32, %arg1: i32) -> (i32, i32) {
    %c0_i32 = arith.constant 0 : i32
    %c0_i32_0 = arith.constant 0 : i32
    %c0_i32_1 = arith.constant 0 : i32
    return %c0_i32, %c0_i32_0 : i32, i32
  }
  func.func @transform_6(%arg0: i32, %arg1: i32) -> (i32, i32) {
    %c0_i32 = arith.constant 0 : i32
    %c0_i32_0 = arith.constant 0 : i32
    %c0_i32_1 = arith.constant 0 : i32
    return %c0_i32, %c0_i32_0 : i32, i32
  }
  func.func @transform_7(%arg0: i32, %arg1: i32) -> (i32, i32) {
    %c0_i32 = arith.constant 0 : i32
    %c0_i32_0 = arith.constant 0 : i32
    return %arg0, %c0_i32 : i32, i32
  }
}

</mosaic_0001>

<bundles_post_ra>
// kernel: tpu_custom_call.1
= control target key start
LH: loop header
LB: loop body
LE: loop exit
PB: predicated region body
PF: predicated region fallthrough
CT: control target
= control target key end

     0   :  { %12 = vsyncpa [#allocation4], 0  ;;  %s1960_s0 = inlined_call_operand.hbm [shape: bf16[2,8,768], index: 0, kind: input, shape index: {}]   ;;  %s1961_s1 = inlined_call_operand.hbm [shape: f32[768,512], index: 1, kind: input, shape index: {}]   ;;  %s1962_s2 = inlined_call_operand.hbm [shape: f32[1,512], index: 2, kind: input, shape index: {}]   ;;  %s1963_s3 = inlined_call_operand.hbm [shape: f32[512,256], index: 3, kind: input, shape index: {}]   ;;  %s1964_s4 = inlined_call_operand.hbm [shape: f32[1,256], index: 4, kind: input, shape index: {}]   ;;  %s1965_s5 = inlined_call_operand.hbm [shape: f32[256,128], index: 5, kind: input, shape index: {}]   ;;  %s1966_s6 = inlined_call_operand.hbm [shape: f32[1,128], index: 6, kind: input, shape index: {}]   ;;  %s1967_s7 = inlined_call_operand.hbm [shape: f32[2,128], index: 7, kind: output, shape index: {}]  }
   0x1   :  { %13 = vsyncpa [#allocation7], 0 }
   0x2   :  { %14 = vsyncpa [#allocation10], 0 }
   0x3   :  { %15 = vsyncpa [#allocation13], 0 }
   0x4   :  { %16 = vsyncpa [#allocation5], 0  ;;  %s1814_s24 = smov [#allocation6]  }
   0x5   :  { %s34_s25 = sshll.u32 %s1814_s24, 4  ;;  %s35_s25 = int_to_ptr.vmem [resolvable:$true] %s34_s25 }
   0x6   :  { %s1652_s26 = scalar_lea.vmem %s35_s25, 49152  ;;  %p1657_p1 = scmp.lt.s32.totalorder %s35_s25, %s35_s25 }
   0x7   :  { %p1653_p0 = scmp.ne.s32.totalorder %s35_s25, %s1652_s26  ;;  %p1658_p2 = scmp.lt.s32.totalorder %s1652_s26, %s1652_s26 }
   0x9   :  { %p1659_p3 = por %p1658_p2, %p1657_p1 }
   0xb   :  { %p1660_p4 = pnand %p1659_p3, %p1653_p0 }
   0xd   :  { %1663 = shalt.err (!%p1660_p4)
}
   0xe   :  { %s1815_s27 = smov 512   ;;  %s1816_s28 = smov 32  }
   0xf   :  { %40 = dma.hbm_to_vmem [thread:$0]  %s1961_s1, 49152, %s35_s25, [#allocation7], %s1815_s27, %s1815_s27, %s1816_s28  }
  0x10   :  { %s1817_s8 = smov [#allocation9]  }
  0x11   :  { %s56_s9 = sshll.u32 %s1817_s8, 4  ;;  %s57_s9 = int_to_ptr.vmem [resolvable:$true] %s56_s9 }
  0x12   :  { %s1672_s10 = scalar_lea.vmem %s57_s9, 16384  ;;  %p1677_p6 = scmp.lt.s32.totalorder %s57_s9, %s57_s9 }
  0x13   :  { %p1673_p5 = scmp.ne.s32.totalorder %s57_s9, %s1672_s10  ;;  %p1678_p7 = scmp.lt.s32.totalorder %s1672_s10, %s1672_s10 }
  0x15   :  { %p1679_p8 = por %p1678_p7, %p1677_p6 }
  0x17   :  { %p1680_p9 = pnand %p1679_p8, %p1673_p5 }
  0x19   :  { %1683 = shalt.err (!%p1680_p9)
}
  0x1a   :  { %s1818_s11 = smov 256   ;;  %s1819_s12 = smov 16  }
  0x1b   :  { %62 = dma.hbm_to_vmem [thread:$0]  %s1963_s3, 16384, %s57_s9, [#allocation10], %s1818_s11, %s1818_s11, %s1819_s12  }
  0x1c   :  { %s1820_s15 = smov [#allocation12]  }
  0x1d   :  { %s78_s16 = sshll.u32 %s1820_s15, 4  ;;  %s79_s16 = int_to_ptr.vmem [resolvable:$true] %s78_s16 }
  0x1e   :  { %s1692_s1 = scalar_lea.vmem %s79_s16, 4096  ;;  %p1697_p11 = scmp.lt.s32.totalorder %s79_s16, %s79_s16 }
  0x1f   :  { %p1693_p10 = scmp.ne.s32.totalorder %s79_s16, %s1692_s1  ;;  %p1698_p12 = scmp.lt.s32.totalorder %s1692_s1, %s1692_s1 }
  0x21   :  { %p1699_p13 = por %p1698_p12, %p1697_p11 }
  0x23   :  { %p1700_p0 = pnand %p1699_p13, %p1693_p10 }
  0x25   :  { %1703 = shalt.err (!%p1700_p0)
}
  0x26   :  { %s1821_s17 = smov 128   ;;  %s1822_s18 = smov 8  }
  0x27   :  { %84 = dma.hbm_to_vmem [thread:$0]  %s1965_s5, 4096, %s79_s16, [#allocation13], %s1821_s17, %s1821_s17, %s1822_s18  }
  0x28   :  { %s1823_s21 = smov [#allocation3]  }
  0x29   :  { %s22_s22 = sshll.u32 %s1823_s21, 4  ;;  %s23_s22 = int_to_ptr.vmem [resolvable:$true] %s22_s22 }
  0x2a   :  { %s1712_s3 = scalar_lea.vmem %s23_s22, 768  ;;  %p1717_p2 = scmp.lt.s32.totalorder %s23_s22, %s23_s22 }
  0x2b   :  { %p1713_p1 = scmp.ne.s32.totalorder %s23_s22, %s1712_s3  ;;  %p1718_p3 = scmp.lt.s32.totalorder %s1712_s3, %s1712_s3 }
  0x2d   :  { %p1719_p4 = por %p1718_p3, %p1717_p2 }
  0x2f   :  { %p1720_p5 = pnand %p1719_p4, %p1713_p1 }
  0x31   :  { %1723 = shalt.err (!%p1720_p5)
}
  0x32   :  { %s1824_s23 = smov 384   ;;  %s1825_s24 = smov 24  }
  0x33   :  { %28 = dma.hbm_to_vmem [thread:$0]  %s1960_s0, 768, %s23_s22, [#allocation4], %s1824_s23, %s1824_s23, %s1825_s24  }
  0x34   :  { %s1826_s27 = smov [#allocation8]   ;;  %s1827_s29 = smov [#allocation11]  }
  0x35   :  { %s47_s28 = sshll.u32 %s1826_s27, 4  ;;  %s69_s5 = sshll.u32 %s1827_s29, 4  ;;  %s48_s28 = int_to_ptr.vmem [resolvable:$true] %s47_s28  ;;  %s70_s5 = int_to_ptr.vmem [resolvable:$true] %s69_s5 }
  0x36   :  { %s1732_s30 = scalar_lea.vmem %s48_s28, 64  ;;  %p1737_p7 = scmp.lt.s32.totalorder %s48_s28, %s48_s28 }
  0x37   :  { %p1733_p6 = scmp.ne.s32.totalorder %s48_s28, %s1732_s30  ;;  %p1738_p8 = scmp.lt.s32.totalorder %s1732_s30, %s1732_s30 }
  0x39   :  { %p1739_p9 = por %p1738_p8, %p1737_p7 }
  0x3b   :  { %p1740_p10 = pnand %p1739_p9, %p1733_p6 }
  0x3d   :  { %1743 = shalt.err (!%p1740_p10)
}
  0x3e   :  { %50 = dma.hbm_to_vmem [thread:$0]  %s1962_s2, 64, %s48_s28, [#allocation7]  }
  0x3f   :  { %s1752_s10 = scalar_lea.vmem %s70_s5, 32  ;;  %p1757_p12 = scmp.lt.s32.totalorder %s70_s5, %s70_s5 }
  0x40   :  { %p1753_p11 = scmp.ne.s32.totalorder %s70_s5, %s1752_s10  ;;  %p1758_p13 = scmp.lt.s32.totalorder %s1752_s10, %s1752_s10 }
  0x42   :  { %p1759_p0 = por %p1758_p13, %p1757_p12 }
  0x44   :  { %p1760_p1 = pnand %p1759_p0, %p1753_p11 }
  0x46   :  { %1763 = shalt.err (!%p1760_p1)
}
  0x47   :  { %72 = dma.hbm_to_vmem [thread:$0]  %s1964_s4, 32, %s70_s5, [#allocation10]  }
  0x48   :  { %s1828_s12 = smov [#allocation14]  }
  0x49   :  { %s91_s13 = sshll.u32 %s1828_s12, 4  ;;  %s92_s13 = int_to_ptr.vmem [resolvable:$true] %s91_s13 }
  0x4a   :  { %s1772_s14 = scalar_lea.vmem %s92_s13, 16  ;;  %s1776_s15 = scalar_lea.vmem %s92_s13, 32 }
  0x4b   :  { %p1773_p2 = scmp.ne.s32.totalorder %s92_s13, %s1772_s14  ;;  %p1777_p3 = scmp.lt.s32.totalorder %s92_s13, %s92_s13 }
  0x4c   :  { %p1778_p4 = scmp.lt.s32.totalorder %s1776_s15, %s1772_s14 }
  0x4e   :  { %p1779_p5 = por %p1778_p4, %p1777_p3 }
  0x50   :  { %p1780_p6 = pnand %p1779_p5, %p1773_p2 }
  0x52   :  { %1783 = shalt.err (!%p1780_p6)
}
  0x53   :  { %94 = dma.hbm_to_vmem [thread:$0]  %s1966_s6, 16, %s92_s13, [#allocation13]  }
  0x54   :  { %1804 = dma.done.wait [#allocation4], 768  }
  0x55   :  { %1805 = vsyncadd [#allocation4], 4294966528 }
  0x56   :  { %1806 = dma.done.wait [#allocation7], 49216  }
  0x57   :  { %1807 = vsyncadd [#allocation7], 4294918080 }
  0x58   :  { %1808 = dma.done.wait [#allocation10], 16416  }
  0x59   :  { %1809 = vsyncadd [#allocation10], 4294950880 }
  0x5a   :  { %1810 = dma.done.wait [#allocation13], 4112  }
  0x5b   :  { %1811 = vsyncadd [#allocation13], 4294963184  ;;  %v1829_v0 = vmov 0.0   ;;  %v370_v1 = vld [vmem:[#allocation6 + $0x1e8] sm:$0xff]  ;;  %v369_v3 = vld [vmem:[#allocation6 + $0x1e0] sm:$0xff]  ;;  %vm281_vm0 = vcmask 1041409  }
  0x5c   :  { %121 = vst [vmem:[#allocation2 + $0x8] sm:$0xf] %v1829_v0  ;;  %v498_v2 = vld [vmem:[#allocation6 + $0x5e8] sm:$0xff]  ;;  %748 = vmatprep.subr.mxu0 %v370_v1  ;;  %v497_v4 = vld [vmem:[#allocation6 + $0x5e0] sm:$0xff]  ;;  %vm283_vm1 = vcmask 1043459   ;;  %vm285_vm2 = vcmask 1045509  }
  0x5d   :  { %819 = vmatprep.subr.mxu1 %v498_v2  ;;  %v366_v5 = vld [vmem:[#allocation6 + $0x1c8] sm:$0xff]  ;;  %749 = vmatpush1.msra.mxu0 %v369_v3  ;;  %v365_v7 = vld [vmem:[#allocation6 + $0x1c0] sm:$0xff]  ;;  %vm287_vm3 = vcmask 1047559   ;;  %s1831_s4 = smov [#allocation15]  }
  0x5e   :  { %v494_v6 = vld [vmem:[#allocation6 + $0x5c8] sm:$0xff]  ;;  %820 = vmatpush1.msra.mxu1 %v497_v4  ;;  %v493_v8 = vld [vmem:[#allocation6 + $0x5c0] sm:$0xff]  ;;  %750 = vmatprep.subr.mxu0 %v366_v5  ;;  %s1578_s6 = sshll.u32 %s1831_s4, 4  ;;  %s1579_s6 = int_to_ptr.vmem [resolvable:$true] %s1578_s6 }
  0x5f   :  { %v362_v9 = vld [vmem:[#allocation6 + $0x1a8] sm:$0xff]  ;;  %821 = vmatprep.subr.mxu1 %v494_v6  ;;  %v361_v11 = vld [vmem:[#allocation6 + $0x1a0] sm:$0xff]  ;;  %751 = vmatpush1.msra.mxu0 %v365_v7  ;;  %s1784_s1 = scalar_lea.vmem %s1579_s6, 32  ;;  %p1789_p8 = scmp.lt.s32.totalorder %s1579_s6, %s1579_s6 }
  0x60   :  { %v490_v10 = vld [vmem:[#allocation6 + $0x5a8] sm:$0xff]  ;;  %v489_v12 = vld [vmem:[#allocation6 + $0x5a0] sm:$0xff]  ;;  %822 = vmatpush1.msra.mxu1 %v493_v8  ;;  %752 = vmatprep.subr.mxu0 %v362_v9  ;;  %p1785_p7 = scmp.ne.s32.totalorder %s1579_s6, %s1784_s1  ;;  %p1790_p9 = scmp.lt.s32.totalorder %s1784_s1, %s1784_s1 }
  0x61   :  { %v358_v13 = vld [vmem:[#allocation6 + $0x188] sm:$0xff]  ;;  %823 = vmatprep.subr.mxu1 %v490_v10  ;;  %v357_v15 = vld [vmem:[#allocation6 + $0x180] sm:$0xff]  ;;  %753 = vmatpush1.msra.mxu0 %v361_v11  ;;  %v1830_v11 = vmov 1983009808  }
  0x62   :  { %v486_v14 = vld [vmem:[#allocation6 + $0x588] sm:$0xff]  ;;  %v485_v16 = vld [vmem:[#allocation6 + $0x580] sm:$0xff]  ;;  %824 = vmatpush1.msra.mxu1 %v489_v12  ;;  %754 = vmatprep.subr.mxu0 %v358_v13  ;;  %v229_v12 = vunpack.c.l.s4 %v1830_v11  ;;  %v231_v13 = vlaneseq  ;;  %p1791_p10 = por %p1790_p9, %p1789_p8 }
  0x63   :  { %v354_v17 = vld [vmem:[#allocation6 + $0x168] sm:$0xff]  ;;  %825 = vmatprep.subr.mxu1 %v486_v14  ;;  %v353_v19 = vld [vmem:[#allocation6 + $0x160] sm:$0xff]  ;;  %755 = vmatpush1.msra.mxu0 %v357_v15 }
  0x64   :  { %v482_v18 = vld [vmem:[#allocation6 + $0x568] sm:$0xff]  ;;  %v481_v20 = vld [vmem:[#allocation6 + $0x560] sm:$0xff]  ;;  %826 = vmatpush1.msra.mxu1 %v485_v16  ;;  %756 = vmatprep.subr.mxu0 %v354_v17  ;;  %p1792_p11 = pnand %p1791_p10, %p1785_p7 }
  0x65   :  { %v350_v21 = vld [vmem:[#allocation6 + $0x148] sm:$0xff]  ;;  %827 = vmatprep.subr.mxu1 %v482_v18  ;;  %v349_v23 = vld [vmem:[#allocation6 + $0x140] sm:$0xff]  ;;  %757 = vmatpush1.msra.mxu0 %v353_v19 }
  0x66   :  { %v478_v22 = vld [vmem:[#allocation6 + $0x548] sm:$0xff]  ;;  %v477_v24 = vld [vmem:[#allocation6 + $0x540] sm:$0xff]  ;;  %828 = vmatpush1.msra.mxu1 %v481_v20  ;;  %758 = vmatprep.subr.mxu0 %v350_v21 }
  0x67   :  { %v346_v25 = vld [vmem:[#allocation6 + $0x128] sm:$0xff]  ;;  %829 = vmatprep.subr.mxu1 %v478_v22  ;;  %v345_v27 = vld [vmem:[#allocation6 + $0x120] sm:$0xff]  ;;  %759 = vmatpush1.msra.mxu0 %v349_v23  ;;  %v230_v22 = vunpack.c.0.s8 %v229_v12  ;;  %v1893_v23 = vshrl.u32 %v231_v13, 7 }
  0x68   :  { %v474_v26 = vld [vmem:[#allocation6 + $0x528] sm:$0xff]  ;;  %v473_v28 = vld [vmem:[#allocation6 + $0x520] sm:$0xff]  ;;  %830 = vmatpush1.msra.mxu1 %v477_v24  ;;  %760 = vmatprep.subr.mxu0 %v346_v25 }
  0x69   :  { %v342_v29 = vld [vmem:[#allocation6 + $0x108] sm:$0xff]  ;;  %831 = vmatprep.subr.mxu1 %v474_v26  ;;  %v341_v31 = vld [vmem:[#allocation6 + $0x100] sm:$0xff]  ;;  %761 = vmatpush1.msra.mxu0 %v345_v27 }
  0x6a   :  { %v470_v30 = vld [vmem:[#allocation6 + $0x508] sm:$0xff]  ;;  %v469_v32 = vld [vmem:[#allocation6 + $0x500] sm:$0xff]  ;;  %832 = vmatpush1.msra.mxu1 %v473_v28  ;;  %762 = vmatprep.subr.mxu0 %v342_v29 }
  0x6b   :  { %v338_v33 = vld [vmem:[#allocation6 + $0xe8] sm:$0xff]  ;;  %833 = vmatprep.subr.mxu1 %v470_v30  ;;  %v337_v35 = vld [vmem:[#allocation6 + $0xe0] sm:$0xff]  ;;  %763 = vmatpush1.msra.mxu0 %v341_v31 }
  0x6c   :  { %v466_v34 = vld [vmem:[#allocation6 + $0x4e8] sm:$0xff]  ;;  %v465_v36 = vld [vmem:[#allocation6 + $0x4e0] sm:$0xff]  ;;  %834 = vmatpush1.msra.mxu1 %v469_v32  ;;  %764 = vmatprep.subr.mxu0 %v338_v33  ;;  %v124_v33 = vld [vmem:[#allocation3] sm:$0xff] }
  0x6d   :  { %v334_v37 = vld [vmem:[#allocation6 + $0xc8] sm:$0xff]  ;;  %835 = vmatprep.subr.mxu1 %v466_v34  ;;  %v333_v39 = vld [vmem:[#allocation6 + $0xc0] sm:$0xff]  ;;  %765 = vmatpush1.msra.mxu0 %v337_v35  ;;  %v125_v34 = vld [vmem:[#allocation3 + $0x8] sm:$0xff]  ;;  %v1896_v35 = vsub.s32 %v230_v22, %v1893_v23 }
  0x6e   :  { %v462_v38 = vld [vmem:[#allocation6 + $0x4c8] sm:$0xff]  ;;  %v461_v40 = vld [vmem:[#allocation6 + $0x4c0] sm:$0xff]  ;;  %836 = vmatpush1.msra.mxu1 %v465_v36  ;;  %766 = vmatprep.subr.mxu0 %v334_v37 }
  0x6f   :  { %v330_v41 = vld [vmem:[#allocation6 + $0xa8] sm:$0xff]  ;;  %837 = vmatprep.subr.mxu1 %v462_v38  ;;  %v329_v43 = vld [vmem:[#allocation6 + $0xa0] sm:$0xff]  ;;  %767 = vmatpush1.msra.mxu0 %v333_v39  ;;  %v128_v38 = vld [vmem:[#allocation3 + $0x20] sm:$0xff]  ;;  %v130_v39 = vunpack.c.l.bf16 %v124_v33 }
  0x70   :  { %v458_v42 = vld [vmem:[#allocation6 + $0x4a8] sm:$0xff]  ;;  %v457_v44 = vld [vmem:[#allocation6 + $0x4a0] sm:$0xff]  ;;  %838 = vmatpush1.msra.mxu1 %v461_v40  ;;  %768 = vmatprep.subr.mxu0 %v330_v41  ;;  %v131_v40 = vunpack.c.h.bf16 %v124_v33  ;;  %v132_v41 = vunpack.c.l.bf16 %v125_v34 }
  0x71   :  { %v326_v45 = vld [vmem:[#allocation6 + $0x88] sm:$0xff]  ;;  %839 = vmatprep.subr.mxu1 %v458_v42  ;;  %v325_v47 = vld [vmem:[#allocation6 + $0x80] sm:$0xff]  ;;  %769 = vmatpush1.msra.mxu0 %v329_v43  ;;  %v133_v42 = vunpack.c.h.bf16 %v125_v34 }
  0x72   :  { %v454_v46 = vld [vmem:[#allocation6 + $0x488] sm:$0xff]  ;;  %v453_v48 = vld [vmem:[#allocation6 + $0x480] sm:$0xff]  ;;  %840 = vmatpush1.msra.mxu1 %v457_v44  ;;  %770 = vmatprep.subr.mxu0 %v326_v45 }
  0x73   :  { %v322_v49 = vld [vmem:[#allocation6 + $0x68] sm:$0xff]  ;;  %841 = vmatprep.subr.mxu1 %v454_v46  ;;  %v321_v51 = vld [vmem:[#allocation6 + $0x60] sm:$0xff]  ;;  %771 = vmatpush1.msra.mxu0 %v325_v47  ;;  %v138_v47 = vunpack.c.l.bf16 %v128_v38 }
  0x74   :  { %v450_v50 = vld [vmem:[#allocation6 + $0x468] sm:$0xff]  ;;  %v449_v52 = vld [vmem:[#allocation6 + $0x460] sm:$0xff]  ;;  %842 = vmatpush1.msra.mxu1 %v453_v48  ;;  %772 = vmatprep.subr.mxu0 %v322_v49  ;;  %v139_v48 = vunpack.c.h.bf16 %v128_v38 }
  0x75   :  { %v318_v53 = vld [vmem:[#allocation6 + $0x48] sm:$0xff]  ;;  %843 = vmatprep.subr.mxu1 %v450_v50  ;;  %v317_v55 = vld [vmem:[#allocation6 + $0x40] sm:$0xff]  ;;  %773 = vmatpush1.msra.mxu0 %v321_v51  ;;  %v142_v51 = vrot.slane %v130_v39, 4 }
  0x76   :  { %v446_v54 = vld [vmem:[#allocation6 + $0x448] sm:$0xff]  ;;  %v445_v56 = vld [vmem:[#allocation6 + $0x440] sm:$0xff]  ;;  %844 = vmatpush1.msra.mxu1 %v449_v52  ;;  %774 = vmatprep.subr.mxu0 %v318_v53  ;;  %v148_v52 = vrot.slane %v131_v40, 4  ;;  %v154_v53 = vrot.slane %v132_v41, 4 }
  0x77   :  { %v314_v57 = vld [vmem:[#allocation6 + $0x28] sm:$0xff]  ;;  %845 = vmatprep.subr.mxu1 %v446_v54  ;;  %v313_v59 = vld [vmem:[#allocation6 + $0x20] sm:$0xff]  ;;  %775 = vmatpush1.msra.mxu0 %v317_v55  ;;  %v160_v54 = vrot.slane %v133_v42, 4 }
  0x78   :  { %v442_v58 = vld [vmem:[#allocation6 + $0x428] sm:$0xff]  ;;  %v441_v60 = vld [vmem:[#allocation6 + $0x420] sm:$0xff]  ;;  %846 = vmatpush1.msra.mxu1 %v445_v56  ;;  %776 = vmatprep.subr.mxu0 %v314_v57 }
  0x79   :  { %v310_v61 = vld [vmem:[#allocation6 + $0x8] sm:$0xff]  ;;  %847 = vmatprep.subr.mxu1 %v442_v58  ;;  %v309_v63 = vld [vmem:[#allocation6] sm:$0xff]  ;;  %777 = vmatpush1.msra.mxu0 %v313_v59  ;;  %v190_v59 = vrot.slane %v138_v47, 4 }
  0x7a   :  { %v438_v62 = vld [vmem:[#allocation6 + $0x408] sm:$0xff]  ;;  %v437_v0 = vld [vmem:[#allocation6 + $0x400] sm:$0xff]  ;;  %848 = vmatpush1.msra.mxu1 %v441_v60  ;;  %778 = vmatprep.subr.mxu0 %v310_v61  ;;  %v196_v60 = vrot.slane %v139_v48, 4 }
  0x7b   :  { %v434_v1 = vld [vmem:[#allocation6 + $0x3e8] sm:$0xff]  ;;  %849 = vmatprep.subr.mxu1 %v438_v62  ;;  %v433_v3 = vld [vmem:[#allocation6 + $0x3e0] sm:$0xff]  ;;  %779 = vmatpush1.msra.mxu0 %v309_v63  ;;  %v143_v63 = vadd.f32 %v142_v51, %v130_v39  ;;  %v191_v12 = vadd.f32 %v190_v59, %v138_v47 }
  0x7c   :  { %v562_v2 = vld [vmem:[#allocation6 + $0x7e8] sm:$0xff]  ;;  %v561_v4 = vld [vmem:[#allocation6 + $0x7e0] sm:$0xff]  ;;  %850 = vmatpush1.msra.mxu1 %v437_v0  ;;  %780 = vmatprep.subr.mxu0 %v434_v1  ;;  %v149_v0 = vadd.f32 %v148_v52, %v131_v40  ;;  %v155_v1 = vadd.f32 %v154_v53, %v132_v41 }
  0x7d   :  { %v430_v5 = vld [vmem:[#allocation6 + $0x3c8] sm:$0xff]  ;;  %851 = vmatprep.subr.mxu1 %v562_v2  ;;  %v429_v7 = vld [vmem:[#allocation6 + $0x3c0] sm:$0xff]  ;;  %781 = vmatpush2.msra.mxu0 %v433_v3 }
  0x7e   :  { %v558_v6 = vld [vmem:[#allocation6 + $0x7c8] sm:$0xff]  ;;  %v557_v8 = vld [vmem:[#allocation6 + $0x7c0] sm:$0xff]  ;;  %852 = vmatpush2.msra.mxu1 %v561_v4  ;;  %782 = vmatprep.subr.mxu0 %v430_v5  ;;  %v161_v4 = vadd.f32 %v160_v54, %v133_v42  ;;  %v156_v11 = vrot.slane %v155_v1, 2 }
  0x7f   :  { %v426_v9 = vld [vmem:[#allocation6 + $0x3a8] sm:$0xff]  ;;  %853 = vmatprep.subr.mxu1 %v558_v6  ;;  %v425_v14 = vld [vmem:[#allocation6 + $0x3a0] sm:$0xff]  ;;  %783 = vmatpush2.msra.mxu0 %v429_v7 }
  0x80   :  { %v554_v10 = vld [vmem:[#allocation6 + $0x7a8] sm:$0xff]  ;;  %v553_v15 = vld [vmem:[#allocation6 + $0x7a0] sm:$0xff]  ;;  %854 = vmatpush2.msra.mxu1 %v557_v8  ;;  %784 = vmatprep.subr.mxu0 %v426_v9  ;;  %v144_v9 = vrot.slane %v143_v63, 2 }
  0x81   :  { %v422_v16 = vld [vmem:[#allocation6 + $0x388] sm:$0xff]  ;;  %855 = vmatprep.subr.mxu1 %v554_v10  ;;  %v421_v18 = vld [vmem:[#allocation6 + $0x380] sm:$0xff]  ;;  %785 = vmatpush2.msra.mxu0 %v425_v14  ;;  %v150_v10 = vrot.slane %v149_v0, 2 }
  0x82   :  { %v550_v17 = vld [vmem:[#allocation6 + $0x788] sm:$0xff]  ;;  %v549_v19 = vld [vmem:[#allocation6 + $0x780] sm:$0xff]  ;;  %856 = vmatpush2.msra.mxu1 %v553_v15  ;;  %786 = vmatprep.subr.mxu0 %v422_v16  ;;  %v162_v15 = vrot.slane %v161_v4, 2 }
  0x83   :  { %v418_v20 = vld [vmem:[#allocation6 + $0x368] sm:$0xff]  ;;  %857 = vmatprep.subr.mxu1 %v550_v17  ;;  %v417_v24 = vld [vmem:[#allocation6 + $0x360] sm:$0xff]  ;;  %787 = vmatpush2.msra.mxu0 %v421_v18  ;;  %v197_v18 = vadd.f32 %v196_v60, %v139_v48  ;;  %v151_v22 = vadd.f32 %v150_v10, %v149_v0 }
  0x84   :  { %v546_v21 = vld [vmem:[#allocation6 + $0x768] sm:$0xff]  ;;  %v545_v25 = vld [vmem:[#allocation6 + $0x760] sm:$0xff]  ;;  %858 = vmatpush2.msra.mxu1 %v549_v19  ;;  %788 = vmatprep.subr.mxu0 %v418_v20 }
  0x85   :  { %v414_v26 = vld [vmem:[#allocation6 + $0x348] sm:$0xff]  ;;  %v413_v28 = vld [vmem:[#allocation6 + $0x340] sm:$0xff]  ;;  %859 = vmatprep.subr.mxu1 %v546_v21  ;;  %789 = vmatpush2.msra.mxu0 %v417_v24  ;;  %v145_v21 = vadd.f32 %v144_v9, %v143_v63  ;;  %v157_v24 = vadd.f32 %v156_v11, %v155_v1 }
  0x86   :  { %v542_v27 = vld [vmem:[#allocation6 + $0x748] sm:$0xff]  ;;  %v541_v29 = vld [vmem:[#allocation6 + $0x740] sm:$0xff]  ;;  %860 = vmatpush2.msra.mxu1 %v545_v25  ;;  %790 = vmatprep.subr.mxu0 %v414_v26  ;;  %v192_v25 = vrot.slane %v191_v12, 2 }
  0x87   :  { %v410_v30 = vld [vmem:[#allocation6 + $0x328] sm:$0xff]  ;;  %v409_v32 = vld [vmem:[#allocation6 + $0x320] sm:$0xff]  ;;  %861 = vmatprep.subr.mxu1 %v542_v27  ;;  %791 = vmatpush2.msra.mxu0 %v413_v28  ;;  %v163_v28 = vadd.f32 %v162_v15, %v161_v4  ;;  %v146_v34 = vrot.slane %v145_v21, 1 }
  0x88   :  { %v538_v31 = vld [vmem:[#allocation6 + $0x728] sm:$0xff]  ;;  %v537_v36 = vld [vmem:[#allocation6 + $0x720] sm:$0xff]  ;;  %862 = vmatpush2.msra.mxu1 %v541_v29  ;;  %792 = vmatprep.subr.mxu0 %v410_v30  ;;  %v193_v38 = vadd.f32 %v192_v25, %v191_v12 }
  0x89   :  { %v127_v37 = vld [vmem:[#allocation3 + $0x18] sm:$0xff]  ;;  %863 = vmatprep.subr.mxu1 %v538_v31  ;;  %v405_v49 = vld [vmem:[#allocation6 + $0x300] sm:$0xff]  ;;  %793 = vmatpush2.msra.mxu0 %v409_v32  ;;  %v198_v31 = vrot.slane %v197_v18, 2  ;;  %v164_v41 = vrot.slane %v163_v28, 1  ;;  %v147_v47 = vadd.f32 %v146_v34, %v145_v21 }
  0x8a   :  { %v406_v43 = vld [vmem:[#allocation6 + $0x308] sm:$0xff]  ;;  %v136_v45 = vunpack.c.l.bf16 %v127_v37  ;;  %v137_v46 = vunpack.c.h.bf16 %v127_v37  ;;  %v533_v50 = vld [vmem:[#allocation6 + $0x700] sm:$0xff]  ;;  %864 = vmatpush2.msra.mxu1 %v537_v36  ;;  %v152_v36 = vrot.slane %v151_v22, 1  ;;  %v158_v37 = vrot.slane %v157_v24, 1 }
  0x8b   :  { %v534_v44 = vld [vmem:[#allocation6 + $0x708] sm:$0xff]  ;;  %794 = vmatprep.subr.mxu0 %v406_v43  ;;  %v401_v61 = vld [vmem:[#allocation6 + $0x2e0] sm:$0xff]  ;;  %v165_v53 = vadd.f32 %v164_v41, %v163_v28 }
  0x8c   :  { %v402_v55 = vld [vmem:[#allocation6 + $0x2e8] sm:$0xff]  ;;  %v178_v57 = vrot.slane %v136_v45, 4  ;;  %v184_v58 = vrot.slane %v137_v46, 4  ;;  %865 = vmatprep.subr.mxu1 %v534_v44  ;;  %v529_v62 = vld [vmem:[#allocation6 + $0x6e0] sm:$0xff]  ;;  %795 = vmatpush2.msra.mxu0 %v405_v49  ;;  %v199_v44 = vadd.f32 %v198_v31, %v197_v18  ;;  %v153_v48 = vadd.f32 %v152_v36, %v151_v22  ;;  %v371_v31 = vld [vmem:[#allocation6 + $0x1f0] sm:$0xff] }
  0x8d   :  { %v530_v56 = vld [vmem:[#allocation6 + $0x6e8] sm:$0xff]  ;;  %866 = vmatpush2.msra.mxu1 %v533_v50  ;;  %796 = vmatprep.subr.mxu0 %v402_v55  ;;  %v397_v7 = vld [vmem:[#allocation6 + $0x2c0] sm:$0xff]  ;;  %v159_v49 = vadd.f32 %v158_v37, %v157_v24  ;;  %v194_v50 = vrot.slane %v193_v38, 1  ;;  %v367_v36 = vld [vmem:[#allocation6 + $0x1d0] sm:$0xff] }
  0x8e   :  { %v398_v2 = vld [vmem:[#allocation6 + $0x2c8] sm:$0xff]  ;;  %v179_v5 = vadd.f32 %v178_v57, %v136_v45  ;;  %v185_v6 = vadd.f32 %v184_v58, %v137_v46  ;;  %867 = vmatprep.subr.mxu1 %v530_v56  ;;  %v525_v8 = vld [vmem:[#allocation6 + $0x6c0] sm:$0xff]  ;;  %797 = vmatpush2.msra.mxu0 %v401_v61  ;;  %v200_v56 = vrot.slane %v199_v44, 1  ;;  %v226_v60 = vcombine.low %v147_v47, %v153_v48  ;;  %v129_v47 = vld [vmem:[#allocation3 + $0x28] sm:$0xff] }
  0x8f   :  { %v526_v3 = vld [vmem:[#allocation6 + $0x6c8] sm:$0xff]  ;;  %868 = vmatpush2.msra.mxu1 %v529_v62  ;;  %798 = vmatprep.subr.mxu0 %v398_v2  ;;  %v393_v19 = vld [vmem:[#allocation6 + $0x2a0] sm:$0xff]  ;;  %v195_v59 = vadd.f32 %v194_v50, %v193_v38  ;;  %v227_v0 = vcombine.low %v159_v49, %v165_v53  ;;  %v364_v38 = vld [vmem:[#allocation6 + $0x1b8] sm:$0xff]  ;;  %v141_v53 = vunpack.c.h.bf16 %v129_v47 }
  0x90   :  { %v394_v13 = vld [vmem:[#allocation6 + $0x2a8] sm:$0xff]  ;;  %v180_v16 = vrot.slane %v179_v5, 2  ;;  %v186_v17 = vrot.slane %v185_v6, 2  ;;  %869 = vmatprep.subr.mxu1 %v526_v3  ;;  %v521_v20 = vld [vmem:[#allocation6 + $0x6a0] sm:$0xff]  ;;  %799 = vmatpush2.msra.mxu0 %v397_v7  ;;  %v201_v63 = vadd.f32 %v200_v56, %v199_v44  ;;  %v234_v4 = vrot.slane %v226_v60, %v1896_v35  ;;  %v356_v48 = vld [vmem:[#allocation6 + $0x178] sm:$0xff] }
  0x91   :  { %v522_v14 = vld [vmem:[#allocation6 + $0x6a8] sm:$0xff]  ;;  %870 = vmatpush2.msra.mxu1 %v525_v8  ;;  %800 = vmatprep.subr.mxu0 %v394_v13  ;;  %v389_v32 = vld [vmem:[#allocation6 + $0x280] sm:$0xff]  ;;  %v241_v7 = vrot.slane %v227_v0, %v1896_v35  ;;  %v352_v56 = vld [vmem:[#allocation6 + $0x158] sm:$0xff] }
  0x92   :  { %v390_v26 = vld [vmem:[#allocation6 + $0x288] sm:$0xff]  ;;  %v181_v29 = vadd.f32 %v180_v16, %v179_v5  ;;  %v187_v30 = vadd.f32 %v186_v17, %v185_v6  ;;  %871 = vmatprep.subr.mxu1 %v522_v14  ;;  %v517_v33 = vld [vmem:[#allocation6 + $0x680] sm:$0xff]  ;;  %801 = vmatpush2.msra.mxu0 %v393_v19  ;;  %v252_v8 = vcombine.low %v195_v59, %v201_v63  ;;  %v372_v14 = vld [vmem:[#allocation6 + $0x1f8] sm:$0xff] }
  0x93   :  { %v518_v27 = vld [vmem:[#allocation6 + $0x688] sm:$0xff]  ;;  %872 = vmatpush2.msra.mxu1 %v521_v20  ;;  %802 = vmatprep.subr.mxu0 %v390_v26  ;;  %v385_v45 = vld [vmem:[#allocation6 + $0x260] sm:$0xff]  ;;  %v242_v15 = vcombine.low %v234_v4, %v241_v7  ;;  %v348_v0 = vld [vmem:[#allocation6 + $0x138] sm:$0xff] }
  0x94   :  { %v386_v39 = vld [vmem:[#allocation6 + $0x268] sm:$0xff]  ;;  %v182_v42 = vrot.slane %v181_v29, 1  ;;  %v188_v43 = vrot.slane %v187_v30, 1  ;;  %873 = vmatprep.subr.mxu1 %v518_v27  ;;  %v513_v46 = vld [vmem:[#allocation6 + $0x660] sm:$0xff]  ;;  %803 = vmatpush2.msra.mxu0 %v389_v32  ;;  %v266_v12 = vrot.slane %v252_v8, %v1896_v35  ;;  %v344_v8 = vld [vmem:[#allocation6 + $0x118] sm:$0xff] }
  0x95   :  { %v514_v40 = vld [vmem:[#allocation6 + $0x668] sm:$0xff]  ;;  %874 = vmatpush2.msra.mxu1 %v517_v33  ;;  %804 = vmatprep.subr.mxu0 %v386_v39  ;;  %v381_v57 = vld [vmem:[#allocation6 + $0x240] sm:$0xff]  ;;  %v368_v33 = vld [vmem:[#allocation6 + $0x1d8] sm:$0xff] }
  0x96   :  { %v382_v51 = vld [vmem:[#allocation6 + $0x248] sm:$0xff]  ;;  %v183_v54 = vadd.f32 %v182_v42, %v181_v29  ;;  %v189_v55 = vadd.f32 %v188_v43, %v187_v30  ;;  %875 = vmatprep.subr.mxu1 %v514_v40  ;;  %v509_v58 = vld [vmem:[#allocation6 + $0x640] sm:$0xff]  ;;  %805 = vmatpush2.msra.mxu0 %v385_v45  ;;  %v363_v40 = vld [vmem:[#allocation6 + $0x1b0] sm:$0xff] }
  0x97   :  { %v510_v52 = vld [vmem:[#allocation6 + $0x648] sm:$0xff]  ;;  %876 = vmatpush2.msra.mxu1 %v513_v46  ;;  %806 = vmatprep.subr.mxu0 %v382_v51  ;;  %v377_v2 = vld [vmem:[#allocation6 + $0x220] sm:$0xff]  ;;  %v360_v42 = vld [vmem:[#allocation6 + $0x198] sm:$0xff] }
  0x98   :  { %v378_v61 = vld [vmem:[#allocation6 + $0x228] sm:$0xff]  ;;  %v251_v1 = vcombine.low %v183_v54, %v189_v55  ;;  %877 = vmatprep.subr.mxu1 %v510_v52  ;;  %v505_v3 = vld [vmem:[#allocation6 + $0x620] sm:$0xff]  ;;  %807 = vmatpush2.msra.mxu0 %v381_v57  ;;  %v359_v43 = vld [vmem:[#allocation6 + $0x190] sm:$0xff]  ;;  %v140_v52 = vunpack.c.l.bf16 %v129_v47 }
  0x99   :  { %v506_v62 = vld [vmem:[#allocation6 + $0x628] sm:$0xff]  ;;  %878 = vmatpush2.msra.mxu1 %v509_v58  ;;  %808 = vmatprep.subr.mxu0 %v378_v61  ;;  %v373_v10 = vld [vmem:[#allocation6 + $0x200] sm:$0xff]  ;;  %v355_v54 = vld [vmem:[#allocation6 + $0x170] sm:$0xff]  ;;  %v208_v61 = vrot.slane %v141_v53, 4 }
  0x9a   :  { %v374_v5 = vld [vmem:[#allocation6 + $0x208] sm:$0xff]  ;;  %v259_v9 = vrot.slane %v251_v1, %v1896_v35  ;;  %879 = vmatprep.subr.mxu1 %v506_v62  ;;  %v501_v11 = vld [vmem:[#allocation6 + $0x600] sm:$0xff]  ;;  %809 = vmatpush2.msra.mxu0 %v377_v2  ;;  %v202_v60 = vrot.slane %v140_v52, 4  ;;  %v351_v62 = vld [vmem:[#allocation6 + $0x150] sm:$0xff] }
  0x9b   :  { %v502_v6 = vld [vmem:[#allocation6 + $0x608] sm:$0xff]  ;;  %880 = vmatpush2.msra.mxu1 %v505_v3  ;;  %810 = vmatprep.subr.mxu0 %v374_v5  ;;  %v625_v28 = vld [vmem:[#allocation6 + $0x9e0] sm:$0xff]  ;;  %v347_v5 = vld [vmem:[#allocation6 + $0x130] sm:$0xff]  ;;  %v209_v7 = vadd.f32 %v208_v61, %v141_v53 }
  0x9c   :  { %v626_v13 = vld [vmem:[#allocation6 + $0x9e8] sm:$0xff]  ;;  %881 = vmatprep.subr.mxu1 %v502_v6  ;;  %811 = vmatpush2.msra.mxu0 %v373_v10  ;;  %v267_v16 = vcombine.low %v259_v9, %v266_v12  ;;  %v621_v32 = vld [vmem:[#allocation6 + $0x9c0] sm:$0xff]  ;;  %v203_v4 = vadd.f32 %v202_v60, %v140_v52  ;;  %v324_v52 = vld [vmem:[#allocation6 + $0x78] sm:$0xff] }
  0x9d   :  { %882 = vmatpush2.msra.mxu1 %v501_v11  ;;  %890 = vmatprep.subr.mxu0 %v626_v13  ;;  %v622_v30 = vld [vmem:[#allocation6 + $0x9c8] sm:$0xff]  ;;  %v617_v37 = vld [vmem:[#allocation6 + $0x9a0] sm:$0xff]  ;;  %v343_v13 = vld [vmem:[#allocation6 + $0x110] sm:$0xff] }
  0x9e   :  { %961 = vmatprep.subr.mxu1 %v372_v14  ;;  %v280_v17 = vrot.slane %v267_v16, 7  ;;  %v618_v34 = vld [vmem:[#allocation6 + $0x9a8] sm:$0xff]  ;;  %v613_v41 = vld [vmem:[#allocation6 + $0x980] sm:$0xff]  ;;  %v204_v12 = vrot.slane %v203_v4, 2  ;;  %v340_v16 = vld [vmem:[#allocation6 + $0xf8] sm:$0xff] }
  0x9f   :  { %v614_v39 = vld [vmem:[#allocation6 + $0x988] sm:$0xff]  ;;  %v609_v45 = vld [vmem:[#allocation6 + $0x960] sm:$0xff]  ;;  %v319_v60 = vld [vmem:[#allocation6 + $0x50] sm:$0xff] }
  0xa0   :  { %v282_v18 = vsel %vm281_vm0, %v280_v17, %v242_v15  ;;  %v610_v44 = vld [vmem:[#allocation6 + $0x968] sm:$0xff]  ;;  %v126_v46 = vld [vmem:[#allocation3 + $0x10] sm:$0xff]  ;;  %v210_v15 = vrot.slane %v209_v7, 2 }
  0xa1   :  { %v284_v19 = vsel %vm283_vm1, %v280_v17, %v282_v18  ;;  %v606_v49 = vld [vmem:[#allocation6 + $0x948] sm:$0xff]  ;;  %v134_v50 = vunpack.c.l.bf16 %v126_v46  ;;  %v135_v51 = vunpack.c.h.bf16 %v126_v46  ;;  %v605_v55 = vld [vmem:[#allocation6 + $0x940] sm:$0xff]  ;;  %v328_v46 = vld [vmem:[#allocation6 + $0x98] sm:$0xff] }
  0xa2   :  { %v286_v20 = vsel %vm285_vm2, %v280_v17, %v284_v19  ;;  %v602_v57 = vld [vmem:[#allocation6 + $0x928] sm:$0xff]  ;;  %v601_v63 = vld [vmem:[#allocation6 + $0x920] sm:$0xff] }
  0xa3   :  { %v288_v21 = vsel %vm287_vm3, %v280_v17, %v286_v20  ;;  %v166_v58 = vrot.slane %v134_v50, 4  ;;  %v172_v59 = vrot.slane %v135_v51, 4  ;;  %v598_v1 = vld [vmem:[#allocation6 + $0x908] sm:$0xff]  ;;  %v597_v6 = vld [vmem:[#allocation6 + $0x900] sm:$0xff]  ;;  %v205_v20 = vadd.f32 %v204_v12, %v203_v4  ;;  %v312_v4 = vld [vmem:[#allocation6 + $0x18] sm:$0xff] }
  0xa4   :  { %v307_v22 = vmul.f32 0.125, %v288_v21  ;;  %v594_v9 = vld [vmem:[#allocation6 + $0x8e8] sm:$0xff]  ;;  %v593_v14 = vld [vmem:[#allocation6 + $0x8e0] sm:$0xff]  ;;  %v339_v21 = vld [vmem:[#allocation6 + $0xf0] sm:$0xff] }
  0xa5   :  { %v167_v2 = vadd.f32 %v166_v58, %v134_v50  ;;  %v173_v3 = vadd.f32 %v172_v59, %v135_v51  ;;  %v590_v17 = vld [vmem:[#allocation6 + $0x8c8] sm:$0xff]  ;;  %v577_v50 = vld [vmem:[#allocation6 + $0x860] sm:$0xff]  ;;  %v320_v58 = vld [vmem:[#allocation6 + $0x58] sm:$0xff] }
  0xa6   :  { %v1907_v24 = vrot.slane %v307_v22, %v1896_v35  ;;  %v717_v25 = vcombine.high %v307_v22, %v307_v22  ;;  %v589_v22 = vld [vmem:[#allocation6 + $0x8c0] sm:$0xff]  ;;  %v578_v47 = vld [vmem:[#allocation6 + $0x868] sm:$0xff] }
  0xa7   :  { %v168_v10 = vrot.slane %v167_v2, 2  ;;  %v174_v11 = vrot.slane %v173_v3, 2  ;;  %v574_v53 = vld [vmem:[#allocation6 + $0x848] sm:$0xff]  ;;  %v569_v61 = vld [vmem:[#allocation6 + $0x820] sm:$0xff] }
  0xa8   :  { %v1911_v26 = vcombine.high %v1907_v24, %v1907_v24  ;;  %v1914_v27 = vrot.slane %v717_v25, %v1896_v35  ;;  %v211_v25 = vadd.f32 %v210_v15, %v209_v7  ;;  %v570_v59 = vld [vmem:[#allocation6 + $0x828] sm:$0xff]  ;;  %v685_v15 = vld [vmem:[#allocation6 + $0xbc0] sm:$0xff] }
  0xa9   :  { %v169_v18 = vadd.f32 %v168_v10, %v167_v2  ;;  %v175_v19 = vadd.f32 %v174_v11, %v173_v3  ;;  %v565_v2 = vld [vmem:[#allocation6 + $0x800] sm:$0xff]  ;;  %v436_v11 = vld [vmem:[#allocation6 + $0x3f8] sm:$0xff]  ;;  %v686_v12 = vld [vmem:[#allocation6 + $0xbc8] sm:$0xff] }
  0xaa   :  { %812 = vmatprep.mubr.f32.mxu0 %v1911_v26  ;;  %v1919_v29 = vcombine.high %v1914_v27, %v1914_v27 }
  0xab   :  { %813 = vmatmul.mubr.f32.vlgmr.msra.gmra.mxu0 %v1907_v24 }
  0xac   :  { %883 = vmatprep.mubr.f32.mxu1 %v1919_v29  ;;  %891 = vmatpush1.msra.mxu0 %v625_v28  ;;  %v336_v28 = vld [vmem:[#allocation6 + $0xd8] sm:$0xff] }
  0xad   :  { %884 = vmatmul.mubr.f32.vlgmr.msra.gmra.mxu1 %v1914_v27  ;;  %892 = vmatprep.subr.mxu0 %v622_v30  ;;  %v586_v30 = vld [vmem:[#allocation6 + $0x8a8] sm:$0xff] }
  0xae   :  { %962 = vmatpush1.msra.mxu1 %v371_v31  ;;  %893 = vmatpush1.msra.mxu0 %v621_v32  ;;  %v170_v31 = vrot.slane %v169_v18, 1  ;;  %v176_v32 = vrot.slane %v175_v19, 1 }
  0xaf   :  { %963 = vmatprep.subr.mxu1 %v368_v33  ;;  %894 = vmatprep.subr.mxu0 %v618_v34  ;;  %v206_v33 = vrot.slane %v205_v20, 1  ;;  %v335_v34 = vld [vmem:[#allocation6 + $0xd0] sm:$0xff] }
  0xb0   :  { %964 = vmatpush1.msra.mxu1 %v367_v36  ;;  %895 = vmatpush1.msra.mxu0 %v617_v37  ;;  %v585_v36 = vld [vmem:[#allocation6 + $0x8a0] sm:$0xff]  ;;  %v212_v37 = vrot.slane %v211_v25, 1 }
  0xb1   :  { %965 = vmatprep.subr.mxu1 %v364_v38  ;;  %896 = vmatprep.subr.mxu0 %v614_v39  ;;  %v332_v38 = vld [vmem:[#allocation6 + $0xb8] sm:$0xff]  ;;  %v582_v39 = vld [vmem:[#allocation6 + $0x888] sm:$0xff] }
  0xb2   :  { %966 = vmatpush1.msra.mxu1 %v363_v40  ;;  %897 = vmatpush1.msra.mxu0 %v613_v41  ;;  %v171_v40 = vadd.f32 %v170_v31, %v169_v18  ;;  %v177_v41 = vadd.f32 %v176_v32, %v175_v19  ;;  %v682_v18 = vld [vmem:[#allocation6 + $0xba8] sm:$0xff]  ;;  %v431_v19 = vld [vmem:[#allocation6 + $0x3d0] sm:$0xff] }
  0xb3   :  { %967 = vmatprep.subr.mxu1 %v360_v42  ;;  %898 = vmatprep.subr.mxu0 %v610_v44  ;;  %v207_v42 = vadd.f32 %v206_v33, %v205_v20  ;;  %v581_v44 = vld [vmem:[#allocation6 + $0x880] sm:$0xff]  ;;  %v674_v31 = vld [vmem:[#allocation6 + $0xb68] sm:$0xff]  ;;  %v423_v32 = vld [vmem:[#allocation6 + $0x390] sm:$0xff] }
  0xb4   :  { %968 = vmatpush1.msra.mxu1 %v359_v43  ;;  %899 = vmatpush1.msra.mxu0 %v609_v45  ;;  %v331_v43 = vld [vmem:[#allocation6 + $0xb0] sm:$0xff]  ;;  %v213_v45 = vadd.f32 %v212_v37, %v211_v25  ;;  %v681_v20 = vld [vmem:[#allocation6 + $0xba0] sm:$0xff] }
  0xb5   :  { %969 = vmatprep.subr.mxu1 %v356_v48  ;;  %900 = vmatprep.subr.mxu0 %v606_v49  ;;  %v243_v48 = vcombine.low %v171_v40, %v177_v41  ;;  %v327_v49 = vld [vmem:[#allocation6 + $0x90] sm:$0xff]  ;;  %v673_v33 = vld [vmem:[#allocation6 + $0xb60] sm:$0xff]  ;;  %v666_v40 = vld [vmem:[#allocation6 + $0xb28] sm:$0xff] }
  0xb6   :  { %970 = vmatpush1.msra.mxu1 %v355_v54  ;;  %901 = vmatpush1.msra.mxu0 %v605_v55  ;;  %v268_v51 = vcombine.low %v207_v42, %v213_v45  ;;  %v323_v54 = vld [vmem:[#allocation6 + $0x70] sm:$0xff]  ;;  %v573_v55 = vld [vmem:[#allocation6 + $0x840] sm:$0xff] }
  0xb7   :  { %971 = vmatprep.subr.mxu1 %v352_v56  ;;  %902 = vmatprep.subr.mxu0 %v602_v57  ;;  %v250_v56 = vrot.slane %v243_v48, %v1896_v35  ;;  %v427_v25 = vld [vmem:[#allocation6 + $0x3b0] sm:$0xff]  ;;  %v665_v42 = vld [vmem:[#allocation6 + $0xb20] sm:$0xff]  ;;  %v658_v48 = vld [vmem:[#allocation6 + $0xae8] sm:$0xff] }
  0xb8   :  { %972 = vmatpush1.msra.mxu1 %v351_v62  ;;  %903 = vmatpush1.msra.mxu0 %v601_v63  ;;  %v275_v57 = vrot.slane %v268_v51, %v1896_v35  ;;  %v316_v63 = vld [vmem:[#allocation6 + $0x38] sm:$0xff]  ;;  %v419_v37 = vld [vmem:[#allocation6 + $0x370] sm:$0xff] }
  0xb9   :  { %973 = vmatprep.subr.mxu1 %v348_v0  ;;  %904 = vmatprep.subr.mxu0 %v598_v1  ;;  %v566_v0 = vld [vmem:[#allocation6 + $0x808] sm:$0xff]  ;;  %v315_v1 = vld [vmem:[#allocation6 + $0x30] sm:$0xff]  ;;  %v404_v51 = vld [vmem:[#allocation6 + $0x2f8] sm:$0xff] }
  0xba   :  { %974 = vmatpush1.msra.mxu1 %v347_v5  ;;  %905 = vmatpush1.msra.mxu0 %v597_v6  ;;  %v291_v62 = vrot.slane %v275_v57, 7  ;;  %v690_v5 = vld [vmem:[#allocation6 + $0xbe8] sm:$0xff]  ;;  %v415_v41 = vld [vmem:[#allocation6 + $0x350] sm:$0xff] }
  0xbb   :  { %975 = vmatprep.subr.mxu1 %v344_v8  ;;  %906 = vmatprep.subr.mxu0 %v594_v9  ;;  %v123_v6 = vld [vmem:[#allocation2 + $0x8] sm:$0xf]  ;;  %v311_v8 = vld [vmem:[#allocation6 + $0x10] sm:$0xff]  ;;  %v689_v9 = vld [vmem:[#allocation6 + $0xbe0] sm:$0xff] }
  0xbc   :  { %976 = vmatpush1.msra.mxu1 %v343_v13  ;;  %907 = vmatpush1.msra.mxu0 %v593_v14  ;;  %v292_v3 = vsel %vm281_vm0, %v291_v62, %v250_v56  ;;  %v435_v14 = vld [vmem:[#allocation6 + $0x3f0] sm:$0xff]  ;;  %v650_v56 = vld [vmem:[#allocation6 + $0xaa8] sm:$0xff] }
  0xbd   :  { %977 = vmatprep.subr.mxu1 %v340_v16  ;;  %908 = vmatprep.subr.mxu0 %v590_v17  ;;  %v293_v7 = vsel %vm283_vm1, %v291_v62, %v292_v3  ;;  %v432_v17 = vld [vmem:[#allocation6 + $0x3d8] sm:$0xff]  ;;  %v411_v45 = vld [vmem:[#allocation6 + $0x330] sm:$0xff] }
  0xbe   :  { %978 = vmatpush1.msra.mxu1 %v339_v21  ;;  %909 = vmatpush1.msra.mxu0 %v589_v22  ;;  %v294_v10 = vsel %vm285_vm2, %v291_v62, %v293_v7  ;;  %v428_v21 = vld [vmem:[#allocation6 + $0x3b8] sm:$0xff]  ;;  %v678_v22 = vld [vmem:[#allocation6 + $0xb88] sm:$0xff]  ;;  %v391_v3 = vld [vmem:[#allocation6 + $0x290] sm:$0xff] }
  0xbf   :  { %979 = vmatprep.subr.mxu1 %v336_v28  ;;  %910 = vmatprep.subr.mxu0 %v586_v30  ;;  %v295_v13 = vsel %vm287_vm3, %v291_v62, %v294_v10  ;;  %v677_v28 = vld [vmem:[#allocation6 + $0xb80] sm:$0xff]  ;;  %v424_v30 = vld [vmem:[#allocation6 + $0x398] sm:$0xff]  ;;  %v395_v62 = vld [vmem:[#allocation6 + $0x2b0] sm:$0xff] }
  0xc0   :  { %980 = vmatpush1.msra.mxu1 %v335_v34  ;;  %911 = vmatpush1.msra.mxu0 %v585_v36  ;;  %v299_v16 = vadd.f32 %v295_v13, %v123_v6  ;;  %v420_v34 = vld [vmem:[#allocation6 + $0x378] sm:$0xff]  ;;  %v670_v36 = vld [vmem:[#allocation6 + $0xb48] sm:$0xff]  ;;  %v387_v7 = vld [vmem:[#allocation6 + $0x270] sm:$0xff] }
  0xc1   :  { %981 = vmatprep.subr.mxu1 %v332_v38  ;;  %912 = vmatprep.subr.mxu0 %v582_v39  ;;  %v669_v38 = vld [vmem:[#allocation6 + $0xb40] sm:$0xff]  ;;  %v416_v39 = vld [vmem:[#allocation6 + $0x358] sm:$0xff]  ;;  %v638_v6 = vld [vmem:[#allocation6 + $0xa48] sm:$0xff] }
  0xc2   :  { %982 = vmatpush1.msra.mxu1 %v331_v43  ;;  %913 = vmatpush1.msra.mxu0 %v581_v44  ;;  %301 = vst [vmem:[#allocation2 + $0x8] sm:$0xf] %v299_v16  ;;  %v412_v43 = vld [vmem:[#allocation6 + $0x338] sm:$0xff]  ;;  %v662_v44 = vld [vmem:[#allocation6 + $0xb08] sm:$0xff]  ;;  %v633_v13 = vld [vmem:[#allocation6 + $0xa20] sm:$0xff] }
  0xc3   :  { %983 = vmatprep.subr.mxu1 %v328_v46  ;;  %914 = vmatprep.subr.mxu0 %v578_v47  ;;  %v661_v46 = vld [vmem:[#allocation6 + $0xb00] sm:$0xff]  ;;  %v408_v47 = vld [vmem:[#allocation6 + $0x318] sm:$0xff]  ;;  %v379_v16 = vld [vmem:[#allocation6 + $0x230] sm:$0xff] }
  0xc4   :  { %984 = vmatpush1.msra.mxu1 %v327_v49  ;;  %915 = vmatpush1.msra.mxu0 %v577_v50  ;;  %v407_v49 = vld [vmem:[#allocation6 + $0x310] sm:$0xff]  ;;  %v657_v50 = vld [vmem:[#allocation6 + $0xae0] sm:$0xff]  ;;  %v384_v10 = vld [vmem:[#allocation6 + $0x258] sm:$0xff] }
  0xc5   :  { %985 = vmatprep.subr.mxu1 %v324_v52  ;;  %916 = vmatprep.subr.mxu0 %v574_v53  ;;  %v654_v52 = vld [vmem:[#allocation6 + $0xac8] sm:$0xff]  ;;  %v403_v53 = vld [vmem:[#allocation6 + $0x2f0] sm:$0xff] }
  0xc6   :  { %986 = vmatpush1.msra.mxu1 %v323_v54  ;;  %917 = vmatpush1.msra.mxu0 %v573_v55  ;;  %v653_v54 = vld [vmem:[#allocation6 + $0xac0] sm:$0xff]  ;;  %v400_v55 = vld [vmem:[#allocation6 + $0x2d8] sm:$0xff] }
  0xc7   :  { %987 = vmatprep.subr.mxu1 %v320_v58  ;;  %918 = vmatprep.subr.mxu0 %v570_v59  ;;  %v399_v58 = vld [vmem:[#allocation6 + $0x2d0] sm:$0xff]  ;;  %v649_v59 = vld [vmem:[#allocation6 + $0xaa0] sm:$0xff] }
  0xc8   :  { %988 = vmatpush1.msra.mxu1 %v319_v60  ;;  %919 = vmatpush1.msra.mxu0 %v569_v61  ;;  %v396_v60 = vld [vmem:[#allocation6 + $0x2b8] sm:$0xff]  ;;  %v646_v61 = vld [vmem:[#allocation6 + $0xa88] sm:$0xff] }
  0xc9   :  { %989 = vmatprep.subr.mxu1 %v316_v63  ;;  %920 = vmatprep.subr.mxu0 %v566_v0  ;;  %v306_v57 = vld [vmem:[#allocation2 + $0x8] sm:$0xf]  ;;  %v645_v63 = vld [vmem:[#allocation6 + $0xa80] sm:$0xff] }
  0xca   :  { %990 = vmatpush1.msra.mxu1 %v315_v1  ;;  %921 = vmatpush1.msra.mxu0 %v565_v2  ;;  %v308_v0 = vmul.f32 0.125, %v306_v57  ;;  %v392_v1 = vld [vmem:[#allocation6 + $0x298] sm:$0xff]  ;;  %v642_v2 = vld [vmem:[#allocation6 + $0xa68] sm:$0xff] }
  0xcb   :  { %991 = vmatprep.subr.mxu1 %v312_v4  ;;  %922 = vmatprep.subr.mxu0 %v690_v5  ;;  %v641_v4 = vld [vmem:[#allocation6 + $0xa60] sm:$0xff]  ;;  %v388_v5 = vld [vmem:[#allocation6 + $0x278] sm:$0xff] }
  0xcc   :  { %992 = vmatpush1.msra.mxu1 %v311_v8  ;;  %923 = vmatpush2.msra.mxu0 %v689_v9  ;;  %v637_v8 = vld [vmem:[#allocation6 + $0xa40] sm:$0xff]  ;;  %v1931_v9 = vrot.slane %v308_v0, %v1896_v35  ;;  %v596_v57 = vld [vmem:[#allocation6 + $0x8f8] sm:$0xff] }
  0xcd   :  { %993 = vmatprep.subr.mxu1 %v436_v11  ;;  %924 = vmatprep.subr.mxu0 %v686_v12  ;;  %v634_v11 = vld [vmem:[#allocation6 + $0xa28] sm:$0xff]  ;;  %v383_v12 = vld [vmem:[#allocation6 + $0x250] sm:$0xff]  ;;  %v460_v0 = vld [vmem:[#allocation6 + $0x4b8] sm:$0xff] }
  0xce   :  { %994 = vmatpush2.msra.mxu1 %v435_v14  ;;  %925 = vmatpush2.msra.mxu0 %v685_v15  ;;  %v380_v14 = vld [vmem:[#allocation6 + $0x238] sm:$0xff]  ;;  %v630_v15 = vld [vmem:[#allocation6 + $0xa08] sm:$0xff]  ;;  %v1935_v35 = vcombine.high %v1931_v9, %v1931_v9 }
  0xcf   :  { %995 = vmatprep.subr.mxu1 %v432_v17  ;;  %926 = vmatprep.subr.mxu0 %v682_v18  ;;  %v629_v17 = vld [vmem:[#allocation6 + $0xa00] sm:$0xff]  ;;  %v376_v18 = vld [vmem:[#allocation6 + $0x218] sm:$0xff] }
  0xd0   :  { %996 = vmatpush2.msra.mxu1 %v431_v19  ;;  %927 = vmatpush2.msra.mxu0 %v681_v20  ;;  %v375_v19 = vld [vmem:[#allocation6 + $0x210] sm:$0xff]  ;;  %v500_v20 = vld [vmem:[#allocation6 + $0x5f8] sm:$0xff] }
  0xd1   :  { %997 = vmatprep.subr.mxu1 %v428_v21  ;;  %928 = vmatprep.subr.mxu0 %v678_v22  ;;  %v628_v21 = vld [vmem:[#allocation6 + $0x9f8] sm:$0xff]  ;;  %v499_v22 = vld [vmem:[#allocation6 + $0x5f0] sm:$0xff] }
  0xd2   :  { %998 = vmatpush2.msra.mxu1 %v427_v25  ;;  %929 = vmatpush2.msra.mxu0 %v677_v28  ;;  %v627_v25 = vld [vmem:[#allocation6 + $0x9f0] sm:$0xff]  ;;  %v496_v28 = vld [vmem:[#allocation6 + $0x5d8] sm:$0xff] }
  0xd3   :  { %999 = vmatprep.subr.mxu1 %v424_v30  ;;  %930 = vmatprep.subr.mxu0 %v674_v31  ;;  %v624_v30 = vld [vmem:[#allocation6 + $0x9d8] sm:$0xff]  ;;  %v495_v31 = vld [vmem:[#allocation6 + $0x5d0] sm:$0xff] }
  0xd4   :  { %1000 = vmatpush2.msra.mxu1 %v423_v32  ;;  %931 = vmatpush2.msra.mxu0 %v673_v33  ;;  %v623_v32 = vld [vmem:[#allocation6 + $0x9d0] sm:$0xff]  ;;  %v492_v33 = vld [vmem:[#allocation6 + $0x5b8] sm:$0xff] }
  0xd5   :  { %1001 = vmatprep.subr.mxu1 %v420_v34  ;;  %932 = vmatprep.subr.mxu0 %v670_v36  ;;  %v620_v34 = vld [vmem:[#allocation6 + $0x9b8] sm:$0xff]  ;;  %v491_v36 = vld [vmem:[#allocation6 + $0x5b0] sm:$0xff] }
  0xd6   :  { %1002 = vmatpush2.msra.mxu1 %v419_v37  ;;  %933 = vmatpush2.msra.mxu0 %v669_v38  ;;  %v619_v37 = vld [vmem:[#allocation6 + $0x9b0] sm:$0xff]  ;;  %v488_v38 = vld [vmem:[#allocation6 + $0x598] sm:$0xff] }
  0xd7   :  { %1003 = vmatprep.subr.mxu1 %v416_v39  ;;  %934 = vmatprep.subr.mxu0 %v666_v40  ;;  %v487_v39 = vld [vmem:[#allocation6 + $0x590] sm:$0xff] }
  0xd8   :  { %1004 = vmatpush2.msra.mxu1 %v415_v41  ;;  %935 = vmatpush2.msra.mxu0 %v665_v42  ;;  %v615_v40 = vld [vmem:[#allocation6 + $0x990] sm:$0xff]  ;;  %v612_v41 = vld [vmem:[#allocation6 + $0x978] sm:$0xff] }
  0xd9   :  { %1005 = vmatprep.subr.mxu1 %v412_v43  ;;  %936 = vmatprep.subr.mxu0 %v662_v44  ;;  %v483_v42 = vld [vmem:[#allocation6 + $0x570] sm:$0xff]  ;;  %v480_v44 = vld [vmem:[#allocation6 + $0x558] sm:$0xff] }
  0xda   :  { %1006 = vmatpush2.msra.mxu1 %v411_v45  ;;  %937 = vmatpush2.msra.mxu0 %v661_v46  ;;  %v611_v43 = vld [vmem:[#allocation6 + $0x970] sm:$0xff]  ;;  %v608_v45 = vld [vmem:[#allocation6 + $0x958] sm:$0xff] }
  0xdb   :  { %1007 = vmatprep.subr.mxu1 %v408_v47  ;;  %938 = vmatprep.subr.mxu0 %v658_v48  ;;  %v479_v46 = vld [vmem:[#allocation6 + $0x550] sm:$0xff]  ;;  %v476_v48 = vld [vmem:[#allocation6 + $0x538] sm:$0xff] }
  0xdc   :  { %1008 = vmatpush2.msra.mxu1 %v407_v49  ;;  %939 = vmatpush2.msra.mxu0 %v657_v50  ;;  %v607_v47 = vld [vmem:[#allocation6 + $0x950] sm:$0xff]  ;;  %v604_v49 = vld [vmem:[#allocation6 + $0x938] sm:$0xff] }
  0xdd   :  { %1009 = vmatprep.subr.mxu1 %v404_v51  ;;  %940 = vmatprep.subr.mxu0 %v654_v52  ;;  %v475_v50 = vld [vmem:[#allocation6 + $0x530] sm:$0xff]  ;;  %v472_v52 = vld [vmem:[#allocation6 + $0x518] sm:$0xff] }
  0xde   :  { %1010 = vmatpush2.msra.mxu1 %v403_v53  ;;  %941 = vmatpush2.msra.mxu0 %v653_v54  ;;  %v603_v51 = vld [vmem:[#allocation6 + $0x930] sm:$0xff]  ;;  %v600_v53 = vld [vmem:[#allocation6 + $0x918] sm:$0xff] }
  0xdf   :  { %1011 = vmatprep.subr.mxu1 %v400_v55  ;;  %942 = vmatprep.subr.mxu0 %v650_v56  ;;  %v471_v54 = vld [vmem:[#allocation6 + $0x510] sm:$0xff]  ;;  %v468_v56 = vld [vmem:[#allocation6 + $0x4f8] sm:$0xff] }
  0xe0   :  { %1012 = vmatpush2.msra.mxu1 %v399_v58  ;;  %943 = vmatpush2.msra.mxu0 %v649_v59  ;;  %v599_v55 = vld [vmem:[#allocation6 + $0x910] sm:$0xff] }
  0xe1   :  { %1013 = vmatprep.subr.mxu1 %v396_v60  ;;  %944 = vmatprep.subr.mxu0 %v646_v61  ;;  %v467_v58 = vld [vmem:[#allocation6 + $0x4f0] sm:$0xff]  ;;  %v464_v60 = vld [vmem:[#allocation6 + $0x4d8] sm:$0xff] }
  0xe2   :  { %1014 = vmatpush2.msra.mxu1 %v395_v62  ;;  %945 = vmatpush2.msra.mxu0 %v645_v63  ;;  %v595_v59 = vld [vmem:[#allocation6 + $0x8f0] sm:$0xff]  ;;  %v592_v61 = vld [vmem:[#allocation6 + $0x8d8] sm:$0xff] }
  0xe3   :  { %1015 = vmatprep.subr.mxu1 %v392_v1  ;;  %946 = vmatprep.subr.mxu0 %v642_v2  ;;  %v463_v62 = vld [vmem:[#allocation6 + $0x4d0] sm:$0xff]  ;;  %v588_v1 = vld [vmem:[#allocation6 + $0x8b8] sm:$0xff] }
  0xe4   :  { %1016 = vmatpush2.msra.mxu1 %v391_v3  ;;  %947 = vmatpush2.msra.mxu0 %v641_v4  ;;  %v591_v63 = vld [vmem:[#allocation6 + $0x8d0] sm:$0xff]  ;;  %v456_v4 = vld [vmem:[#allocation6 + $0x498] sm:$0xff] }
  0xe5   :  { %1017 = vmatprep.subr.mxu1 %v388_v5  ;;  %948 = vmatprep.subr.mxu0 %v638_v6  ;;  %v459_v2 = vld [vmem:[#allocation6 + $0x4b0] sm:$0xff]  ;;  %v584_v5 = vld [vmem:[#allocation6 + $0x898] sm:$0xff] }
  0xe6   :  { %1018 = vmatpush2.msra.mxu1 %v387_v7  ;;  %949 = vmatpush2.msra.mxu0 %v637_v8  ;;  %v587_v3 = vld [vmem:[#allocation6 + $0x8b0] sm:$0xff]  ;;  %v452_v8 = vld [vmem:[#allocation6 + $0x478] sm:$0xff] }
  0xe7   :  { %1019 = vmatprep.subr.mxu1 %v384_v10  ;;  %950 = vmatprep.subr.mxu0 %v634_v11  ;;  %v455_v6 = vld [vmem:[#allocation6 + $0x490] sm:$0xff]  ;;  %v580_v10 = vld [vmem:[#allocation6 + $0x878] sm:$0xff] }
  0xe8   :  { %1020 = vmatpush2.msra.mxu1 %v383_v12  ;;  %951 = vmatpush2.msra.mxu0 %v633_v13  ;;  %v583_v7 = vld [vmem:[#allocation6 + $0x890] sm:$0xff]  ;;  %v448_v13 = vld [vmem:[#allocation6 + $0x458] sm:$0xff] }
  0xe9   :  { %1021 = vmatprep.subr.mxu1 %v380_v14  ;;  %952 = vmatprep.subr.mxu0 %v630_v15  ;;  %v451_v11 = vld [vmem:[#allocation6 + $0x470] sm:$0xff]  ;;  %v576_v14 = vld [vmem:[#allocation6 + $0x858] sm:$0xff] }
  0xea   :  { %1022 = vmatpush2.msra.mxu1 %v379_v16  ;;  %953 = vmatpush2.msra.mxu0 %v629_v17  ;;  %v579_v12 = vld [vmem:[#allocation6 + $0x870] sm:$0xff]  ;;  %v444_v17 = vld [vmem:[#allocation6 + $0x438] sm:$0xff] }
  0xeb   :  { %1023 = vmatprep.subr.mxu1 %v376_v18  ;;  %954 = vmatprep.mubr.f32.mxu0 %v1935_v35  ;;  %v447_v15 = vld [vmem:[#allocation6 + $0x450] sm:$0xff]  ;;  %v572_v18 = vld [vmem:[#allocation6 + $0x838] sm:$0xff] }
  0xec   :  { %1024 = vmatpush2.msra.mxu1 %v375_v19  ;;  %955 = vmatmul.mubr.f32.vlgmr.msra.gmra.mxu0 %v1931_v9  ;;  %v575_v16 = vld [vmem:[#allocation6 + $0x850] sm:$0xff] }
  0xed   :  { %1025 = vmatprep.mubr.f32.mxu1 %v1911_v26  ;;  %1032 = vmatprep.subr.mxu0 %v500_v20  ;;  %v616_v26 = vld [vmem:[#allocation6 + $0x998] sm:$0xff]  ;;  %v443_v19 = vld [vmem:[#allocation6 + $0x430] sm:$0xff] }
  0xee   :  { %1103 = vmatprep.subr.mxu1 %v628_v21  ;;  %1026 = vmatmul.mubr.f32.vlgmr.msra.gmra.mxu1 %v1907_v24  ;;  %v484_v24 = vld [vmem:[#allocation6 + $0x578] sm:$0xff]  ;;  %v571_v20 = vld [vmem:[#allocation6 + $0x830] sm:$0xff] }
  0xef   :  { %1033 = vmatpush1.msra.mxu0 %v499_v22  ;;  %1104 = vmatpush1.msra.mxu1 %v627_v25  ;;  %v440_v21 = vld [vmem:[#allocation6 + $0x418] sm:$0xff]  ;;  %v439_v25 = vld [vmem:[#allocation6 + $0x410] sm:$0xff] }
  0xf0   :  { %1034 = vmatprep.subr.mxu0 %v496_v28  ;;  %1105 = vmatprep.subr.mxu1 %v624_v30  ;;  %v568_v22 = vld [vmem:[#allocation6 + $0x818] sm:$0xff]  ;;  %v567_v28 = vld [vmem:[#allocation6 + $0x810] sm:$0xff] }
  0xf1   :  { %1035 = vmatpush1.msra.mxu0 %v495_v31  ;;  %1106 = vmatpush1.msra.mxu1 %v623_v32  ;;  %v564_v30 = vld [vmem:[#allocation6 + $0x7f8] sm:$0xff]  ;;  %v563_v32 = vld [vmem:[#allocation6 + $0x7f0] sm:$0xff] }
  0xf2   :  { %1036 = vmatprep.subr.mxu0 %v492_v33  ;;  %1107 = vmatprep.subr.mxu1 %v620_v34  ;;  %v692_v31 = vld [vmem:[#allocation6 + $0xbf8] sm:$0xff]  ;;  %v691_v33 = vld [vmem:[#allocation6 + $0xbf0] sm:$0xff] }
  0xf3   :  { %1037 = vmatpush1.msra.mxu0 %v491_v36  ;;  %1108 = vmatpush1.msra.mxu1 %v619_v37  ;;  %v560_v34 = vld [vmem:[#allocation6 + $0x7d8] sm:$0xff]  ;;  %v559_v37 = vld [vmem:[#allocation6 + $0x7d0] sm:$0xff] }
  0xf4   :  { %1038 = vmatprep.subr.mxu0 %v488_v38  ;;  %1109 = vmatprep.subr.mxu1 %v616_v26  ;;  %v688_v36 = vld [vmem:[#allocation6 + $0xbd8] sm:$0xff]  ;;  %v687_v38 = vld [vmem:[#allocation6 + $0xbd0] sm:$0xff] }
  0xf5   :  { %1039 = vmatpush1.msra.mxu0 %v487_v39  ;;  %1110 = vmatpush1.msra.mxu1 %v615_v40  ;;  %v556_v26 = vld [vmem:[#allocation6 + $0x7b8] sm:$0xff]  ;;  %v555_v40 = vld [vmem:[#allocation6 + $0x7b0] sm:$0xff] }
  0xf6   :  { %1040 = vmatprep.subr.mxu0 %v484_v24  ;;  %1111 = vmatprep.subr.mxu1 %v612_v41  ;;  %v684_v39 = vld [vmem:[#allocation6 + $0xbb8] sm:$0xff]  ;;  %v683_v24 = vld [vmem:[#allocation6 + $0xbb0] sm:$0xff] }
  0xf7   :  { %1041 = vmatpush1.msra.mxu0 %v483_v42  ;;  %1112 = vmatpush1.msra.mxu1 %v611_v43  ;;  %v552_v41 = vld [vmem:[#allocation6 + $0x798] sm:$0xff]  ;;  %v551_v43 = vld [vmem:[#allocation6 + $0x790] sm:$0xff] }
  0xf8   :  { %1042 = vmatprep.subr.mxu0 %v480_v44  ;;  %1113 = vmatprep.subr.mxu1 %v608_v45  ;;  %v680_v42 = vld [vmem:[#allocation6 + $0xb98] sm:$0xff]  ;;  %v679_v44 = vld [vmem:[#allocation6 + $0xb90] sm:$0xff] }
  0xf9   :  { %1043 = vmatpush1.msra.mxu0 %v479_v46  ;;  %1114 = vmatpush1.msra.mxu1 %v607_v47  ;;  %v548_v45 = vld [vmem:[#allocation6 + $0x778] sm:$0xff]  ;;  %v547_v47 = vld [vmem:[#allocation6 + $0x770] sm:$0xff] }
  0xfa   :  { %1044 = vmatprep.subr.mxu0 %v476_v48  ;;  %1115 = vmatprep.subr.mxu1 %v604_v49  ;;  %v676_v46 = vld [vmem:[#allocation6 + $0xb78] sm:$0xff]  ;;  %v675_v48 = vld [vmem:[#allocation6 + $0xb70] sm:$0xff] }
  0xfb   :  { %1045 = vmatpush1.msra.mxu0 %v475_v50  ;;  %1116 = vmatpush1.msra.mxu1 %v603_v51  ;;  %v544_v49 = vld [vmem:[#allocation6 + $0x758] sm:$0xff]  ;;  %v543_v51 = vld [vmem:[#allocation6 + $0x750] sm:$0xff] }
  0xfc   :  { %1046 = vmatprep.subr.mxu0 %v472_v52  ;;  %1117 = vmatprep.subr.mxu1 %v600_v53  ;;  %v672_v50 = vld [vmem:[#allocation6 + $0xb58] sm:$0xff]  ;;  %v671_v52 = vld [vmem:[#allocation6 + $0xb50] sm:$0xff] }
  0xfd   :  { %1047 = vmatpush1.msra.mxu0 %v471_v54  ;;  %1118 = vmatpush1.msra.mxu1 %v599_v55  ;;  %v540_v53 = vld [vmem:[#allocation6 + $0x738] sm:$0xff]  ;;  %v539_v55 = vld [vmem:[#allocation6 + $0x730] sm:$0xff] }
  0xfe   :  { %1048 = vmatprep.subr.mxu0 %v468_v56  ;;  %1119 = vmatprep.subr.mxu1 %v596_v57  ;;  %v668_v54 = vld [vmem:[#allocation6 + $0xb38] sm:$0xff]  ;;  %v667_v56 = vld [vmem:[#allocation6 + $0xb30] sm:$0xff] }
  0xff   :  { %1049 = vmatpush1.msra.mxu0 %v467_v58  ;;  %1120 = vmatpush1.msra.mxu1 %v595_v59  ;;  %v536_v57 = vld [vmem:[#allocation6 + $0x718] sm:$0xff]  ;;  %v535_v59 = vld [vmem:[#allocation6 + $0x710] sm:$0xff] }
 0x100   :  { %1050 = vmatprep.subr.mxu0 %v464_v60  ;;  %1121 = vmatprep.subr.mxu1 %v592_v61  ;;  %v664_v58 = vld [vmem:[#allocation6 + $0xb18] sm:$0xff]  ;;  %v663_v60 = vld [vmem:[#allocation6 + $0xb10] sm:$0xff] }
 0x101   :  { %1051 = vmatpush1.msra.mxu0 %v463_v62  ;;  %1122 = vmatpush1.msra.mxu1 %v591_v63  ;;  %v532_v61 = vld [vmem:[#allocation6 + $0x6f8] sm:$0xff]  ;;  %v531_v63 = vld [vmem:[#allocation6 + $0x6f0] sm:$0xff] }
 0x102   :  { %1052 = vmatprep.subr.mxu0 %v460_v0  ;;  %1123 = vmatprep.subr.mxu1 %v588_v1  ;;  %v660_v62 = vld [vmem:[#allocation6 + $0xaf8] sm:$0xff]  ;;  %v659_v0 = vld [vmem:[#allocation6 + $0xaf0] sm:$0xff] }
 0x103   :  { %1053 = vmatpush1.msra.mxu0 %v459_v2  ;;  %1124 = vmatpush1.msra.mxu1 %v587_v3  ;;  %v528_v1 = vld [vmem:[#allocation6 + $0x6d8] sm:$0xff]  ;;  %v527_v3 = vld [vmem:[#allocation6 + $0x6d0] sm:$0xff] }
 0x104   :  { %1054 = vmatprep.subr.mxu0 %v456_v4  ;;  %1125 = vmatprep.subr.mxu1 %v584_v5  ;;  %v656_v2 = vld [vmem:[#allocation6 + $0xad8] sm:$0xff]  ;;  %v655_v4 = vld [vmem:[#allocation6 + $0xad0] sm:$0xff] }
 0x105   :  { %1055 = vmatpush1.msra.mxu0 %v455_v6  ;;  %1126 = vmatpush1.msra.mxu1 %v583_v7  ;;  %v524_v5 = vld [vmem:[#allocation6 + $0x6b8] sm:$0xff]  ;;  %v523_v7 = vld [vmem:[#allocation6 + $0x6b0] sm:$0xff] }
 0x106   :  { %1056 = vmatprep.subr.mxu0 %v452_v8  ;;  %1127 = vmatprep.subr.mxu1 %v580_v10  ;;  %v652_v6 = vld [vmem:[#allocation6 + $0xab8] sm:$0xff]  ;;  %v651_v8 = vld [vmem:[#allocation6 + $0xab0] sm:$0xff] }
 0x107   :  { %1057 = vmatpush1.msra.mxu0 %v451_v11  ;;  %1128 = vmatpush1.msra.mxu1 %v579_v12  ;;  %v520_v10 = vld [vmem:[#allocation6 + $0x698] sm:$0xff]  ;;  %v519_v12 = vld [vmem:[#allocation6 + $0x690] sm:$0xff] }
 0x108   :  { %1058 = vmatprep.subr.mxu0 %v448_v13  ;;  %1129 = vmatprep.subr.mxu1 %v576_v14  ;;  %v648_v11 = vld [vmem:[#allocation6 + $0xa98] sm:$0xff]  ;;  %v647_v13 = vld [vmem:[#allocation6 + $0xa90] sm:$0xff] }
 0x109   :  { %1059 = vmatpush1.msra.mxu0 %v447_v15  ;;  %1130 = vmatpush1.msra.mxu1 %v575_v16  ;;  %v516_v14 = vld [vmem:[#allocation6 + $0x678] sm:$0xff]  ;;  %v515_v16 = vld [vmem:[#allocation6 + $0x670] sm:$0xff] }
 0x10a   :  { %1060 = vmatprep.subr.mxu0 %v444_v17  ;;  %1131 = vmatprep.subr.mxu1 %v572_v18  ;;  %v644_v15 = vld [vmem:[#allocation6 + $0xa78] sm:$0xff]  ;;  %v643_v17 = vld [vmem:[#allocation6 + $0xa70] sm:$0xff] }
 0x10b   :  { %1061 = vmatpush1.msra.mxu0 %v443_v19  ;;  %1132 = vmatpush1.msra.mxu1 %v571_v20  ;;  %v512_v18 = vld [vmem:[#allocation6 + $0x658] sm:$0xff]  ;;  %v511_v20 = vld [vmem:[#allocation6 + $0x650] sm:$0xff] }
 0x10c   :  { %1062 = vmatprep.subr.mxu0 %v440_v21  ;;  %1133 = vmatprep.subr.mxu1 %v568_v22  ;;  %v640_v19 = vld [vmem:[#allocation6 + $0xa58] sm:$0xff]  ;;  %v639_v21 = vld [vmem:[#allocation6 + $0xa50] sm:$0xff] }
 0x10d   :  { %1063 = vmatpush1.msra.mxu0 %v439_v25  ;;  %1134 = vmatpush1.msra.mxu1 %v567_v28  ;;  %v508_v22 = vld [vmem:[#allocation6 + $0x638] sm:$0xff]  ;;  %v507_v28 = vld [vmem:[#allocation6 + $0x630] sm:$0xff] }
 0x10e   :  { %1064 = vmatprep.subr.mxu0 %v564_v30  ;;  %1135 = vmatprep.subr.mxu1 %v692_v31  ;;  %v636_v25 = vld [vmem:[#allocation6 + $0xa38] sm:$0xff]  ;;  %v635_v30 = vld [vmem:[#allocation6 + $0xa30] sm:$0xff] }
 0x10f   :  { %1065 = vmatpush2.msra.mxu0 %v563_v32  ;;  %1136 = vmatpush2.msra.mxu1 %v691_v33  ;;  %v504_v31 = vld [vmem:[#allocation6 + $0x618] sm:$0xff]  ;;  %v503_v33 = vld [vmem:[#allocation6 + $0x610] sm:$0xff] }
 0x110   :  { %1066 = vmatprep.subr.mxu0 %v560_v34  ;;  %1137 = vmatprep.subr.mxu1 %v688_v36  ;;  %v632_v32 = vld [vmem:[#allocation6 + $0xa18] sm:$0xff]  ;;  %v631_v34 = vld [vmem:[#allocation6 + $0xa10] sm:$0xff] }
 0x111   :  { %1067 = vmatpush2.msra.mxu0 %v559_v37  ;;  %1138 = vmatpush2.msra.mxu1 %v687_v38  ;;  %v1209_v36 = vld [vmem:[#allocation9 + $0xf8] sm:$0xff]  ;;  %v1208_v37 = vld [vmem:[#allocation9 + $0xf0] sm:$0xff]  ;;  %v1207_v38 = vld [vmem:[#allocation9 + $0xe8] sm:$0xff] }
 0x112   :  { %1068 = vmatprep.subr.mxu0 %v556_v26  ;;  %1139 = vmatprep.subr.mxu1 %v684_v39  ;;  %v1206_v26 = vld [vmem:[#allocation9 + $0xe0] sm:$0xff]  ;;  %v1205_v39 = vld [vmem:[#allocation9 + $0xd8] sm:$0xff] }
 0x113   :  { %1069 = vmatpush2.msra.mxu0 %v555_v40  ;;  %1140 = vmatpush2.msra.mxu1 %v683_v24  ;;  %v1204_v40 = vld [vmem:[#allocation9 + $0xd0] sm:$0xff]  ;;  %v1203_v24 = vld [vmem:[#allocation9 + $0xc8] sm:$0xff] }
 0x114   :  { %1070 = vmatprep.subr.mxu0 %v552_v41  ;;  %1141 = vmatprep.subr.mxu1 %v680_v42  ;;  %v1202_v41 = vld [vmem:[#allocation9 + $0xc0] sm:$0xff]  ;;  %v1272_v42 = vld [vmem:[#allocation9 + $0x2f0] sm:$0xff] }
 0x115   :  { %1071 = vmatpush2.msra.mxu0 %v551_v43  ;;  %1142 = vmatpush2.msra.mxu1 %v679_v44  ;;  %v1271_v43 = vld [vmem:[#allocation9 + $0x2e8] sm:$0xff]  ;;  %v1269_v44 = vld [vmem:[#allocation9 + $0x2d8] sm:$0xff] }
 0x116   :  { %1072 = vmatprep.subr.mxu0 %v548_v45  ;;  %1143 = vmatprep.subr.mxu1 %v676_v46  ;;  %v1199_v45 = vld [vmem:[#allocation9 + $0xa8] sm:$0xff]  ;;  %v1268_v46 = vld [vmem:[#allocation9 + $0x2d0] sm:$0xff] }
 0x117   :  { %1073 = vmatpush2.msra.mxu0 %v547_v47  ;;  %1144 = vmatpush2.msra.mxu1 %v675_v48  ;;  %v1198_v47 = vld [vmem:[#allocation9 + $0xa0] sm:$0xff]  ;;  %v1267_v48 = vld [vmem:[#allocation9 + $0x2c8] sm:$0xff] }
 0x118   :  { %1074 = vmatprep.subr.mxu0 %v544_v49  ;;  %1145 = vmatprep.subr.mxu1 %v672_v50  ;;  %v1197_v49 = vld [vmem:[#allocation9 + $0x98] sm:$0xff]  ;;  %v1266_v50 = vld [vmem:[#allocation9 + $0x2c0] sm:$0xff] }
 0x119   :  { %1075 = vmatpush2.msra.mxu0 %v543_v51  ;;  %1146 = vmatpush2.msra.mxu1 %v671_v52  ;;  %v1196_v51 = vld [vmem:[#allocation9 + $0x90] sm:$0xff]  ;;  %v1265_v52 = vld [vmem:[#allocation9 + $0x2b8] sm:$0xff] }
 0x11a   :  { %1076 = vmatprep.subr.mxu0 %v540_v53  ;;  %1147 = vmatprep.subr.mxu1 %v668_v54  ;;  %v1195_v53 = vld [vmem:[#allocation9 + $0x88] sm:$0xff]  ;;  %v1264_v54 = vld [vmem:[#allocation9 + $0x2b0] sm:$0xff] }
 0x11b   :  { %1077 = vmatpush2.msra.mxu0 %v539_v55  ;;  %1148 = vmatpush2.msra.mxu1 %v667_v56  ;;  %v1194_v55 = vld [vmem:[#allocation9 + $0x80] sm:$0xff]  ;;  %v1263_v56 = vld [vmem:[#allocation9 + $0x2a8] sm:$0xff] }
 0x11c   :  { %1078 = vmatprep.subr.mxu0 %v536_v57  ;;  %1149 = vmatprep.subr.mxu1 %v664_v58  ;;  %v1193_v57 = vld [vmem:[#allocation9 + $0x78] sm:$0xff]  ;;  %v1262_v58 = vld [vmem:[#allocation9 + $0x2a0] sm:$0xff] }
 0x11d   :  { %1079 = vmatpush2.msra.mxu0 %v535_v59  ;;  %1150 = vmatpush2.msra.mxu1 %v663_v60  ;;  %v1192_v59 = vld [vmem:[#allocation9 + $0x70] sm:$0xff]  ;;  %v1261_v60 = vld [vmem:[#allocation9 + $0x298] sm:$0xff] }
 0x11e   :  { %1080 = vmatprep.subr.mxu0 %v532_v61  ;;  %1151 = vmatprep.subr.mxu1 %v660_v62  ;;  %v1191_v61 = vld [vmem:[#allocation9 + $0x68] sm:$0xff]  ;;  %v1260_v62 = vld [vmem:[#allocation9 + $0x290] sm:$0xff] }
 0x11f   :  { %1081 = vmatpush2.msra.mxu0 %v531_v63  ;;  %1152 = vmatpush2.msra.mxu1 %v659_v0  ;;  %v1190_v63 = vld [vmem:[#allocation9 + $0x60] sm:$0xff]  ;;  %v1259_v0 = vld [vmem:[#allocation9 + $0x288] sm:$0xff] }
 0x120   :  { %1082 = vmatprep.subr.mxu0 %v528_v1  ;;  %1153 = vmatprep.subr.mxu1 %v656_v2  ;;  %v1189_v1 = vld [vmem:[#allocation9 + $0x58] sm:$0xff]  ;;  %v1258_v2 = vld [vmem:[#allocation9 + $0x280] sm:$0xff] }
 0x121   :  { %1083 = vmatpush2.msra.mxu0 %v527_v3  ;;  %1154 = vmatpush2.msra.mxu1 %v655_v4  ;;  %v1188_v3 = vld [vmem:[#allocation9 + $0x50] sm:$0xff]  ;;  %v1257_v4 = vld [vmem:[#allocation9 + $0x278] sm:$0xff] }
 0x122   :  { %1084 = vmatprep.subr.mxu0 %v524_v5  ;;  %1155 = vmatprep.subr.mxu1 %v652_v6  ;;  %v1187_v5 = vld [vmem:[#allocation9 + $0x48] sm:$0xff]  ;;  %v1256_v6 = vld [vmem:[#allocation9 + $0x270] sm:$0xff] }
 0x123   :  { %1085 = vmatpush2.msra.mxu0 %v523_v7  ;;  %1156 = vmatpush2.msra.mxu1 %v651_v8  ;;  %v1186_v7 = vld [vmem:[#allocation9 + $0x40] sm:$0xff]  ;;  %v1255_v8 = vld [vmem:[#allocation9 + $0x268] sm:$0xff] }
 0x124   :  { %1086 = vmatprep.subr.mxu0 %v520_v10  ;;  %1157 = vmatprep.subr.mxu1 %v648_v11  ;;  %v1185_v10 = vld [vmem:[#allocation9 + $0x38] sm:$0xff]  ;;  %v1254_v11 = vld [vmem:[#allocation9 + $0x260] sm:$0xff] }
 0x125   :  { %1087 = vmatpush2.msra.mxu0 %v519_v12  ;;  %1158 = vmatpush2.msra.mxu1 %v647_v13  ;;  %v1184_v12 = vld [vmem:[#allocation9 + $0x30] sm:$0xff]  ;;  %v1253_v13 = vld [vmem:[#allocation9 + $0x258] sm:$0xff] }
 0x126   :  { %1088 = vmatprep.subr.mxu0 %v516_v14  ;;  %1159 = vmatprep.subr.mxu1 %v644_v15  ;;  %v1183_v14 = vld [vmem:[#allocation9 + $0x28] sm:$0xff]  ;;  %v1252_v15 = vld [vmem:[#allocation9 + $0x250] sm:$0xff] }
 0x127   :  { %1089 = vmatpush2.msra.mxu0 %v515_v16  ;;  %1160 = vmatpush2.msra.mxu1 %v643_v17  ;;  %v1182_v16 = vld [vmem:[#allocation9 + $0x20] sm:$0xff]  ;;  %v1251_v17 = vld [vmem:[#allocation9 + $0x248] sm:$0xff] }
 0x128   :  { %1090 = vmatprep.subr.mxu0 %v512_v18  ;;  %1161 = vmatprep.subr.mxu1 %v640_v19  ;;  %v1181_v18 = vld [vmem:[#allocation9 + $0x18] sm:$0xff]  ;;  %v1250_v19 = vld [vmem:[#allocation9 + $0x240] sm:$0xff] }
 0x129   :  { %1091 = vmatpush2.msra.mxu0 %v511_v20  ;;  %1162 = vmatpush2.msra.mxu1 %v639_v21  ;;  %v1180_v20 = vld [vmem:[#allocation9 + $0x10] sm:$0xff]  ;;  %v1249_v21 = vld [vmem:[#allocation9 + $0x238] sm:$0xff] }
 0x12a   :  { %1092 = vmatprep.subr.mxu0 %v508_v22  ;;  %1163 = vmatprep.subr.mxu1 %v636_v25  ;;  %v1179_v22 = vld [vmem:[#allocation9 + $0x8] sm:$0xff]  ;;  %v1248_v25 = vld [vmem:[#allocation9 + $0x230] sm:$0xff] }
 0x12b   :  { %1093 = vmatpush2.msra.mxu0 %v507_v28  ;;  %1164 = vmatpush2.msra.mxu1 %v635_v30  ;;  %v1178_v28 = vld [vmem:[#allocation9] sm:$0xff]  ;;  %v1247_v30 = vld [vmem:[#allocation9 + $0x228] sm:$0xff] }
 0x12c   :  { %1094 = vmatprep.subr.mxu0 %v504_v31  ;;  %1165 = vmatprep.subr.mxu1 %v632_v32  ;;  %v1241_v31 = vld [vmem:[#allocation9 + $0x1f8] sm:$0xff]  ;;  %v1246_v32 = vld [vmem:[#allocation9 + $0x220] sm:$0xff] }
 0x12d   :  { %1095 = vmatpush2.msra.mxu0 %v503_v33  ;;  %1096 = vmatprep.mubr.f32.mxu0 %v1919_v29  ;;  %v1273_v29 = vld [vmem:[#allocation9 + $0x2f8] sm:$0xff]  ;;  %v1240_v33 = vld [vmem:[#allocation9 + $0x1f0] sm:$0xff] }
 0x12e   :  { %1166 = vmatpush2.msra.mxu1 %v631_v34  ;;  %1167 = vmatprep.mubr.f32.mxu1 %v1935_v35  ;;  %v1201_v35 = vld [vmem:[#allocation9 + $0xb8] sm:$0xff] }
 0x12f   :  { %1097 = vmatmul.mubr.f32.vlgmr.msra.gmra.mxu0 %v1914_v27  ;;  %1168 = vmatmul.mubr.f32.vlgmr.msra.gmra.mxu1 %v1931_v9  ;;  %v1270_v27 = vld [vmem:[#allocation9 + $0x2e0] sm:$0xff]  ;;  %v1200_v9 = vld [vmem:[#allocation9 + $0xb0] sm:$0xff]  ;;  %v1245_v34 = vld [vmem:[#allocation9 + $0x218] sm:$0xff] }
 0x130   :  { %1318 = vmatprep.subr.mxu0 %v1209_v36  ;;  %1389 = vmatprep.subr.mxu1 %v1273_v29  ;;  %v1239_v36 = vld [vmem:[#allocation9 + $0x1e8] sm:$0xff] }
 0x131   :  { %1319 = vmatpush1.msra.mxu0 %v1208_v37  ;;  %1390 = vmatpush1.msra.mxu1 %v1272_v42  ;;  %v1244_v37 = vld [vmem:[#allocation9 + $0x210] sm:$0xff]  ;;  %v1235_v29 = vld [vmem:[#allocation9 + $0x1c8] sm:$0xff] }
 0x132   :  { %1320 = vmatprep.subr.mxu0 %v1207_v38  ;;  %1391 = vmatprep.subr.mxu1 %v1271_v43  ;;  %v1238_v38 = vld [vmem:[#allocation9 + $0x1e0] sm:$0xff]  ;;  %v1304_v42 = vld [vmem:[#allocation9 + $0x3f0] sm:$0xff] }
 0x133   :  { %1321 = vmatpush1.msra.mxu0 %v1206_v26  ;;  %1392 = vmatpush1.msra.mxu1 %v1270_v27  ;;  %v1243_v26 = vld [vmem:[#allocation9 + $0x208] sm:$0xff]  ;;  %v1234_v43 = vld [vmem:[#allocation9 + $0x1c0] sm:$0xff]  ;;  %v1233_v27 = vld [vmem:[#allocation9 + $0x1b8] sm:$0xff] }
 0x134   :  { %1322 = vmatprep.subr.mxu0 %v1205_v39  ;;  %1393 = vmatprep.subr.mxu1 %v1269_v44  ;;  %v1237_v39 = vld [vmem:[#allocation9 + $0x1d8] sm:$0xff]  ;;  %v1232_v44 = vld [vmem:[#allocation9 + $0x1b0] sm:$0xff] }
 0x135   :  { %1323 = vmatpush1.msra.mxu0 %v1204_v40  ;;  %1394 = vmatpush1.msra.mxu1 %v1268_v46  ;;  %v1242_v40 = vld [vmem:[#allocation9 + $0x200] sm:$0xff]  ;;  %v1231_v46 = vld [vmem:[#allocation9 + $0x1a8] sm:$0xff] }
 0x136   :  { %1324 = vmatprep.subr.mxu0 %v1203_v24  ;;  %1395 = vmatprep.subr.mxu1 %v1267_v48  ;;  %v1236_v24 = vld [vmem:[#allocation9 + $0x1d0] sm:$0xff]  ;;  %v1230_v48 = vld [vmem:[#allocation9 + $0x1a0] sm:$0xff] }
 0x137   :  { %1325 = vmatpush1.msra.mxu0 %v1202_v41  ;;  %1396 = vmatpush1.msra.mxu1 %v1266_v50  ;;  %v1305_v41 = vld [vmem:[#allocation9 + $0x3f8] sm:$0xff] }
 0x138   :  { %1326 = vmatprep.subr.mxu0 %v1201_v35  ;;  %1397 = vmatprep.subr.mxu1 %v1265_v52  ;;  %v1303_v35 = vld [vmem:[#allocation9 + $0x3e8] sm:$0xff]  ;;  %v1229_v50 = vld [vmem:[#allocation9 + $0x198] sm:$0xff]  ;;  %v1228_v52 = vld [vmem:[#allocation9 + $0x190] sm:$0xff] }
 0x139   :  { %1327 = vmatpush1.msra.mxu0 %v1200_v9  ;;  %1398 = vmatpush1.msra.mxu1 %v1264_v54  ;;  %v1302_v9 = vld [vmem:[#allocation9 + $0x3e0] sm:$0xff]  ;;  %v1227_v54 = vld [vmem:[#allocation9 + $0x188] sm:$0xff] }
 0x13a   :  { %1328 = vmatprep.subr.mxu0 %v1199_v45  ;;  %1399 = vmatprep.subr.mxu1 %v1263_v56  ;;  %v1301_v45 = vld [vmem:[#allocation9 + $0x3d8] sm:$0xff]  ;;  %v1226_v56 = vld [vmem:[#allocation9 + $0x180] sm:$0xff] }
 0x13b   :  { %1329 = vmatpush1.msra.mxu0 %v1198_v47  ;;  %1400 = vmatpush1.msra.mxu1 %v1262_v58  ;;  %v1300_v47 = vld [vmem:[#allocation9 + $0x3d0] sm:$0xff]  ;;  %v1225_v58 = vld [vmem:[#allocation9 + $0x178] sm:$0xff] }
 0x13c   :  { %1330 = vmatprep.subr.mxu0 %v1197_v49  ;;  %1401 = vmatprep.subr.mxu1 %v1261_v60  ;;  %v1299_v49 = vld [vmem:[#allocation9 + $0x3c8] sm:$0xff]  ;;  %v1224_v60 = vld [vmem:[#allocation9 + $0x170] sm:$0xff] }
 0x13d   :  { %1331 = vmatpush1.msra.mxu0 %v1196_v51  ;;  %1402 = vmatpush1.msra.mxu1 %v1260_v62  ;;  %v1298_v51 = vld [vmem:[#allocation9 + $0x3c0] sm:$0xff]  ;;  %v1223_v62 = vld [vmem:[#allocation9 + $0x168] sm:$0xff] }
 0x13e   :  { %1332 = vmatprep.subr.mxu0 %v1195_v53  ;;  %1403 = vmatprep.subr.mxu1 %v1259_v0  ;;  %v1297_v53 = vld [vmem:[#allocation9 + $0x3b8] sm:$0xff]  ;;  %v1222_v0 = vld [vmem:[#allocation9 + $0x160] sm:$0xff] }
 0x13f   :  { %1333 = vmatpush1.msra.mxu0 %v1194_v55  ;;  %1404 = vmatpush1.msra.mxu1 %v1258_v2  ;;  %v1296_v55 = vld [vmem:[#allocation9 + $0x3b0] sm:$0xff]  ;;  %v1221_v2 = vld [vmem:[#allocation9 + $0x158] sm:$0xff] }
 0x140   :  { %1334 = vmatprep.subr.mxu0 %v1193_v57  ;;  %1405 = vmatprep.subr.mxu1 %v1257_v4  ;;  %v1295_v57 = vld [vmem:[#allocation9 + $0x3a8] sm:$0xff]  ;;  %v1220_v4 = vld [vmem:[#allocation9 + $0x150] sm:$0xff] }
 0x141   :  { %1335 = vmatpush1.msra.mxu0 %v1192_v59  ;;  %1406 = vmatpush1.msra.mxu1 %v1256_v6  ;;  %v1294_v59 = vld [vmem:[#allocation9 + $0x3a0] sm:$0xff]  ;;  %v1219_v6 = vld [vmem:[#allocation9 + $0x148] sm:$0xff] }
 0x142   :  { %1336 = vmatprep.subr.mxu0 %v1191_v61  ;;  %1407 = vmatprep.subr.mxu1 %v1255_v8  ;;  %v1293_v61 = vld [vmem:[#allocation9 + $0x398] sm:$0xff]  ;;  %v1218_v8 = vld [vmem:[#allocation9 + $0x140] sm:$0xff] }
 0x143   :  { %1337 = vmatpush1.msra.mxu0 %v1190_v63  ;;  %1408 = vmatpush1.msra.mxu1 %v1254_v11  ;;  %v1292_v63 = vld [vmem:[#allocation9 + $0x390] sm:$0xff]  ;;  %v1217_v11 = vld [vmem:[#allocation9 + $0x138] sm:$0xff] }
 0x144   :  { %1338 = vmatprep.subr.mxu0 %v1189_v1  ;;  %1409 = vmatprep.subr.mxu1 %v1253_v13  ;;  %v1291_v1 = vld [vmem:[#allocation9 + $0x388] sm:$0xff]  ;;  %v1216_v13 = vld [vmem:[#allocation9 + $0x130] sm:$0xff] }
 0x145   :  { %1339 = vmatpush1.msra.mxu0 %v1188_v3  ;;  %1410 = vmatpush1.msra.mxu1 %v1252_v15  ;;  %v1290_v3 = vld [vmem:[#allocation9 + $0x380] sm:$0xff]  ;;  %v1215_v15 = vld [vmem:[#allocation9 + $0x128] sm:$0xff] }
 0x146   :  { %1340 = vmatprep.subr.mxu0 %v1187_v5  ;;  %1411 = vmatprep.subr.mxu1 %v1251_v17  ;;  %v1289_v5 = vld [vmem:[#allocation9 + $0x378] sm:$0xff]  ;;  %v1214_v17 = vld [vmem:[#allocation9 + $0x120] sm:$0xff] }
 0x147   :  { %1341 = vmatpush1.msra.mxu0 %v1186_v7  ;;  %1412 = vmatpush1.msra.mxu1 %v1250_v19  ;;  %v1288_v7 = vld [vmem:[#allocation9 + $0x370] sm:$0xff] }
 0x148   :  { %1342 = vmatprep.subr.mxu0 %v1185_v10  ;;  %1413 = vmatprep.subr.mxu1 %v1249_v21  ;;  %v1287_v10 = vld [vmem:[#allocation9 + $0x368] sm:$0xff]  ;;  %v1212_v19 = vld [vmem:[#allocation9 + $0x110] sm:$0xff]  ;;  %v1210_v21 = vld [vmem:[#allocation9 + $0x100] sm:$0xff] }
 0x149   :  { %1343 = vmatpush1.msra.mxu0 %v1184_v12  ;;  %1414 = vmatpush1.msra.mxu1 %v1248_v25  ;;  %v1286_v12 = vld [vmem:[#allocation9 + $0x360] sm:$0xff] }
 0x14a   :  { %1344 = vmatprep.subr.mxu0 %v1183_v14  ;;  %1415 = vmatprep.subr.mxu1 %v1247_v30  ;;  %v1285_v14 = vld [vmem:[#allocation9 + $0x358] sm:$0xff]  ;;  %v1282_v25 = vld [vmem:[#allocation9 + $0x340] sm:$0xff]  ;;  %v1280_v30 = vld [vmem:[#allocation9 + $0x330] sm:$0xff] }
 0x14b   :  { %1345 = vmatpush1.msra.mxu0 %v1182_v16  ;;  %1416 = vmatpush1.msra.mxu1 %v1246_v32  ;;  %v1284_v16 = vld [vmem:[#allocation9 + $0x350] sm:$0xff]  ;;  %v1278_v32 = vld [vmem:[#allocation9 + $0x320] sm:$0xff] }
 0x14c   :  { %1346 = vmatprep.subr.mxu0 %v1181_v18  ;;  %1417 = vmatprep.subr.mxu1 %v1245_v34  ;;  %v1213_v18 = vld [vmem:[#allocation9 + $0x118] sm:$0xff]  ;;  %v1276_v34 = vld [vmem:[#allocation9 + $0x310] sm:$0xff] }
 0x14d   :  { %1347 = vmatpush1.msra.mxu0 %v1180_v20  ;;  %1418 = vmatpush1.msra.mxu1 %v1244_v37  ;;  %v1211_v20 = vld [vmem:[#allocation9 + $0x108] sm:$0xff]  ;;  %v1274_v37 = vld [vmem:[#allocation9 + $0x300] sm:$0xff] }
 0x14e   :  { %1348 = vmatprep.subr.mxu0 %v1179_v22  ;;  %1419 = vmatprep.subr.mxu1 %v1243_v26  ;;  %v1283_v22 = vld [vmem:[#allocation9 + $0x348] sm:$0xff]  ;;  %v693_v26 = vld [vmem:[#allocation8] sm:$0xf] }
 0x14f   :  { %1349 = vmatpush1.msra.mxu0 %v1178_v28  ;;  %1420 = vmatpush1.msra.mxu1 %v1242_v40  ;;  %v1281_v28 = vld [vmem:[#allocation9 + $0x338] sm:$0xff] }
 0x150   :  { %1350 = vmatprep.subr.mxu0 %v1241_v31  ;;  %1421 = vmatprep.subr.mxu1 %v1305_v41  ;;  %v1279_v31 = vld [vmem:[#allocation9 + $0x328] sm:$0xff] }
 0x151   :  { %1351 = vmatpush2.msra.mxu0 %v1240_v33  ;;  %1422 = vmatpush2.msra.mxu1 %v1304_v42  ;;  %v1277_v33 = vld [vmem:[#allocation9 + $0x318] sm:$0xff] }
 0x152   :  { %1352 = vmatprep.subr.mxu0 %v1239_v36  ;;  %1423 = vmatprep.subr.mxu1 %v1303_v35  ;;  %v1275_v36 = vld [vmem:[#allocation9 + $0x308] sm:$0xff] }
 0x153   :  { %1353 = vmatpush2.msra.mxu0 %v1238_v38  ;;  %1424 = vmatpush2.msra.mxu1 %v1302_v9  ;;  %v697_v38 = vsub.s32 0, %v1893_v23 }
 0x154   :  { %1354 = vmatprep.subr.mxu0 %v1237_v39  ;;  %1425 = vmatprep.subr.mxu1 %v1301_v45  ;;  %v701_v39 = vsub.s32 1, %v1893_v23 }
 0x155   :  { %1355 = vmatpush2.msra.mxu0 %v1236_v24  ;;  %1426 = vmatpush2.msra.mxu1 %v1300_v47  ;;  %v698_v24 = vrot.slane %v693_v26, %v697_v38 }
 0x156   :  { %1356 = vmatprep.subr.mxu0 %v1235_v29  ;;  %1427 = vmatprep.subr.mxu1 %v1299_v49  ;;  %v702_v41 = vrot.slane %v693_v26, %v701_v39 }
 0x157   :  { %1357 = vmatpush2.msra.mxu0 %v1234_v43  ;;  %1428 = vmatpush2.msra.mxu1 %v1298_v51  ;;  %v705_v51 = vsub.s32 2, %v1893_v23 }
 0x158   :  { %1358 = vmatprep.subr.mxu0 %v1233_v27  ;;  %1429 = vmatprep.subr.mxu1 %v1297_v53 }
 0x159   :  { %1359 = vmatpush2.msra.mxu0 %v1232_v44  ;;  %1430 = vmatpush2.msra.mxu1 %v1296_v55 }
 0x15a   :  { %1360 = vmatprep.subr.mxu0 %v1231_v46  ;;  %1431 = vmatprep.subr.mxu1 %v1295_v57 }
 0x15b   :  { %1361 = vmatpush2.msra.mxu0 %v1230_v48  ;;  %1432 = vmatpush2.msra.mxu1 %v1294_v59 }
 0x15c   :  { %1362 = vmatprep.subr.mxu0 %v1229_v50  ;;  %1433 = vmatprep.subr.mxu1 %v1293_v61 }
 0x15d   :  { %1363 = vmatpush2.msra.mxu0 %v1228_v52  ;;  %1434 = vmatpush2.msra.mxu1 %v1292_v63  ;;  %v709_v52 = vsub.s32 3, %v1893_v23 }
 0x15e   :  { %1364 = vmatprep.subr.mxu0 %v1227_v54  ;;  %1435 = vmatprep.subr.mxu1 %v1291_v1  ;;  %v706_v54 = vrot.slane %v693_v26, %v705_v51 }
 0x15f   :  { %1365 = vmatpush2.msra.mxu0 %v1226_v56  ;;  %1436 = vmatpush2.msra.mxu1 %v1290_v3  ;;  %v710_v55 = vrot.slane %v693_v26, %v709_v52  ;;  %v1480_v26 = vld [vmem:[#allocation12 + $0x90] sm:$0xff] }
 0x160   :  { %1366 = vmatprep.subr.mxu0 %v1225_v58  ;;  %1437 = vmatprep.subr.mxu1 %v1289_v5  ;;  %v1493_v5 = vld [vmem:[#allocation12 + $0xf8] sm:$0xff] }
 0x161   :  { %1367 = vmatpush2.msra.mxu0 %v1224_v60  ;;  %1438 = vmatpush2.msra.mxu1 %v1288_v7  ;;  %v1492_v7 = vld [vmem:[#allocation12 + $0xf0] sm:$0xff] }
 0x162   :  { %1368 = vmatprep.subr.mxu0 %v1223_v62  ;;  %1439 = vmatprep.subr.mxu1 %v1287_v10  ;;  %v1491_v10 = vld [vmem:[#allocation12 + $0xe8] sm:$0xff] }
 0x163   :  { %1369 = vmatpush2.msra.mxu0 %v1222_v0  ;;  %1440 = vmatpush2.msra.mxu1 %v1286_v12  ;;  %v1490_v12 = vld [vmem:[#allocation12 + $0xe0] sm:$0xff] }
 0x164   :  { %1370 = vmatprep.subr.mxu0 %v1221_v2  ;;  %1441 = vmatprep.subr.mxu1 %v1285_v14  ;;  %v1489_v14 = vld [vmem:[#allocation12 + $0xd8] sm:$0xff] }
 0x165   :  { %1371 = vmatpush2.msra.mxu0 %v1220_v4  ;;  %1442 = vmatpush2.msra.mxu1 %v1284_v16  ;;  %v1488_v16 = vld [vmem:[#allocation12 + $0xd0] sm:$0xff] }
 0x166   :  { %1372 = vmatprep.subr.mxu0 %v1219_v6  ;;  %1443 = vmatprep.subr.mxu1 %v1283_v22  ;;  %v1477_v6 = vld [vmem:[#allocation12 + $0x78] sm:$0xff] }
 0x167   :  { %1373 = vmatpush2.msra.mxu0 %v1218_v8  ;;  %1444 = vmatpush2.msra.mxu1 %v1282_v25  ;;  %v1476_v8 = vld [vmem:[#allocation12 + $0x70] sm:$0xff]  ;;  %v1485_v22 = vld [vmem:[#allocation12 + $0xb8] sm:$0xff] }
 0x168   :  { %1374 = vmatprep.subr.mxu0 %v1217_v11  ;;  %1445 = vmatprep.subr.mxu1 %v1281_v28  ;;  %v1475_v11 = vld [vmem:[#allocation12 + $0x68] sm:$0xff]  ;;  %v1469_v25 = vld [vmem:[#allocation12 + $0x38] sm:$0xff]  ;;  %v1484_v28 = vld [vmem:[#allocation12 + $0xb0] sm:$0xff] }
 0x169   :  { %1375 = vmatpush2.msra.mxu0 %v1216_v13  ;;  %1446 = vmatpush2.msra.mxu1 %v1280_v30  ;;  %v1474_v13 = vld [vmem:[#allocation12 + $0x60] sm:$0xff]  ;;  %v1468_v30 = vld [vmem:[#allocation12 + $0x30] sm:$0xff] }
 0x16a   :  { %1376 = vmatprep.subr.mxu0 %v1215_v15  ;;  %1447 = vmatprep.subr.mxu1 %v1279_v31  ;;  %v1473_v15 = vld [vmem:[#allocation12 + $0x58] sm:$0xff]  ;;  %v1483_v31 = vld [vmem:[#allocation12 + $0xa8] sm:$0xff] }
 0x16b   :  { %1377 = vmatpush2.msra.mxu0 %v1214_v17  ;;  %1448 = vmatpush2.msra.mxu1 %v1278_v32  ;;  %v814_v40 = vpop.f32.mrf.mxu0  ;;  %v1472_v17 = vld [vmem:[#allocation12 + $0x50] sm:$0xff]  ;;  %v1467_v32 = vld [vmem:[#allocation12 + $0x28] sm:$0xff] }
 0x16c   :  { %1378 = vmatprep.subr.mxu0 %v1213_v18  ;;  %1449 = vmatprep.subr.mxu1 %v1277_v33  ;;  %v815_v43 = vadd.f32 %v814_v40, %v698_v24  ;;  %v1487_v18 = vld [vmem:[#allocation12 + $0xc8] sm:$0xff]  ;;  %v1482_v33 = vld [vmem:[#allocation12 + $0xa0] sm:$0xff]  ;;  %v1464_v40 = vld [vmem:[#allocation12 + $0x10] sm:$0xff] }
 0x16d   :  { %1379 = vmatpush2.msra.mxu0 %v1212_v19  ;;  %1450 = vmatpush2.msra.mxu1 %v1276_v34  ;;  %v885_v29 = vpop.f32.mrf.mxu1  ;;  %v816_v42 = vpop.f32.mrf.mxu0  ;;  %v1471_v19 = vld [vmem:[#allocation12 + $0x48] sm:$0xff]  ;;  %v1466_v34 = vld [vmem:[#allocation12 + $0x20] sm:$0xff] }
 0x16e   :  { %1380 = vmatprep.subr.mxu0 %v1211_v20  ;;  %1451 = vmatprep.subr.mxu1 %v1275_v36  ;;  %v817_v35 = vadd.f32 %v816_v42, %v702_v41  ;;  %v886_v9 = vadd.f32 %v885_v29, %v815_v43  ;;  %v1486_v20 = vld [vmem:[#allocation12 + $0xc0] sm:$0xff]  ;;  %v1481_v36 = vld [vmem:[#allocation12 + $0x98] sm:$0xff]  ;;  %v1479_v24 = vld [vmem:[#allocation12 + $0x88] sm:$0xff] }
 0x16f   :  { %1381 = vmatpush2.msra.mxu0 %v1210_v21  ;;  %1452 = vmatpush2.msra.mxu1 %v1274_v37  ;;  %v887_v27 = vpop.f32.mrf.mxu1  ;;  %v1470_v21 = vld [vmem:[#allocation12 + $0x40] sm:$0xff]  ;;  %v1465_v37 = vld [vmem:[#allocation12 + $0x18] sm:$0xff]  ;;  %v1463_v41 = vld [vmem:[#allocation12 + $0x8] sm:$0xff] }
 0x170   :  { %v888_v45 = vadd.f32 %v887_v27, %v817_v35  ;;  %1591 = vmatprep.subr.mxu0 %v1493_v5  ;;  %v1478_v29 = vld [vmem:[#allocation12 + $0x80] sm:$0xff]  ;;  %v1306_v43 = vld [vmem:[#allocation11] sm:$0x3] }
 0x171   :  { %v1462_v42 = vld [vmem:[#allocation12] sm:$0xff]  ;;  %v1311_v27 = vrot.slane %v1306_v43, %v697_v38 }
 0x1ac   :  { %v956_v44 = vpop.f32.mrf.mxu0 }
 0x1ad   :  { %v957_v46 = vadd.f32 %v956_v44, %v886_v9  ;;  %v1315_v9 = vrot.slane %v1306_v43, %v701_v39 }
 0x1ae   :  { %v958_v47 = vpop.f32.mrf.mxu0  ;;  %v1027_v53 = vpop.f32.mrf.mxu1 }
 0x1af   :  { %v959_v48 = vadd.f32 %v958_v47, %v888_v45  ;;  %v1174_v50 = vmax.f32 %v957_v46, 0.0  ;;  %v1028_v57 = vadd.f32 %v1027_v53, %v706_v54  ;;  %v1590_v54 = vld [vmem:[#allocation14] ss:$0 sm:$0xff] }
 0x1b0   :  { %v1029_v56 = vpop.f32.mrf.mxu1 }
 0x1b1   :  { %v1175_v49 = vmax.f32 %v959_v48, 0.0  ;;  %v1030_v60 = vadd.f32 %v1029_v56, %v710_v55 }
 0x1b3   :  { %1382 = vmatprep.mubr.f32.mxu0 %v1175_v49 }
 0x1b4   :  { %1383 = vmatmul.mubr.f32.vlgmr.msra.gmra.mxu0 %v1174_v50 }
 0x1b5   :  { %1592 = vmatpush3.msra.mxu0 %v1477_v6 }
 0x1b6   :  { %1593 = vmatprep.subr.mxu0 %v1492_v7 }
 0x1b7   :  { %1594 = vmatpush3.msra.mxu0 %v1476_v8 }
 0x1b8   :  { %1595 = vmatprep.subr.mxu0 %v1491_v10 }
 0x1b9   :  { %1596 = vmatpush3.msra.mxu0 %v1475_v11 }
 0x1ba   :  { %1597 = vmatprep.subr.mxu0 %v1490_v12 }
 0x1bb   :  { %1598 = vmatpush3.msra.mxu0 %v1474_v13 }
 0x1bc   :  { %1599 = vmatprep.subr.mxu0 %v1489_v14 }
 0x1bd   :  { %1600 = vmatpush3.msra.mxu0 %v1473_v15 }
 0x1be   :  { %1601 = vmatprep.subr.mxu0 %v1488_v16 }
 0x1bf   :  { %1602 = vmatpush3.msra.mxu0 %v1472_v17 }
 0x1c0   :  { %1603 = vmatprep.subr.mxu0 %v1487_v18 }
 0x1c1   :  { %1604 = vmatpush3.msra.mxu0 %v1471_v19 }
 0x1c2   :  { %1605 = vmatprep.subr.mxu0 %v1486_v20 }
 0x1c3   :  { %1606 = vmatpush3.msra.mxu0 %v1470_v21 }
 0x1c4   :  { %1607 = vmatprep.subr.mxu0 %v1485_v22 }
 0x1c5   :  { %1608 = vmatpush3.msra.mxu0 %v1469_v25 }
 0x1c6   :  { %1609 = vmatprep.subr.mxu0 %v1484_v28 }
 0x1c7   :  { %1610 = vmatpush3.msra.mxu0 %v1468_v30 }
 0x1c8   :  { %1611 = vmatprep.subr.mxu0 %v1483_v31 }
 0x1c9   :  { %1612 = vmatpush3.msra.mxu0 %v1467_v32 }
 0x1ca   :  { %1613 = vmatprep.subr.mxu0 %v1482_v33 }
 0x1cb   :  { %1614 = vmatpush3.msra.mxu0 %v1466_v34 }
 0x1cc   :  { %1615 = vmatprep.subr.mxu0 %v1481_v36 }
 0x1cd   :  { %1616 = vmatpush3.msra.mxu0 %v1465_v37 }
 0x1ce   :  { %1617 = vmatprep.subr.mxu0 %v1480_v26 }
 0x1cf   :  { %1618 = vmatpush3.msra.mxu0 %v1464_v40 }
 0x1d0   :  { %1619 = vmatprep.subr.mxu0 %v1479_v24 }
 0x1d1   :  { %1620 = vmatpush3.msra.mxu0 %v1463_v41 }
 0x1d2   :  { %1621 = vmatprep.subr.mxu0 %v1478_v29 }
 0x1d3   :  { %1622 = vmatpush3.msra.mxu0 %v1462_v42 }
 0x1ef   :  { %v1098_v58 = vpop.f32.mrf.mxu0  ;;  %v1169_v59 = vpop.f32.mrf.mxu1 }
 0x1f0   :  { %v1099_v61 = vadd.f32 %v1098_v58, %v1028_v57 }
 0x1f1   :  { %v1100_v62 = vpop.f32.mrf.mxu0  ;;  %v1171_v1 = vpop.f32.mrf.mxu1 }
 0x1f2   :  { %v1101_v63 = vadd.f32 %v1100_v62, %v1030_v60  ;;  %v1170_v0 = vadd.f32 %v1169_v59, %v1099_v61 }
 0x1f4   :  { %v1172_v2 = vadd.f32 %v1171_v1, %v1101_v63  ;;  %v1176_v4 = vmax.f32 %v1170_v0, 0.0 }
 0x1f6   :  { %v1177_v3 = vmax.f32 %v1172_v2, 0.0 }
 0x1f8   :  { %1453 = vmatprep.mubr.f32.mxu1 %v1177_v3 }
 0x1f9   :  { %1454 = vmatmul.mubr.f32.vlgmr.msra.gmra.mxu1 %v1176_v4 }
 0x274   :  { %v1384_v35 = vpop.f32.mrf.mxu0 }
 0x275   :  { %v1385_v45 = vadd.f32 %v1384_v35, %v1311_v27 }
 0x276   :  { %v1386_v44 = vpop.f32.mrf.mxu0 }
 0x277   :  { %v1387_v47 = vadd.f32 %v1386_v44, %v1315_v9 }
 0x2b9   :  { %v1455_v46 = vpop.f32.mrf.mxu1 }
 0x2ba   :  { %v1456_v48 = vadd.f32 %v1455_v46, %v1385_v45 }
 0x2bb   :  { %v1457_v49 = vpop.f32.mrf.mxu1 }
 0x2bc   :  { %v1458_v50 = vadd.f32 %v1457_v49, %v1387_v47  ;;  %v1460_v52 = vmax.f32 %v1456_v48, 0.0 }
 0x2be   :  { %v1461_v51 = vmax.f32 %v1458_v50, 0.0 }
 0x2c0   :  { %1565 = vmatprep.mubr.f32.mxu0 %v1461_v51 }
 0x2c1   :  { %1566 = vmatmul.mubr.f32.vlgmr.msra.gmra.mxu0 %v1460_v52 }
 0x381   :  { %v1623_v53 = vpop.f32.mrf.mxu0 }
 0x383   :  { %v1624_v55 = vpop.f32.mrf.mxu0 }
 0x384   :  { %v1625_v38 = vadd.f32 %v1624_v55, %v1623_v53 }
 0x386   :  { %v1568_v56 = vadd.f32 %v1625_v38, %v1590_v54 }
 0x388   :  { %1571 = vst [vmem:[#allocation15] sm:$0x3] %v1568_v56 }
 0x389   :  { %1795 = shalt.err (!%p1792_p11)
}
 0x38a   :  { %1581 = dma.vmem_to_hbm [thread:$0]  %s1579_s6, 32, %s1967_s7, [#allocation5]  }
 0x38b   :  { %1812 = dma.done.wait [#allocation5], 32  }
 0x38c   :  { %1813 = vsyncadd [#allocation5], 4294967264 }
 0x38d   :  { %1585 = vsyncpa [#allocation4], 1 }
 0x38e   :  { %1586 = vsyncpa [#allocation7], 1 }
 0x38f   :  { %1587 = vsyncpa [#allocation10], 1 }
 0x390   :  { %1588 = vsyncpa [#allocation13], 1 }
 0x391   :  { %1589 = vsyncpa [#allocation5], 1 }

// kernel: tpu_custom_call.1
= control target key start
LH: loop header
LB: loop body
LE: loop exit
PB: predicated region body
PF: predicated region fallthrough
CT: control target
= control target key end

     0   :  { %12 = vsyncpa [#allocation4], 0  ;;  %s1960_s0 = inlined_call_operand.hbm [shape: bf16[2,8,768], index: 0, kind: input, shape index: {}]   ;;  %s1961_s1 = inlined_call_operand.hbm [shape: f32[768,512], index: 1, kind: input, shape index: {}]   ;;  %s1962_s2 = inlined_call_operand.hbm [shape: f32[1,512], index: 2, kind: input, shape index: {}]   ;;  %s1963_s3 = inlined_call_operand.hbm [shape: f32[512,256], index: 3, kind: input, shape index: {}]   ;;  %s1964_s4 = inlined_call_operand.hbm [shape: f32[1,256], index: 4, kind: input, shape index: {}]   ;;  %s1965_s5 = inlined_call_operand.hbm [shape: f32[256,128], index: 5, kind: input, shape index: {}]   ;;  %s1966_s6 = inlined_call_operand.hbm [shape: f32[1,128], index: 6, kind: input, shape index: {}]   ;;  %s1967_s7 = inlined_call_operand.hbm [shape: f32[2,128], index: 7, kind: output, shape index: {}]  }
   0x1   :  { %13 = vsyncpa [#allocation7], 0 }
   0x2   :  { %14 = vsyncpa [#allocation10], 0 }
   0x3   :  { %15 = vsyncpa [#allocation13], 0 }
   0x4   :  { %16 = vsyncpa [#allocation5], 0  ;;  %s1814_s24 = smov [#allocation6]  }
   0x5   :  { %s34_s25 = sshll.u32 %s1814_s24, 4  ;;  %s35_s25 = int_to_ptr.vmem [resolvable:$true] %s34_s25 }
   0x6   :  { %s1652_s26 = scalar_lea.vmem %s35_s25, 49152  ;;  %p1657_p1 = scmp.lt.s32.totalorder %s35_s25, %s35_s25 }
   0x7   :  { %p1653_p0 = scmp.ne.s32.totalorder %s35_s25, %s1652_s26  ;;  %p1658_p2 = scmp.lt.s32.totalorder %s1652_s26, %s1652_s26 }
   0x9   :  { %p1659_p3 = por %p1658_p2, %p1657_p1 }
   0xb   :  { %p1660_p4 = pnand %p1659_p3, %p1653_p0 }
   0xd   :  { %1663 = shalt.err (!%p1660_p4)
}
   0xe   :  { %s1815_s27 = smov 512   ;;  %s1816_s28 = smov 32  }
   0xf   :  { %40 = dma.hbm_to_vmem [thread:$0]  %s1961_s1, 49152, %s35_s25, [#allocation7], %s1815_s27, %s1815_s27, %s1816_s28  }
  0x10   :  { %s1817_s8 = smov [#allocation9]  }
  0x11   :  { %s56_s9 = sshll.u32 %s1817_s8, 4  ;;  %s57_s9 = int_to_ptr.vmem [resolvable:$true] %s56_s9 }
  0x12   :  { %s1672_s10 = scalar_lea.vmem %s57_s9, 16384  ;;  %p1677_p6 = scmp.lt.s32.totalorder %s57_s9, %s57_s9 }
  0x13   :  { %p1673_p5 = scmp.ne.s32.totalorder %s57_s9, %s1672_s10  ;;  %p1678_p7 = scmp.lt.s32.totalorder %s1672_s10, %s1672_s10 }
  0x15   :  { %p1679_p8 = por %p1678_p7, %p1677_p6 }
  0x17   :  { %p1680_p9 = pnand %p1679_p8, %p1673_p5 }
  0x19   :  { %1683 = shalt.err (!%p1680_p9)
}
  0x1a   :  { %s1818_s11 = smov 256   ;;  %s1819_s12 = smov 16  }
  0x1b   :  { %62 = dma.hbm_to_vmem [thread:$0]  %s1963_s3, 16384, %s57_s9, [#allocation10], %s1818_s11, %s1818_s11, %s1819_s12  }
  0x1c   :  { %s1820_s15 = smov [#allocation12]  }
  0x1d   :  { %s78_s16 = sshll.u32 %s1820_s15, 4  ;;  %s79_s16 = int_to_ptr.vmem [resolvable:$true] %s78_s16 }
  0x1e   :  { %s1692_s1 = scalar_lea.vmem %s79_s16, 4096  ;;  %p1697_p11 = scmp.lt.s32.totalorder %s79_s16, %s79_s16 }
  0x1f   :  { %p1693_p10 = scmp.ne.s32.totalorder %s79_s16, %s1692_s1  ;;  %p1698_p12 = scmp.lt.s32.totalorder %s1692_s1, %s1692_s1 }
  0x21   :  { %p1699_p13 = por %p1698_p12, %p1697_p11 }
  0x23   :  { %p1700_p0 = pnand %p1699_p13, %p1693_p10 }
  0x25   :  { %1703 = shalt.err (!%p1700_p0)
}
  0x26   :  { %s1821_s17 = smov 128   ;;  %s1822_s18 = smov 8  }
  0x27   :  { %84 = dma.hbm_to_vmem [thread:$0]  %s1965_s5, 4096, %s79_s16, [#allocation13], %s1821_s17, %s1821_s17, %s1822_s18  }
  0x28   :  { %s1823_s21 = smov [#allocation3]  }
  0x29   :  { %s22_s22 = sshll.u32 %s1823_s21, 4  ;;  %s23_s22 = int_to_ptr.vmem [resolvable:$true] %s22_s22 }
  0x2a   :  { %s1712_s3 = scalar_lea.vmem %s23_s22, 768  ;;  %p1717_p2 = scmp.lt.s32.totalorder %s23_s22, %s23_s22 }
  0x2b   :  { %p1713_p1 = scmp.ne.s32.totalorder %s23_s22, %s1712_s3  ;;  %p1718_p3 = scmp.lt.s32.totalorder %s1712_s3, %s1712_s3 }
  0x2d   :  { %p1719_p4 = por %p1718_p3, %p1717_p2 }
  0x2f   :  { %p1720_p5 = pnand %p1719_p4, %p1713_p1 }
  0x31   :  { %1723 = shalt.err (!%p1720_p5)
}
  0x32   :  { %s1824_s23 = smov 384   ;;  %s1825_s24 = smov 24  }
  0x33   :  { %28 = dma.hbm_to_vmem [thread:$0]  %s1960_s0, 768, %s23_s22, [#allocation4], %s1824_s23, %s1824_s23, %s1825_s24  }
  0x34   :  { %s1826_s27 = smov [#allocation8]   ;;  %s1827_s29 = smov [#allocation11]  }
  0x35   :  { %s47_s28 = sshll.u32 %s1826_s27, 4  ;;  %s69_s5 = sshll.u32 %s1827_s29, 4  ;;  %s48_s28 = int_to_ptr.vmem [resolvable:$true] %s47_s28  ;;  %s70_s5 = int_to_ptr.vmem [resolvable:$true] %s69_s5 }
  0x36   :  { %s1732_s30 = scalar_lea.vmem %s48_s28, 64  ;;  %p1737_p7 = scmp.lt.s32.totalorder %s48_s28, %s48_s28 }
  0x37   :  { %p1733_p6 = scmp.ne.s32.totalorder %s48_s28, %s1732_s30  ;;  %p1738_p8 = scmp.lt.s32.totalorder %s1732_s30, %s1732_s30 }
  0x39   :  { %p1739_p9 = por %p1738_p8, %p1737_p7 }
  0x3b   :  { %p1740_p10 = pnand %p1739_p9, %p1733_p6 }
  0x3d   :  { %1743 = shalt.err (!%p1740_p10)
}
  0x3e   :  { %50 = dma.hbm_to_vmem [thread:$0]  %s1962_s2, 64, %s48_s28, [#allocation7]  }
  0x3f   :  { %s1752_s10 = scalar_lea.vmem %s70_s5, 32  ;;  %p1757_p12 = scmp.lt.s32.totalorder %s70_s5, %s70_s5 }
  0x40   :  { %p1753_p11 = scmp.ne.s32.totalorder %s70_s5, %s1752_s10  ;;  %p1758_p13 = scmp.lt.s32.totalorder %s1752_s10, %s1752_s10 }
  0x42   :  { %p1759_p0 = por %p1758_p13, %p1757_p12 }
  0x44   :  { %p1760_p1 = pnand %p1759_p0, %p1753_p11 }
  0x46   :  { %1763 = shalt.err (!%p1760_p1)
}
  0x47   :  { %72 = dma.hbm_to_vmem [thread:$0]  %s1964_s4, 32, %s70_s5, [#allocation10]  }
  0x48   :  { %s1828_s12 = smov [#allocation14]  }
  0x49   :  { %s91_s13 = sshll.u32 %s1828_s12, 4  ;;  %s92_s13 = int_to_ptr.vmem [resolvable:$true] %s91_s13 }
  0x4a   :  { %s1772_s14 = scalar_lea.vmem %s92_s13, 16  ;;  %s1776_s15 = scalar_lea.vmem %s92_s13, 32 }
  0x4b   :  { %p1773_p2 = scmp.ne.s32.totalorder %s92_s13, %s1772_s14  ;;  %p1777_p3 = scmp.lt.s32.totalorder %s92_s13, %s92_s13 }
  0x4c   :  { %p1778_p4 = scmp.lt.s32.totalorder %s1776_s15, %s1772_s14 }
  0x4e   :  { %p1779_p5 = por %p1778_p4, %p1777_p3 }
  0x50   :  { %p1780_p6 = pnand %p1779_p5, %p1773_p2 }
  0x52   :  { %1783 = shalt.err (!%p1780_p6)
}
  0x53   :  { %94 = dma.hbm_to_vmem [thread:$0]  %s1966_s6, 16, %s92_s13, [#allocation13]  }
  0x54   :  { %1804 = dma.done.wait [#allocation4], 768  }
  0x55   :  { %1805 = vsyncadd [#allocation4], 4294966528 }
  0x56   :  { %1806 = dma.done.wait [#allocation7], 49216  }
  0x57   :  { %1807 = vsyncadd [#allocation7], 4294918080 }
  0x58   :  { %1808 = dma.done.wait [#allocation10], 16416  }
  0x59   :  { %1809 = vsyncadd [#allocation10], 4294950880 }
  0x5a   :  { %1810 = dma.done.wait [#allocation13], 4112  }
  0x5b   :  { %1811 = vsyncadd [#allocation13], 4294963184  ;;  %v1829_v0 = vmov 0.0   ;;  %v370_v1 = vld [vmem:[#allocation6 + $0x1e8] sm:$0xff]  ;;  %v369_v3 = vld [vmem:[#allocation6 + $0x1e0] sm:$0xff]  ;;  %vm281_vm0 = vcmask 1041409  }
  0x5c   :  { %121 = vst [vmem:[#allocation2 + $0x8] sm:$0xf] %v1829_v0  ;;  %v498_v2 = vld [vmem:[#allocation6 + $0x5e8] sm:$0xff]  ;;  %748 = vmatprep.subr.mxu0 %v370_v1  ;;  %v497_v4 = vld [vmem:[#allocation6 + $0x5e0] sm:$0xff]  ;;  %vm283_vm1 = vcmask 1043459   ;;  %vm285_vm2 = vcmask 1045509  }
  0x5d   :  { %819 = vmatprep.subr.mxu1 %v498_v2  ;;  %v366_v5 = vld [vmem:[#allocation6 + $0x1c8] sm:$0xff]  ;;  %749 = vmatpush1.msra.mxu0 %v369_v3  ;;  %v365_v7 = vld [vmem:[#allocation6 + $0x1c0] sm:$0xff]  ;;  %vm287_vm3 = vcmask 1047559   ;;  %s1831_s4 = smov [#allocation15]  }
  0x5e   :  { %v494_v6 = vld [vmem:[#allocation6 + $0x5c8] sm:$0xff]  ;;  %820 = vmatpush1.msra.mxu1 %v497_v4  ;;  %v493_v8 = vld [vmem:[#allocation6 + $0x5c0] sm:$0xff]  ;;  %750 = vmatprep.subr.mxu0 %v366_v5  ;;  %s1578_s6 = sshll.u32 %s1831_s4, 4  ;;  %s1579_s6 = int_to_ptr.vmem [resolvable:$true] %s1578_s6 }
  0x5f   :  { %v362_v9 = vld [vmem:[#allocation6 + $0x1a8] sm:$0xff]  ;;  %821 = vmatprep.subr.mxu1 %v494_v6  ;;  %v361_v11 = vld [vmem:[#allocation6 + $0x1a0] sm:$0xff]  ;;  %751 = vmatpush1.msra.mxu0 %v365_v7  ;;  %s1784_s1 = scalar_lea.vmem %s1579_s6, 32  ;;  %p1789_p8 = scmp.lt.s32.totalorder %s1579_s6, %s1579_s6 }
  0x60   :  { %v490_v10 = vld [vmem:[#allocation6 + $0x5a8] sm:$0xff]  ;;  %v489_v12 = vld [vmem:[#allocation6 + $0x5a0] sm:$0xff]  ;;  %822 = vmatpush1.msra.mxu1 %v493_v8  ;;  %752 = vmatprep.subr.mxu0 %v362_v9  ;;  %p1785_p7 = scmp.ne.s32.totalorder %s1579_s6, %s1784_s1  ;;  %p1790_p9 = scmp.lt.s32.totalorder %s1784_s1, %s1784_s1 }
  0x61   :  { %v358_v13 = vld [vmem:[#allocation6 + $0x188] sm:$0xff]  ;;  %823 = vmatprep.subr.mxu1 %v490_v10  ;;  %v357_v15 = vld [vmem:[#allocation6 + $0x180] sm:$0xff]  ;;  %753 = vmatpush1.msra.mxu0 %v361_v11  ;;  %v1830_v11 = vmov 1983009808  }
  0x62   :  { %v486_v14 = vld [vmem:[#allocation6 + $0x588] sm:$0xff]  ;;  %v485_v16 = vld [vmem:[#allocation6 + $0x580] sm:$0xff]  ;;  %824 = vmatpush1.msra.mxu1 %v489_v12  ;;  %754 = vmatprep.subr.mxu0 %v358_v13  ;;  %v229_v12 = vunpack.c.l.s4 %v1830_v11  ;;  %v231_v13 = vlaneseq  ;;  %p1791_p10 = por %p1790_p9, %p1789_p8 }
  0x63   :  { %v354_v17 = vld [vmem:[#allocation6 + $0x168] sm:$0xff]  ;;  %825 = vmatprep.subr.mxu1 %v486_v14  ;;  %v353_v19 = vld [vmem:[#allocation6 + $0x160] sm:$0xff]  ;;  %755 = vmatpush1.msra.mxu0 %v357_v15 }
  0x64   :  { %v482_v18 = vld [vmem:[#allocation6 + $0x568] sm:$0xff]  ;;  %v481_v20 = vld [vmem:[#allocation6 + $0x560] sm:$0xff]  ;;  %826 = vmatpush1.msra.mxu1 %v485_v16  ;;  %756 = vmatprep.subr.mxu0 %v354_v17  ;;  %p1792_p11 = pnand %p1791_p10, %p1785_p7 }
  0x65   :  { %v350_v21 = vld [vmem:[#allocation6 + $0x148] sm:$0xff]  ;;  %827 = vmatprep.subr.mxu1 %v482_v18  ;;  %v349_v23 = vld [vmem:[#allocation6 + $0x140] sm:$0xff]  ;;  %757 = vmatpush1.msra.mxu0 %v353_v19 }
  0x66   :  { %v478_v22 = vld [vmem:[#allocation6 + $0x548] sm:$0xff]  ;;  %v477_v24 = vld [vmem:[#allocation6 + $0x540] sm:$0xff]  ;;  %828 = vmatpush1.msra.mxu1 %v481_v20  ;;  %758 = vmatprep.subr.mxu0 %v350_v21 }
  0x67   :  { %v346_v25 = vld [vmem:[#allocation6 + $0x128] sm:$0xff]  ;;  %829 = vmatprep.subr.mxu1 %v478_v22  ;;  %v345_v27 = vld [vmem:[#allocation6 + $0x120] sm:$0xff]  ;;  %759 = vmatpush1.msra.mxu0 %v349_v23  ;;  %v230_v22 = vunpack.c.0.s8 %v229_v12  ;;  %v1893_v23 = vshrl.u32 %v231_v13, 7 }
  0x68   :  { %v474_v26 = vld [vmem:[#allocation6 + $0x528] sm:$0xff]  ;;  %v473_v28 = vld [vmem:[#allocation6 + $0x520] sm:$0xff]  ;;  %830 = vmatpush1.msra.mxu1 %v477_v24  ;;  %760 = vmatprep.subr.mxu0 %v346_v25 }
  0x69   :  { %v342_v29 = vld [vmem:[#allocation6 + $0x108] sm:$0xff]  ;;  %831 = vmatprep.subr.mxu1 %v474_v26  ;;  %v341_v31 = vld [vmem:[#allocation6 + $0x100] sm:$0xff]  ;;  %761 = vmatpush1.msra.mxu0 %v345_v27 }
  0x6a   :  { %v470_v30 = vld [vmem:[#allocation6 + $0x508] sm:$0xff]  ;;  %v469_v32 = vld [vmem:[#allocation6 + $0x500] sm:$0xff]  ;;  %832 = vmatpush1.msra.mxu1 %v473_v28  ;;  %762 = vmatprep.subr.mxu0 %v342_v29 }
  0x6b   :  { %v338_v33 = vld [vmem:[#allocation6 + $0xe8] sm:$0xff]  ;;  %833 = vmatprep.subr.mxu1 %v470_v30  ;;  %v337_v35 = vld [vmem:[#allocation6 + $0xe0] sm:$0xff]  ;;  %763 = vmatpush1.msra.mxu0 %v341_v31 }
  0x6c   :  { %v466_v34 = vld [vmem:[#allocation6 + $0x4e8] sm:$0xff]  ;;  %v465_v36 = vld [vmem:[#allocation6 + $0x4e0] sm:$0xff]  ;;  %834 = vmatpush1.msra.mxu1 %v469_v32  ;;  %764 = vmatprep.subr.mxu0 %v338_v33  ;;  %v124_v33 = vld [vmem:[#allocation3] sm:$0xff] }
  0x6d   :  { %v334_v37 = vld [vmem:[#allocation6 + $0xc8] sm:$0xff]  ;;  %835 = vmatprep.subr.mxu1 %v466_v34  ;;  %v333_v39 = vld [vmem:[#allocation6 + $0xc0] sm:$0xff]  ;;  %765 = vmatpush1.msra.mxu0 %v337_v35  ;;  %v125_v34 = vld [vmem:[#allocation3 + $0x8] sm:$0xff]  ;;  %v1896_v35 = vsub.s32 %v230_v22, %v1893_v23 }
  0x6e   :  { %v462_v38 = vld [vmem:[#allocation6 + $0x4c8] sm:$0xff]  ;;  %v461_v40 = vld [vmem:[#allocation6 + $0x4c0] sm:$0xff]  ;;  %836 = vmatpush1.msra.mxu1 %v465_v36  ;;  %766 = vmatprep.subr.mxu0 %v334_v37 }
  0x6f   :  { %v330_v41 = vld [vmem:[#allocation6 + $0xa8] sm:$0xff]  ;;  %837 = vmatprep.subr.mxu1 %v462_v38  ;;  %v329_v43 = vld [vmem:[#allocation6 + $0xa0] sm:$0xff]  ;;  %767 = vmatpush1.msra.mxu0 %v333_v39  ;;  %v128_v38 = vld [vmem:[#allocation3 + $0x20] sm:$0xff]  ;;  %v130_v39 = vunpack.c.l.bf16 %v124_v33 }
  0x70   :  { %v458_v42 = vld [vmem:[#allocation6 + $0x4a8] sm:$0xff]  ;;  %v457_v44 = vld [vmem:[#allocation6 + $0x4a0] sm:$0xff]  ;;  %838 = vmatpush1.msra.mxu1 %v461_v40  ;;  %768 = vmatprep.subr.mxu0 %v330_v41  ;;  %v131_v40 = vunpack.c.h.bf16 %v124_v33  ;;  %v132_v41 = vunpack.c.l.bf16 %v125_v34 }
  0x71   :  { %v326_v45 = vld [vmem:[#allocation6 + $0x88] sm:$0xff]  ;;  %839 = vmatprep.subr.mxu1 %v458_v42  ;;  %v325_v47 = vld [vmem:[#allocation6 + $0x80] sm:$0xff]  ;;  %769 = vmatpush1.msra.mxu0 %v329_v43  ;;  %v133_v42 = vunpack.c.h.bf16 %v125_v34 }
  0x72   :  { %v454_v46 = vld [vmem:[#allocation6 + $0x488] sm:$0xff]  ;;  %v453_v48 = vld [vmem:[#allocation6 + $0x480] sm:$0xff]  ;;  %840 = vmatpush1.msra.mxu1 %v457_v44  ;;  %770 = vmatprep.subr.mxu0 %v326_v45 }
  0x73   :  { %v322_v49 = vld [vmem:[#allocation6 + $0x68] sm:$0xff]  ;;  %841 = vmatprep.subr.mxu1 %v454_v46  ;;  %v321_v51 = vld [vmem:[#allocation6 + $0x60] sm:$0xff]  ;;  %771 = vmatpush1.msra.mxu0 %v325_v47  ;;  %v138_v47 = vunpack.c.l.bf16 %v128_v38 }
  0x74   :  { %v450_v50 = vld [vmem:[#allocation6 + $0x468] sm:$0xff]  ;;  %v449_v52 = vld [vmem:[#allocation6 + $0x460] sm:$0xff]  ;;  %842 = vmatpush1.msra.mxu1 %v453_v48  ;;  %772 = vmatprep.subr.mxu0 %v322_v49  ;;  %v139_v48 = vunpack.c.h.bf16 %v128_v38 }
  0x75   :  { %v318_v53 = vld [vmem:[#allocation6 + $0x48] sm:$0xff]  ;;  %843 = vmatprep.subr.mxu1 %v450_v50  ;;  %v317_v55 = vld [vmem:[#allocation6 + $0x40] sm:$0xff]  ;;  %773 = vmatpush1.msra.mxu0 %v321_v51  ;;  %v142_v51 = vrot.slane %v130_v39, 4 }
  0x76   :  { %v446_v54 = vld [vmem:[#allocation6 + $0x448] sm:$0xff]  ;;  %v445_v56 = vld [vmem:[#allocation6 + $0x440] sm:$0xff]  ;;  %844 = vmatpush1.msra.mxu1 %v449_v52  ;;  %774 = vmatprep.subr.mxu0 %v318_v53  ;;  %v148_v52 = vrot.slane %v131_v40, 4  ;;  %v154_v53 = vrot.slane %v132_v41, 4 }
  0x77   :  { %v314_v57 = vld [vmem:[#allocation6 + $0x28] sm:$0xff]  ;;  %845 = vmatprep.subr.mxu1 %v446_v54  ;;  %v313_v59 = vld [vmem:[#allocation6 + $0x20] sm:$0xff]  ;;  %775 = vmatpush1.msra.mxu0 %v317_v55  ;;  %v160_v54 = vrot.slane %v133_v42, 4 }
  0x78   :  { %v442_v58 = vld [vmem:[#allocation6 + $0x428] sm:$0xff]  ;;  %v441_v60 = vld [vmem:[#allocation6 + $0x420] sm:$0xff]  ;;  %846 = vmatpush1.msra.mxu1 %v445_v56  ;;  %776 = vmatprep.subr.mxu0 %v314_v57 }
  0x79   :  { %v310_v61 = vld [vmem:[#allocation6 + $0x8] sm:$0xff]  ;;  %847 = vmatprep.subr.mxu1 %v442_v58  ;;  %v309_v63 = vld [vmem:[#allocation6] sm:$0xff]  ;;  %777 = vmatpush1.msra.mxu0 %v313_v59  ;;  %v190_v59 = vrot.slane %v138_v47, 4 }
  0x7a   :  { %v438_v62 = vld [vmem:[#allocation6 + $0x408] sm:$0xff]  ;;  %v437_v0 = vld [vmem:[#allocation6 + $0x400] sm:$0xff]  ;;  %848 = vmatpush1.msra.mxu1 %v441_v60  ;;  %778 = vmatprep.subr.mxu0 %v310_v61  ;;  %v196_v60 = vrot.slane %v139_v48, 4 }
  0x7b   :  { %v434_v1 = vld [vmem:[#allocation6 + $0x3e8] sm:$0xff]  ;;  %849 = vmatprep.subr.mxu1 %v438_v62  ;;  %v433_v3 = vld [vmem:[#allocation6 + $0x3e0] sm:$0xff]  ;;  %779 = vmatpush1.msra.mxu0 %v309_v63  ;;  %v143_v63 = vadd.f32 %v142_v51, %v130_v39  ;;  %v191_v12 = vadd.f32 %v190_v59, %v138_v47 }
  0x7c   :  { %v562_v2 = vld [vmem:[#allocation6 + $0x7e8] sm:$0xff]  ;;  %v561_v4 = vld [vmem:[#allocation6 + $0x7e0] sm:$0xff]  ;;  %850 = vmatpush1.msra.mxu1 %v437_v0  ;;  %780 = vmatprep.subr.mxu0 %v434_v1  ;;  %v149_v0 = vadd.f32 %v148_v52, %v131_v40  ;;  %v155_v1 = vadd.f32 %v154_v53, %v132_v41 }
  0x7d   :  { %v430_v5 = vld [vmem:[#allocation6 + $0x3c8] sm:$0xff]  ;;  %851 = vmatprep.subr.mxu1 %v562_v2  ;;  %v429_v7 = vld [vmem:[#allocation6 + $0x3c0] sm:$0xff]  ;;  %781 = vmatpush2.msra.mxu0 %v433_v3 }
  0x7e   :  { %v558_v6 = vld [vmem:[#allocation6 + $0x7c8] sm:$0xff]  ;;  %v557_v8 = vld [vmem:[#allocation6 + $0x7c0] sm:$0xff]  ;;  %852 = vmatpush2.msra.mxu1 %v561_v4  ;;  %782 = vmatprep.subr.mxu0 %v430_v5  ;;  %v161_v4 = vadd.f32 %v160_v54, %v133_v42  ;;  %v156_v11 = vrot.slane %v155_v1, 2 }
  0x7f   :  { %v426_v9 = vld [vmem:[#allocation6 + $0x3a8] sm:$0xff]  ;;  %853 = vmatprep.subr.mxu1 %v558_v6  ;;  %v425_v14 = vld [vmem:[#allocation6 + $0x3a0] sm:$0xff]  ;;  %783 = vmatpush2.msra.mxu0 %v429_v7 }
  0x80   :  { %v554_v10 = vld [vmem:[#allocation6 + $0x7a8] sm:$0xff]  ;;  %v553_v15 = vld [vmem:[#allocation6 + $0x7a0] sm:$0xff]  ;;  %854 = vmatpush2.msra.mxu1 %v557_v8  ;;  %784 = vmatprep.subr.mxu0 %v426_v9  ;;  %v144_v9 = vrot.slane %v143_v63, 2 }
  0x81   :  { %v422_v16 = vld [vmem:[#allocation6 + $0x388] sm:$0xff]  ;;  %855 = vmatprep.subr.mxu1 %v554_v10  ;;  %v421_v18 = vld [vmem:[#allocation6 + $0x380] sm:$0xff]  ;;  %785 = vmatpush2.msra.mxu0 %v425_v14  ;;  %v150_v10 = vrot.slane %v149_v0, 2 }
  0x82   :  { %v550_v17 = vld [vmem:[#allocation6 + $0x788] sm:$0xff]  ;;  %v549_v19 = vld [vmem:[#allocation6 + $0x780] sm:$0xff]  ;;  %856 = vmatpush2.msra.mxu1 %v553_v15  ;;  %786 = vmatprep.subr.mxu0 %v422_v16  ;;  %v162_v15 = vrot.slane %v161_v4, 2 }
  0x83   :  { %v418_v20 = vld [vmem:[#allocation6 + $0x368] sm:$0xff]  ;;  %857 = vmatprep.subr.mxu1 %v550_v17  ;;  %v417_v24 = vld [vmem:[#allocation6 + $0x360] sm:$0xff]  ;;  %787 = vmatpush2.msra.mxu0 %v421_v18  ;;  %v197_v18 = vadd.f32 %v196_v60, %v139_v48  ;;  %v151_v22 = vadd.f32 %v150_v10, %v149_v0 }
  0x84   :  { %v546_v21 = vld [vmem:[#allocation6 + $0x768] sm:$0xff]  ;;  %v545_v25 = vld [vmem:[#allocation6 + $0x760] sm:$0xff]  ;;  %858 = vmatpush2.msra.mxu1 %v549_v19  ;;  %788 = vmatprep.subr.mxu0 %v418_v20 }
  0x85   :  { %v414_v26 = vld [vmem:[#allocation6 + $0x348] sm:$0xff]  ;;  %v413_v28 = vld [vmem:[#allocation6 + $0x340] sm:$0xff]  ;;  %859 = vmatprep.subr.mxu1 %v546_v21  ;;  %789 = vmatpush2.msra.mxu0 %v417_v24  ;;  %v145_v21 = vadd.f32 %v144_v9, %v143_v63  ;;  %v157_v24 = vadd.f32 %v156_v11, %v155_v1 }
  0x86   :  { %v542_v27 = vld [vmem:[#allocation6 + $0x748] sm:$0xff]  ;;  %v541_v29 = vld [vmem:[#allocation6 + $0x740] sm:$0xff]  ;;  %860 = vmatpush2.msra.mxu1 %v545_v25  ;;  %790 = vmatprep.subr.mxu0 %v414_v26  ;;  %v192_v25 = vrot.slane %v191_v12, 2 }
  0x87   :  { %v410_v30 = vld [vmem:[#allocation6 + $0x328] sm:$0xff]  ;;  %v409_v32 = vld [vmem:[#allocation6 + $0x320] sm:$0xff]  ;;  %861 = vmatprep.subr.mxu1 %v542_v27  ;;  %791 = vmatpush2.msra.mxu0 %v413_v28  ;;  %v163_v28 = vadd.f32 %v162_v15, %v161_v4  ;;  %v146_v34 = vrot.slane %v145_v21, 1 }
  0x88   :  { %v538_v31 = vld [vmem:[#allocation6 + $0x728] sm:$0xff]  ;;  %v537_v36 = vld [vmem:[#allocation6 + $0x720] sm:$0xff]  ;;  %862 = vmatpush2.msra.mxu1 %v541_v29  ;;  %792 = vmatprep.subr.mxu0 %v410_v30  ;;  %v193_v38 = vadd.f32 %v192_v25, %v191_v12 }
  0x89   :  { %v127_v37 = vld [vmem:[#allocation3 + $0x18] sm:$0xff]  ;;  %863 = vmatprep.subr.mxu1 %v538_v31  ;;  %v405_v49 = vld [vmem:[#allocation6 + $0x300] sm:$0xff]  ;;  %793 = vmatpush2.msra.mxu0 %v409_v32  ;;  %v198_v31 = vrot.slane %v197_v18, 2  ;;  %v164_v41 = vrot.slane %v163_v28, 1  ;;  %v147_v47 = vadd.f32 %v146_v34, %v145_v21 }
  0x8a   :  { %v406_v43 = vld [vmem:[#allocation6 + $0x308] sm:$0xff]  ;;  %v136_v45 = vunpack.c.l.bf16 %v127_v37  ;;  %v137_v46 = vunpack.c.h.bf16 %v127_v37  ;;  %v533_v50 = vld [vmem:[#allocation6 + $0x700] sm:$0xff]  ;;  %864 = vmatpush2.msra.mxu1 %v537_v36  ;;  %v152_v36 = vrot.slane %v151_v22, 1  ;;  %v158_v37 = vrot.slane %v157_v24, 1 }
  0x8b   :  { %v534_v44 = vld [vmem:[#allocation6 + $0x708] sm:$0xff]  ;;  %794 = vmatprep.subr.mxu0 %v406_v43  ;;  %v401_v61 = vld [vmem:[#allocation6 + $0x2e0] sm:$0xff]  ;;  %v165_v53 = vadd.f32 %v164_v41, %v163_v28 }
  0x8c   :  { %v402_v55 = vld [vmem:[#allocation6 + $0x2e8] sm:$0xff]  ;;  %v178_v57 = vrot.slane %v136_v45, 4  ;;  %v184_v58 = vrot.slane %v137_v46, 4  ;;  %865 = vmatprep.subr.mxu1 %v534_v44  ;;  %v529_v62 = vld [vmem:[#allocation6 + $0x6e0] sm:$0xff]  ;;  %795 = vmatpush2.msra.mxu0 %v405_v49  ;;  %v199_v44 = vadd.f32 %v198_v31, %v197_v18  ;;  %v153_v48 = vadd.f32 %v152_v36, %v151_v22  ;;  %v371_v31 = vld [vmem:[#allocation6 + $0x1f0] sm:$0xff] }
  0x8d   :  { %v530_v56 = vld [vmem:[#allocation6 + $0x6e8] sm:$0xff]  ;;  %866 = vmatpush2.msra.mxu1 %v533_v50  ;;  %796 = vmatprep.subr.mxu0 %v402_v55  ;;  %v397_v7 = vld [vmem:[#allocation6 + $0x2c0] sm:$0xff]  ;;  %v159_v49 = vadd.f32 %v158_v37, %v157_v24  ;;  %v194_v50 = vrot.slane %v193_v38, 1  ;;  %v367_v36 = vld [vmem:[#allocation6 + $0x1d0] sm:$0xff] }
  0x8e   :  { %v398_v2 = vld [vmem:[#allocation6 + $0x2c8] sm:$0xff]  ;;  %v179_v5 = vadd.f32 %v178_v57, %v136_v45  ;;  %v185_v6 = vadd.f32 %v184_v58, %v137_v46  ;;  %867 = vmatprep.subr.mxu1 %v530_v56  ;;  %v525_v8 = vld [vmem:[#allocation6 + $0x6c0] sm:$0xff]  ;;  %797 = vmatpush2.msra.mxu0 %v401_v61  ;;  %v200_v56 = vrot.slane %v199_v44, 1  ;;  %v226_v60 = vcombine.low %v147_v47, %v153_v48  ;;  %v129_v47 = vld [vmem:[#allocation3 + $0x28] sm:$0xff] }
  0x8f   :  { %v526_v3 = vld [vmem:[#allocation6 + $0x6c8] sm:$0xff]  ;;  %868 = vmatpush2.msra.mxu1 %v529_v62  ;;  %798 = vmatprep.subr.mxu0 %v398_v2  ;;  %v393_v19 = vld [vmem:[#allocation6 + $0x2a0] sm:$0xff]  ;;  %v195_v59 = vadd.f32 %v194_v50, %v193_v38  ;;  %v227_v0 = vcombine.low %v159_v49, %v165_v53  ;;  %v364_v38 = vld [vmem:[#allocation6 + $0x1b8] sm:$0xff]  ;;  %v141_v53 = vunpack.c.h.bf16 %v129_v47 }
  0x90   :  { %v394_v13 = vld [vmem:[#allocation6 + $0x2a8] sm:$0xff]  ;;  %v180_v16 = vrot.slane %v179_v5, 2  ;;  %v186_v17 = vrot.slane %v185_v6, 2  ;;  %869 = vmatprep.subr.mxu1 %v526_v3  ;;  %v521_v20 = vld [vmem:[#allocation6 + $0x6a0] sm:$0xff]  ;;  %799 = vmatpush2.msra.mxu0 %v397_v7  ;;  %v201_v63 = vadd.f32 %v200_v56, %v199_v44  ;;  %v234_v4 = vrot.slane %v226_v60, %v1896_v35  ;;  %v356_v48 = vld [vmem:[#allocation6 + $0x178] sm:$0xff] }
  0x91   :  { %v522_v14 = vld [vmem:[#allocation6 + $0x6a8] sm:$0xff]  ;;  %870 = vmatpush2.msra.mxu1 %v525_v8  ;;  %800 = vmatprep.subr.mxu0 %v394_v13  ;;  %v389_v32 = vld [vmem:[#allocation6 + $0x280] sm:$0xff]  ;;  %v241_v7 = vrot.slane %v227_v0, %v1896_v35  ;;  %v352_v56 = vld [vmem:[#allocation6 + $0x158] sm:$0xff] }
  0x92   :  { %v390_v26 = vld [vmem:[#allocation6 + $0x288] sm:$0xff]  ;;  %v181_v29 = vadd.f32 %v180_v16, %v179_v5  ;;  %v187_v30 = vadd.f32 %v186_v17, %v185_v6  ;;  %871 = vmatprep.subr.mxu1 %v522_v14  ;;  %v517_v33 = vld [vmem:[#allocation6 + $0x680] sm:$0xff]  ;;  %801 = vmatpush2.msra.mxu0 %v393_v19  ;;  %v252_v8 = vcombine.low %v195_v59, %v201_v63  ;;  %v372_v14 = vld [vmem:[#allocation6 + $0x1f8] sm:$0xff] }
  0x93   :  { %v518_v27 = vld [vmem:[#allocation6 + $0x688] sm:$0xff]  ;;  %872 = vmatpush2.msra.mxu1 %v521_v20  ;;  %802 = vmatprep.subr.mxu0 %v390_v26  ;;  %v385_v45 = vld [vmem:[#allocation6 + $0x260] sm:$0xff]  ;;  %v242_v15 = vcombine.low %v234_v4, %v241_v7  ;;  %v348_v0 = vld [vmem:[#allocation6 + $0x138] sm:$0xff] }
  0x94   :  { %v386_v39 = vld [vmem:[#allocation6 + $0x268] sm:$0xff]  ;;  %v182_v42 = vrot.slane %v181_v29, 1  ;;  %v188_v43 = vrot.slane %v187_v30, 1  ;;  %873 = vmatprep.subr.mxu1 %v518_v27  ;;  %v513_v46 = vld [vmem:[#allocation6 + $0x660] sm:$0xff]  ;;  %803 = vmatpush2.msra.mxu0 %v389_v32  ;;  %v266_v12 = vrot.slane %v252_v8, %v1896_v35  ;;  %v344_v8 = vld [vmem:[#allocation6 + $0x118] sm:$0xff] }
  0x95   :  { %v514_v40 = vld [vmem:[#allocation6 + $0x668] sm:$0xff]  ;;  %874 = vmatpush2.msra.mxu1 %v517_v33  ;;  %804 = vmatprep.subr.mxu0 %v386_v39  ;;  %v381_v57 = vld [vmem:[#allocation6 + $0x240] sm:$0xff]  ;;  %v368_v33 = vld [vmem:[#allocation6 + $0x1d8] sm:$0xff] }
  0x96   :  { %v382_v51 = vld [vmem:[#allocation6 + $0x248] sm:$0xff]  ;;  %v183_v54 = vadd.f32 %v182_v42, %v181_v29  ;;  %v189_v55 = vadd.f32 %v188_v43, %v187_v30  ;;  %875 = vmatprep.subr.mxu1 %v514_v40  ;;  %v509_v58 = vld [vmem:[#allocation6 + $0x640] sm:$0xff]  ;;  %805 = vmatpush2.msra.mxu0 %v385_v45  ;;  %v363_v40 = vld [vmem:[#allocation6 + $0x1b0] sm:$0xff] }
  0x97   :  { %v510_v52 = vld [vmem:[#allocation6 + $0x648] sm:$0xff]  ;;  %876 = vmatpush2.msra.mxu1 %v513_v46  ;;  %806 = vmatprep.subr.mxu0 %v382_v51  ;;  %v377_v2 = vld [vmem:[#allocation6 + $0x220] sm:$0xff]  ;;  %v360_v42 = vld [vmem:[#allocation6 + $0x198] sm:$0xff] }
  0x98   :  { %v378_v61 = vld [vmem:[#allocation6 + $0x228] sm:$0xff]  ;;  %v251_v1 = vcombine.low %v183_v54, %v189_v55  ;;  %877 = vmatprep.subr.mxu1 %v510_v52  ;;  %v505_v3 = vld [vmem:[#allocation6 + $0x620] sm:$0xff]  ;;  %807 = vmatpush2.msra.mxu0 %v381_v57  ;;  %v359_v43 = vld [vmem:[#allocation6 + $0x190] sm:$0xff]  ;;  %v140_v52 = vunpack.c.l.bf16 %v129_v47 }
  0x99   :  { %v506_v62 = vld [vmem:[#allocation6 + $0x628] sm:$0xff]  ;;  %878 = vmatpush2.msra.mxu1 %v509_v58  ;;  %808 = vmatprep.subr.mxu0 %v378_v61  ;;  %v373_v10 = vld [vmem:[#allocation6 + $0x200] sm:$0xff]  ;;  %v355_v54 = vld [vmem:[#allocation6 + $0x170] sm:$0xff]  ;;  %v208_v61 = vrot.slane %v141_v53, 4 }
  0x9a   :  { %v374_v5 = vld [vmem:[#allocation6 + $0x208] sm:$0xff]  ;;  %v259_v9 = vrot.slane %v251_v1, %v1896_v35  ;;  %879 = vmatprep.subr.mxu1 %v506_v62  ;;  %v501_v11 = vld [vmem:[#allocation6 + $0x600] sm:$0xff]  ;;  %809 = vmatpush2.msra.mxu0 %v377_v2  ;;  %v202_v60 = vrot.slane %v140_v52, 4  ;;  %v351_v62 = vld [vmem:[#allocation6 + $0x150] sm:$0xff] }
  0x9b   :  { %v502_v6 = vld [vmem:[#allocation6 + $0x608] sm:$0xff]  ;;  %880 = vmatpush2.msra.mxu1 %v505_v3  ;;  %810 = vmatprep.subr.mxu0 %v374_v5  ;;  %v625_v28 = vld [vmem:[#allocation6 + $0x9e0] sm:$0xff]  ;;  %v347_v5 = vld [vmem:[#allocation6 + $0x130] sm:$0xff]  ;;  %v209_v7 = vadd.f32 %v208_v61, %v141_v53 }
  0x9c   :  { %v626_v13 = vld [vmem:[#allocation6 + $0x9e8] sm:$0xff]  ;;  %881 = vmatprep.subr.mxu1 %v502_v6  ;;  %811 = vmatpush2.msra.mxu0 %v373_v10  ;;  %v267_v16 = vcombine.low %v259_v9, %v266_v12  ;;  %v621_v32 = vld [vmem:[#allocation6 + $0x9c0] sm:$0xff]  ;;  %v203_v4 = vadd.f32 %v202_v60, %v140_v52  ;;  %v324_v52 = vld [vmem:[#allocation6 + $0x78] sm:$0xff] }
  0x9d   :  { %882 = vmatpush2.msra.mxu1 %v501_v11  ;;  %890 = vmatprep.subr.mxu0 %v626_v13  ;;  %v622_v30 = vld [vmem:[#allocation6 + $0x9c8] sm:$0xff]  ;;  %v617_v37 = vld [vmem:[#allocation6 + $0x9a0] sm:$0xff]  ;;  %v343_v13 = vld [vmem:[#allocation6 + $0x110] sm:$0xff] }
  0x9e   :  { %961 = vmatprep.subr.mxu1 %v372_v14  ;;  %v280_v17 = vrot.slane %v267_v16, 7  ;;  %v618_v34 = vld [vmem:[#allocation6 + $0x9a8] sm:$0xff]  ;;  %v613_v41 = vld [vmem:[#allocation6 + $0x980] sm:$0xff]  ;;  %v204_v12 = vrot.slane %v203_v4, 2  ;;  %v340_v16 = vld [vmem:[#allocation6 + $0xf8] sm:$0xff] }
  0x9f   :  { %v614_v39 = vld [vmem:[#allocation6 + $0x988] sm:$0xff]  ;;  %v609_v45 = vld [vmem:[#allocation6 + $0x960] sm:$0xff]  ;;  %v319_v60 = vld [vmem:[#allocation6 + $0x50] sm:$0xff] }
  0xa0   :  { %v282_v18 = vsel %vm281_vm0, %v280_v17, %v242_v15  ;;  %v610_v44 = vld [vmem:[#allocation6 + $0x968] sm:$0xff]  ;;  %v126_v46 = vld [vmem:[#allocation3 + $0x10] sm:$0xff]  ;;  %v210_v15 = vrot.slane %v209_v7, 2 }
  0xa1   :  { %v284_v19 = vsel %vm283_vm1, %v280_v17, %v282_v18  ;;  %v606_v49 = vld [vmem:[#allocation6 + $0x948] sm:$0xff]  ;;  %v134_v50 = vunpack.c.l.bf16 %v126_v46  ;;  %v135_v51 = vunpack.c.h.bf16 %v126_v46  ;;  %v605_v55 = vld [vmem:[#allocation6 + $0x940] sm:$0xff]  ;;  %v328_v46 = vld [vmem:[#allocation6 + $0x98] sm:$0xff] }
  0xa2   :  { %v286_v20 = vsel %vm285_vm2, %v280_v17, %v284_v19  ;;  %v602_v57 = vld [vmem:[#allocation6 + $0x928] sm:$0xff]  ;;  %v601_v63 = vld [vmem:[#allocation6 + $0x920] sm:$0xff] }
  0xa3   :  { %v288_v21 = vsel %vm287_vm3, %v280_v17, %v286_v20  ;;  %v166_v58 = vrot.slane %v134_v50, 4  ;;  %v172_v59 = vrot.slane %v135_v51, 4  ;;  %v598_v1 = vld [vmem:[#allocation6 + $0x908] sm:$0xff]  ;;  %v597_v6 = vld [vmem:[#allocation6 + $0x900] sm:$0xff]  ;;  %v205_v20 = vadd.f32 %v204_v12, %v203_v4  ;;  %v312_v4 = vld [vmem:[#allocation6 + $0x18] sm:$0xff] }
  0xa4   :  { %v307_v22 = vmul.f32 0.125, %v288_v21  ;;  %v594_v9 = vld [vmem:[#allocation6 + $0x8e8] sm:$0xff]  ;;  %v593_v14 = vld [vmem:[#allocation6 + $0x8e0] sm:$0xff]  ;;  %v339_v21 = vld [vmem:[#allocation6 + $0xf0] sm:$0xff] }
  0xa5   :  { %v167_v2 = vadd.f32 %v166_v58, %v134_v50  ;;  %v173_v3 = vadd.f32 %v172_v59, %v135_v51  ;;  %v590_v17 = vld [vmem:[#allocation6 + $0x8c8] sm:$0xff]  ;;  %v577_v50 = vld [vmem:[#allocation6 + $0x860] sm:$0xff]  ;;  %v320_v58 = vld [vmem:[#allocation6 + $0x58] sm:$0xff] }
  0xa6   :  { %v1907_v24 = vrot.slane %v307_v22, %v1896_v35  ;;  %v717_v25 = vcombine.high %v307_v22, %v307_v22  ;;  %v589_v22 = vld [vmem:[#allocation6 + $0x8c0] sm:$0xff]  ;;  %v578_v47 = vld [vmem:[#allocation6 + $0x868] sm:$0xff] }
  0xa7   :  { %v168_v10 = vrot.slane %v167_v2, 2  ;;  %v174_v11 = vrot.slane %v173_v3, 2  ;;  %v574_v53 = vld [vmem:[#allocation6 + $0x848] sm:$0xff]  ;;  %v569_v61 = vld [vmem:[#allocation6 + $0x820] sm:$0xff] }
  0xa8   :  { %v1911_v26 = vcombine.high %v1907_v24, %v1907_v24  ;;  %v1914_v27 = vrot.slane %v717_v25, %v1896_v35  ;;  %v211_v25 = vadd.f32 %v210_v15, %v209_v7  ;;  %v570_v59 = vld [vmem:[#allocation6 + $0x828] sm:$0xff]  ;;  %v685_v15 = vld [vmem:[#allocation6 + $0xbc0] sm:$0xff] }
  0xa9   :  { %v169_v18 = vadd.f32 %v168_v10, %v167_v2  ;;  %v175_v19 = vadd.f32 %v174_v11, %v173_v3  ;;  %v565_v2 = vld [vmem:[#allocation6 + $0x800] sm:$0xff]  ;;  %v436_v11 = vld [vmem:[#allocation6 + $0x3f8] sm:$0xff]  ;;  %v686_v12 = vld [vmem:[#allocation6 + $0xbc8] sm:$0xff] }
  0xaa   :  { %812 = vmatprep.mubr.f32.mxu0 %v1911_v26  ;;  %v1919_v29 = vcombine.high %v1914_v27, %v1914_v27 }
  0xab   :  { %813 = vmatmul.mubr.f32.vlgmr.msra.gmra.mxu0 %v1907_v24 }
  0xac   :  { %883 = vmatprep.mubr.f32.mxu1 %v1919_v29  ;;  %891 = vmatpush1.msra.mxu0 %v625_v28  ;;  %v336_v28 = vld [vmem:[#allocation6 + $0xd8] sm:$0xff] }
  0xad   :  { %884 = vmatmul.mubr.f32.vlgmr.msra.gmra.mxu1 %v1914_v27  ;;  %892 = vmatprep.subr.mxu0 %v622_v30  ;;  %v586_v30 = vld [vmem:[#allocation6 + $0x8a8] sm:$0xff] }
  0xae   :  { %962 = vmatpush1.msra.mxu1 %v371_v31  ;;  %893 = vmatpush1.msra.mxu0 %v621_v32  ;;  %v170_v31 = vrot.slane %v169_v18, 1  ;;  %v176_v32 = vrot.slane %v175_v19, 1 }
  0xaf   :  { %963 = vmatprep.subr.mxu1 %v368_v33  ;;  %894 = vmatprep.subr.mxu0 %v618_v34  ;;  %v206_v33 = vrot.slane %v205_v20, 1  ;;  %v335_v34 = vld [vmem:[#allocation6 + $0xd0] sm:$0xff] }
  0xb0   :  { %964 = vmatpush1.msra.mxu1 %v367_v36  ;;  %895 = vmatpush1.msra.mxu0 %v617_v37  ;;  %v585_v36 = vld [vmem:[#allocation6 + $0x8a0] sm:$0xff]  ;;  %v212_v37 = vrot.slane %v211_v25, 1 }
  0xb1   :  { %965 = vmatprep.subr.mxu1 %v364_v38  ;;  %896 = vmatprep.subr.mxu0 %v614_v39  ;;  %v332_v38 = vld [vmem:[#allocation6 + $0xb8] sm:$0xff]  ;;  %v582_v39 = vld [vmem:[#allocation6 + $0x888] sm:$0xff] }
  0xb2   :  { %966 = vmatpush1.msra.mxu1 %v363_v40  ;;  %897 = vmatpush1.msra.mxu0 %v613_v41  ;;  %v171_v40 = vadd.f32 %v170_v31, %v169_v18  ;;  %v177_v41 = vadd.f32 %v176_v32, %v175_v19  ;;  %v682_v18 = vld [vmem:[#allocation6 + $0xba8] sm:$0xff]  ;;  %v431_v19 = vld [vmem:[#allocation6 + $0x3d0] sm:$0xff] }
  0xb3   :  { %967 = vmatprep.subr.mxu1 %v360_v42  ;;  %898 = vmatprep.subr.mxu0 %v610_v44  ;;  %v207_v42 = vadd.f32 %v206_v33, %v205_v20  ;;  %v581_v44 = vld [vmem:[#allocation6 + $0x880] sm:$0xff]  ;;  %v674_v31 = vld [vmem:[#allocation6 + $0xb68] sm:$0xff]  ;;  %v423_v32 = vld [vmem:[#allocation6 + $0x390] sm:$0xff] }
  0xb4   :  { %968 = vmatpush1.msra.mxu1 %v359_v43  ;;  %899 = vmatpush1.msra.mxu0 %v609_v45  ;;  %v331_v43 = vld [vmem:[#allocation6 + $0xb0] sm:$0xff]  ;;  %v213_v45 = vadd.f32 %v212_v37, %v211_v25  ;;  %v681_v20 = vld [vmem:[#allocation6 + $0xba0] sm:$0xff] }
  0xb5   :  { %969 = vmatprep.subr.mxu1 %v356_v48  ;;  %900 = vmatprep.subr.mxu0 %v606_v49  ;;  %v243_v48 = vcombine.low %v171_v40, %v177_v41  ;;  %v327_v49 = vld [vmem:[#allocation6 + $0x90] sm:$0xff]  ;;  %v673_v33 = vld [vmem:[#allocation6 + $0xb60] sm:$0xff]  ;;  %v666_v40 = vld [vmem:[#allocation6 + $0xb28] sm:$0xff] }
  0xb6   :  { %970 = vmatpush1.msra.mxu1 %v355_v54  ;;  %901 = vmatpush1.msra.mxu0 %v605_v55  ;;  %v268_v51 = vcombine.low %v207_v42, %v213_v45  ;;  %v323_v54 = vld [vmem:[#allocation6 + $0x70] sm:$0xff]  ;;  %v573_v55 = vld [vmem:[#allocation6 + $0x840] sm:$0xff] }
  0xb7   :  { %971 = vmatprep.subr.mxu1 %v352_v56  ;;  %902 = vmatprep.subr.mxu0 %v602_v57  ;;  %v250_v56 = vrot.slane %v243_v48, %v1896_v35  ;;  %v427_v25 = vld [vmem:[#allocation6 + $0x3b0] sm:$0xff]  ;;  %v665_v42 = vld [vmem:[#allocation6 + $0xb20] sm:$0xff]  ;;  %v658_v48 = vld [vmem:[#allocation6 + $0xae8] sm:$0xff] }
  0xb8   :  { %972 = vmatpush1.msra.mxu1 %v351_v62  ;;  %903 = vmatpush1.msra.mxu0 %v601_v63  ;;  %v275_v57 = vrot.slane %v268_v51, %v1896_v35  ;;  %v316_v63 = vld [vmem:[#allocation6 + $0x38] sm:$0xff]  ;;  %v419_v37 = vld [vmem:[#allocation6 + $0x370] sm:$0xff] }
  0xb9   :  { %973 = vmatprep.subr.mxu1 %v348_v0  ;;  %904 = vmatprep.subr.mxu0 %v598_v1  ;;  %v566_v0 = vld [vmem:[#allocation6 + $0x808] sm:$0xff]  ;;  %v315_v1 = vld [vmem:[#allocation6 + $0x30] sm:$0xff]  ;;  %v404_v51 = vld [vmem:[#allocation6 + $0x2f8] sm:$0xff] }
  0xba   :  { %974 = vmatpush1.msra.mxu1 %v347_v5  ;;  %905 = vmatpush1.msra.mxu0 %v597_v6  ;;  %v291_v62 = vrot.slane %v275_v57, 7  ;;  %v690_v5 = vld [vmem:[#allocation6 + $0xbe8] sm:$0xff]  ;;  %v415_v41 = vld [vmem:[#allocation6 + $0x350] sm:$0xff] }
  0xbb   :  { %975 = vmatprep.subr.mxu1 %v344_v8  ;;  %906 = vmatprep.subr.mxu0 %v594_v9  ;;  %v123_v6 = vld [vmem:[#allocation2 + $0x8] sm:$0xf]  ;;  %v311_v8 = vld [vmem:[#allocation6 + $0x10] sm:$0xff]  ;;  %v689_v9 = vld [vmem:[#allocation6 + $0xbe0] sm:$0xff] }
  0xbc   :  { %976 = vmatpush1.msra.mxu1 %v343_v13  ;;  %907 = vmatpush1.msra.mxu0 %v593_v14  ;;  %v292_v3 = vsel %vm281_vm0, %v291_v62, %v250_v56  ;;  %v435_v14 = vld [vmem:[#allocation6 + $0x3f0] sm:$0xff]  ;;  %v650_v56 = vld [vmem:[#allocation6 + $0xaa8] sm:$0xff] }
  0xbd   :  { %977 = vmatprep.subr.mxu1 %v340_v16  ;;  %908 = vmatprep.subr.mxu0 %v590_v17  ;;  %v293_v7 = vsel %vm283_vm1, %v291_v62, %v292_v3  ;;  %v432_v17 = vld [vmem:[#allocation6 + $0x3d8] sm:$0xff]  ;;  %v411_v45 = vld [vmem:[#allocation6 + $0x330] sm:$0xff] }
  0xbe   :  { %978 = vmatpush1.msra.mxu1 %v339_v21  ;;  %909 = vmatpush1.msra.mxu0 %v589_v22  ;;  %v294_v10 = vsel %vm285_vm2, %v291_v62, %v293_v7  ;;  %v428_v21 = vld [vmem:[#allocation6 + $0x3b8] sm:$0xff]  ;;  %v678_v22 = vld [vmem:[#allocation6 + $0xb88] sm:$0xff]  ;;  %v391_v3 = vld [vmem:[#allocation6 + $0x290] sm:$0xff] }
  0xbf   :  { %979 = vmatprep.subr.mxu1 %v336_v28  ;;  %910 = vmatprep.subr.mxu0 %v586_v30  ;;  %v295_v13 = vsel %vm287_vm3, %v291_v62, %v294_v10  ;;  %v677_v28 = vld [vmem:[#allocation6 + $0xb80] sm:$0xff]  ;;  %v424_v30 = vld [vmem:[#allocation6 + $0x398] sm:$0xff]  ;;  %v395_v62 = vld [vmem:[#allocation6 + $0x2b0] sm:$0xff] }
  0xc0   :  { %980 = vmatpush1.msra.mxu1 %v335_v34  ;;  %911 = vmatpush1.msra.mxu0 %v585_v36  ;;  %v299_v16 = vadd.f32 %v295_v13, %v123_v6  ;;  %v420_v34 = vld [vmem:[#allocation6 + $0x378] sm:$0xff]  ;;  %v670_v36 = vld [vmem:[#allocation6 + $0xb48] sm:$0xff]  ;;  %v387_v7 = vld [vmem:[#allocation6 + $0x270] sm:$0xff] }
  0xc1   :  { %981 = vmatprep.subr.mxu1 %v332_v38  ;;  %912 = vmatprep.subr.mxu0 %v582_v39  ;;  %v669_v38 = vld [vmem:[#allocation6 + $0xb40] sm:$0xff]  ;;  %v416_v39 = vld [vmem:[#allocation6 + $0x358] sm:$0xff]  ;;  %v638_v6 = vld [vmem:[#allocation6 + $0xa48] sm:$0xff] }
  0xc2   :  { %982 = vmatpush1.msra.mxu1 %v331_v43  ;;  %913 = vmatpush1.msra.mxu0 %v581_v44  ;;  %301 = vst [vmem:[#allocation2 + $0x8] sm:$0xf] %v299_v16  ;;  %v412_v43 = vld [vmem:[#allocation6 + $0x338] sm:$0xff]  ;;  %v662_v44 = vld [vmem:[#allocation6 + $0xb08] sm:$0xff]  ;;  %v633_v13 = vld [vmem:[#allocation6 + $0xa20] sm:$0xff] }
  0xc3   :  { %983 = vmatprep.subr.mxu1 %v328_v46  ;;  %914 = vmatprep.subr.mxu0 %v578_v47  ;;  %v661_v46 = vld [vmem:[#allocation6 + $0xb00] sm:$0xff]  ;;  %v408_v47 = vld [vmem:[#allocation6 + $0x318] sm:$0xff]  ;;  %v379_v16 = vld [vmem:[#allocation6 + $0x230] sm:$0xff] }
  0xc4   :  { %984 = vmatpush1.msra.mxu1 %v327_v49  ;;  %915 = vmatpush1.msra.mxu0 %v577_v50  ;;  %v407_v49 = vld [vmem:[#allocation6 + $0x310] sm:$0xff]  ;;  %v657_v50 = vld [vmem:[#allocation6 + $0xae0] sm:$0xff]  ;;  %v384_v10 = vld [vmem:[#allocation6 + $0x258] sm:$0xff] }
  0xc5   :  { %985 = vmatprep.subr.mxu1 %v324_v52  ;;  %916 = vmatprep.subr.mxu0 %v574_v53  ;;  %v654_v52 = vld [vmem:[#allocation6 + $0xac8] sm:$0xff]  ;;  %v403_v53 = vld [vmem:[#allocation6 + $0x2f0] sm:$0xff] }
  0xc6   :  { %986 = vmatpush1.msra.mxu1 %v323_v54  ;;  %917 = vmatpush1.msra.mxu0 %v573_v55  ;;  %v653_v54 = vld [vmem:[#allocation6 + $0xac0] sm:$0xff]  ;;  %v400_v55 = vld [vmem:[#allocation6 + $0x2d8] sm:$0xff] }
  0xc7   :  { %987 = vmatprep.subr.mxu1 %v320_v58  ;;  %918 = vmatprep.subr.mxu0 %v570_v59  ;;  %v399_v58 = vld [vmem:[#allocation6 + $0x2d0] sm:$0xff]  ;;  %v649_v59 = vld [vmem:[#allocation6 + $0xaa0] sm:$0xff] }
  0xc8   :  { %988 = vmatpush1.msra.mxu1 %v319_v60  ;;  %919 = vmatpush1.msra.mxu0 %v569_v61  ;;  %v396_v60 = vld [vmem:[#allocation6 + $0x2b8] sm:$0xff]  ;;  %v646_v61 = vld [vmem:[#allocation6 + $0xa88] sm:$0xff] }
  0xc9   :  { %989 = vmatprep.subr.mxu1 %v316_v63  ;;  %920 = vmatprep.subr.mxu0 %v566_v0  ;;  %v306_v57 = vld [vmem:[#allocation2 + $0x8] sm:$0xf]  ;;  %v645_v63 = vld [vmem:[#allocation6 + $0xa80] sm:$0xff] }
  0xca   :  { %990 = vmatpush1.msra.mxu1 %v315_v1  ;;  %921 = vmatpush1.msra.mxu0 %v565_v2  ;;  %v308_v0 = vmul.f32 0.125, %v306_v57  ;;  %v392_v1 = vld [vmem:[#allocation6 + $0x298] sm:$0xff]  ;;  %v642_v2 = vld [vmem:[#allocation6 + $0xa68] sm:$0xff] }
  0xcb   :  { %991 = vmatprep.subr.mxu1 %v312_v4  ;;  %922 = vmatprep.subr.mxu0 %v690_v5  ;;  %v641_v4 = vld [vmem:[#allocation6 + $0xa60] sm:$0xff]  ;;  %v388_v5 = vld [vmem:[#allocation6 + $0x278] sm:$0xff] }
  0xcc   :  { %992 = vmatpush1.msra.mxu1 %v311_v8  ;;  %923 = vmatpush2.msra.mxu0 %v689_v9  ;;  %v637_v8 = vld [vmem:[#allocation6 + $0xa40] sm:$0xff]  ;;  %v1931_v9 = vrot.slane %v308_v0, %v1896_v35  ;;  %v596_v57 = vld [vmem:[#allocation6 + $0x8f8] sm:$0xff] }
  0xcd   :  { %993 = vmatprep.subr.mxu1 %v436_v11  ;;  %924 = vmatprep.subr.mxu0 %v686_v12  ;;  %v634_v11 = vld [vmem:[#allocation6 + $0xa28] sm:$0xff]  ;;  %v383_v12 = vld [vmem:[#allocation6 + $0x250] sm:$0xff]  ;;  %v460_v0 = vld [vmem:[#allocation6 + $0x4b8] sm:$0xff] }
  0xce   :  { %994 = vmatpush2.msra.mxu1 %v435_v14  ;;  %925 = vmatpush2.msra.mxu0 %v685_v15  ;;  %v380_v14 = vld [vmem:[#allocation6 + $0x238] sm:$0xff]  ;;  %v630_v15 = vld [vmem:[#allocation6 + $0xa08] sm:$0xff]  ;;  %v1935_v35 = vcombine.high %v1931_v9, %v1931_v9 }
  0xcf   :  { %995 = vmatprep.subr.mxu1 %v432_v17  ;;  %926 = vmatprep.subr.mxu0 %v682_v18  ;;  %v629_v17 = vld [vmem:[#allocation6 + $0xa00] sm:$0xff]  ;;  %v376_v18 = vld [vmem:[#allocation6 + $0x218] sm:$0xff] }
  0xd0   :  { %996 = vmatpush2.msra.mxu1 %v431_v19  ;;  %927 = vmatpush2.msra.mxu0 %v681_v20  ;;  %v375_v19 = vld [vmem:[#allocation6 + $0x210] sm:$0xff]  ;;  %v500_v20 = vld [vmem:[#allocation6 + $0x5f8] sm:$0xff] }
  0xd1   :  { %997 = vmatprep.subr.mxu1 %v428_v21  ;;  %928 = vmatprep.subr.mxu0 %v678_v22  ;;  %v628_v21 = vld [vmem:[#allocation6 + $0x9f8] sm:$0xff]  ;;  %v499_v22 = vld [vmem:[#allocation6 + $0x5f0] sm:$0xff] }
  0xd2   :  { %998 = vmatpush2.msra.mxu1 %v427_v25  ;;  %929 = vmatpush2.msra.mxu0 %v677_v28  ;;  %v627_v25 = vld [vmem:[#allocation6 + $0x9f0] sm:$0xff]  ;;  %v496_v28 = vld [vmem:[#allocation6 + $0x5d8] sm:$0xff] }
  0xd3   :  { %999 = vmatprep.subr.mxu1 %v424_v30  ;;  %930 = vmatprep.subr.mxu0 %v674_v31  ;;  %v624_v30 = vld [vmem:[#allocation6 + $0x9d8] sm:$0xff]  ;;  %v495_v31 = vld [vmem:[#allocation6 + $0x5d0] sm:$0xff] }
  0xd4   :  { %1000 = vmatpush2.msra.mxu1 %v423_v32  ;;  %931 = vmatpush2.msra.mxu0 %v673_v33  ;;  %v623_v32 = vld [vmem:[#allocation6 + $0x9d0] sm:$0xff]  ;;  %v492_v33 = vld [vmem:[#allocation6 + $0x5b8] sm:$0xff] }
  0xd5   :  { %1001 = vmatprep.subr.mxu1 %v420_v34  ;;  %932 = vmatprep.subr.mxu0 %v670_v36  ;;  %v620_v34 = vld [vmem:[#allocation6 + $0x9b8] sm:$0xff]  ;;  %v491_v36 = vld [vmem:[#allocation6 + $0x5b0] sm:$0xff] }
  0xd6   :  { %1002 = vmatpush2.msra.mxu1 %v419_v37  ;;  %933 = vmatpush2.msra.mxu0 %v669_v38  ;;  %v619_v37 = vld [vmem:[#allocation6 + $0x9b0] sm:$0xff]  ;;  %v488_v38 = vld [vmem:[#allocation6 + $0x598] sm:$0xff] }
  0xd7   :  { %1003 = vmatprep.subr.mxu1 %v416_v39  ;;  %934 = vmatprep.subr.mxu0 %v666_v40  ;;  %v487_v39 = vld [vmem:[#allocation6 + $0x590] sm:$0xff] }
  0xd8   :  { %1004 = vmatpush2.msra.mxu1 %v415_v41  ;;  %935 = vmatpush2.msra.mxu0 %v665_v42  ;;  %v615_v40 = vld [vmem:[#allocation6 + $0x990] sm:$0xff]  ;;  %v612_v41 = vld [vmem:[#allocation6 + $0x978] sm:$0xff] }
  0xd9   :  { %1005 = vmatprep.subr.mxu1 %v412_v43  ;;  %936 = vmatprep.subr.mxu0 %v662_v44  ;;  %v483_v42 = vld [vmem:[#allocation6 + $0x570] sm:$0xff]  ;;  %v480_v44 = vld [vmem:[#allocation6 + $0x558] sm:$0xff] }
  0xda   :  { %1006 = vmatpush2.msra.mxu1 %v411_v45  ;;  %937 = vmatpush2.msra.mxu0 %v661_v46  ;;  %v611_v43 = vld [vmem:[#allocation6 + $0x970] sm:$0xff]  ;;  %v608_v45 = vld [vmem:[#allocation6 + $0x958] sm:$0xff] }
  0xdb   :  { %1007 = vmatprep.subr.mxu1 %v408_v47  ;;  %938 = vmatprep.subr.mxu0 %v658_v48  ;;  %v479_v46 = vld [vmem:[#allocation6 + $0x550] sm:$0xff]  ;;  %v476_v48 = vld [vmem:[#allocation6 + $0x538] sm:$0xff] }
  0xdc   :  { %1008 = vmatpush2.msra.mxu1 %v407_v49  ;;  %939 = vmatpush2.msra.mxu0 %v657_v50  ;;  %v607_v47 = vld [vmem:[#allocation6 + $0x950] sm:$0xff]  ;;  %v604_v49 = vld [vmem:[#allocation6 + $0x938] sm:$0xff] }
  0xdd   :  { %1009 = vmatprep.subr.mxu1 %v404_v51  ;;  %940 = vmatprep.subr.mxu0 %v654_v52  ;;  %v475_v50 = vld [vmem:[#allocation6 + $0x530] sm:$0xff]  ;;  %v472_v52 = vld [vmem:[#allocation6 + $0x518] sm:$0xff] }
  0xde   :  { %1010 = vmatpush2.msra.mxu1 %v403_v53  ;;  %941 = vmatpush2.msra.mxu0 %v653_v54  ;;  %v603_v51 = vld [vmem:[#allocation6 + $0x930] sm:$0xff]  ;;  %v600_v53 = vld [vmem:[#allocation6 + $0x918] sm:$0xff] }
  0xdf   :  { %1011 = vmatprep.subr.mxu1 %v400_v55  ;;  %942 = vmatprep.subr.mxu0 %v650_v56  ;;  %v471_v54 = vld [vmem:[#allocation6 + $0x510] sm:$0xff]  ;;  %v468_v56 = vld [vmem:[#allocation6 + $0x4f8] sm:$0xff] }
  0xe0   :  { %1012 = vmatpush2.msra.mxu1 %v399_v58  ;;  %943 = vmatpush2.msra.mxu0 %v649_v59  ;;  %v599_v55 = vld [vmem:[#allocation6 + $0x910] sm:$0xff] }
  0xe1   :  { %1013 = vmatprep.subr.mxu1 %v396_v60  ;;  %944 = vmatprep.subr.mxu0 %v646_v61  ;;  %v467_v58 = vld [vmem:[#allocation6 + $0x4f0] sm:$0xff]  ;;  %v464_v60 = vld [vmem:[#allocation6 + $0x4d8] sm:$0xff] }
  0xe2   :  { %1014 = vmatpush2.msra.mxu1 %v395_v62  ;;  %945 = vmatpush2.msra.mxu0 %v645_v63  ;;  %v595_v59 = vld [vmem:[#allocation6 + $0x8f0] sm:$0xff]  ;;  %v592_v61 = vld [vmem:[#allocation6 + $0x8d8] sm:$0xff] }
  0xe3   :  { %1015 = vmatprep.subr.mxu1 %v392_v1  ;;  %946 = vmatprep.subr.mxu0 %v642_v2  ;;  %v463_v62 = vld [vmem:[#allocation6 + $0x4d0] sm:$0xff]  ;;  %v588_v1 = vld [vmem:[#allocation6 + $0x8b8] sm:$0xff] }
  0xe4   :  { %1016 = vmatpush2.msra.mxu1 %v391_v3  ;;  %947 = vmatpush2.msra.mxu0 %v641_v4  ;;  %v591_v63 = vld [vmem:[#allocation6 + $0x8d0] sm:$0xff]  ;;  %v456_v4 = vld [vmem:[#allocation6 + $0x498] sm:$0xff] }
  0xe5   :  { %1017 = vmatprep.subr.mxu1 %v388_v5  ;;  %948 = vmatprep.subr.mxu0 %v638_v6  ;;  %v459_v2 = vld [vmem:[#allocation6 + $0x4b0] sm:$0xff]  ;;  %v584_v5 = vld [vmem:[#allocation6 + $0x898] sm:$0xff] }
  0xe6   :  { %1018 = vmatpush2.msra.mxu1 %v387_v7  ;;  %949 = vmatpush2.msra.mxu0 %v637_v8  ;;  %v587_v3 = vld [vmem:[#allocation6 + $0x8b0] sm:$0xff]  ;;  %v452_v8 = vld [vmem:[#allocation6 + $0x478] sm:$0xff] }
  0xe7   :  { %1019 = vmatprep.subr.mxu1 %v384_v10  ;;  %950 = vmatprep.subr.mxu0 %v634_v11  ;;  %v455_v6 = vld [vmem:[#allocation6 + $0x490] sm:$0xff]  ;;  %v580_v10 = vld [vmem:[#allocation6 + $0x878] sm:$0xff] }
  0xe8   :  { %1020 = vmatpush2.msra.mxu1 %v383_v12  ;;  %951 = vmatpush2.msra.mxu0 %v633_v13  ;;  %v583_v7 = vld [vmem:[#allocation6 + $0x890] sm:$0xff]  ;;  %v448_v13 = vld [vmem:[#allocation6 + $0x458] sm:$0xff] }
  0xe9   :  { %1021 = vmatprep.subr.mxu1 %v380_v14  ;;  %952 = vmatprep.subr.mxu0 %v630_v15  ;;  %v451_v11 = vld [vmem:[#allocation6 + $0x470] sm:$0xff]  ;;  %v576_v14 = vld [vmem:[#allocation6 + $0x858] sm:$0xff] }
  0xea   :  { %1022 = vmatpush2.msra.mxu1 %v379_v16  ;;  %953 = vmatpush2.msra.mxu0 %v629_v17  ;;  %v579_v12 = vld [vmem:[#allocation6 + $0x870] sm:$0xff]  ;;  %v444_v17 = vld [vmem:[#allocation6 + $0x438] sm:$0xff] }
  0xeb   :  { %1023 = vmatprep.subr.mxu1 %v376_v18  ;;  %954 = vmatprep.mubr.f32.mxu0 %v1935_v35  ;;  %v447_v15 = vld [vmem:[#allocation6 + $0x450] sm:$0xff]  ;;  %v572_v18 = vld [vmem:[#allocation6 + $0x838] sm:$0xff] }
  0xec   :  { %1024 = vmatpush2.msra.mxu1 %v375_v19  ;;  %955 = vmatmul.mubr.f32.vlgmr.msra.gmra.mxu0 %v1931_v9  ;;  %v575_v16 = vld [vmem:[#allocation6 + $0x850] sm:$0xff] }
  0xed   :  { %1025 = vmatprep.mubr.f32.mxu1 %v1911_v26  ;;  %1032 = vmatprep.subr.mxu0 %v500_v20  ;;  %v616_v26 = vld [vmem:[#allocation6 + $0x998] sm:$0xff]  ;;  %v443_v19 = vld [vmem:[#allocation6 + $0x430] sm:$0xff] }
  0xee   :  { %1103 = vmatprep.subr.mxu1 %v628_v21  ;;  %1026 = vmatmul.mubr.f32.vlgmr.msra.gmra.mxu1 %v1907_v24  ;;  %v484_v24 = vld [vmem:[#allocation6 + $0x578] sm:$0xff]  ;;  %v571_v20 = vld [vmem:[#allocation6 + $0x830] sm:$0xff] }
  0xef   :  { %1033 = vmatpush1.msra.mxu0 %v499_v22  ;;  %1104 = vmatpush1.msra.mxu1 %v627_v25  ;;  %v440_v21 = vld [vmem:[#allocation6 + $0x418] sm:$0xff]  ;;  %v439_v25 = vld [vmem:[#allocation6 + $0x410] sm:$0xff] }
  0xf0   :  { %1034 = vmatprep.subr.mxu0 %v496_v28  ;;  %1105 = vmatprep.subr.mxu1 %v624_v30  ;;  %v568_v22 = vld [vmem:[#allocation6 + $0x818] sm:$0xff]  ;;  %v567_v28 = vld [vmem:[#allocation6 + $0x810] sm:$0xff] }
  0xf1   :  { %1035 = vmatpush1.msra.mxu0 %v495_v31  ;;  %1106 = vmatpush1.msra.mxu1 %v623_v32  ;;  %v564_v30 = vld [vmem:[#allocation6 + $0x7f8] sm:$0xff]  ;;  %v563_v32 = vld [vmem:[#allocation6 + $0x7f0] sm:$0xff] }
  0xf2   :  { %1036 = vmatprep.subr.mxu0 %v492_v33  ;;  %1107 = vmatprep.subr.mxu1 %v620_v34  ;;  %v692_v31 = vld [vmem:[#allocation6 + $0xbf8] sm:$0xff]  ;;  %v691_v33 = vld [vmem:[#allocation6 + $0xbf0] sm:$0xff] }
  0xf3   :  { %1037 = vmatpush1.msra.mxu0 %v491_v36  ;;  %1108 = vmatpush1.msra.mxu1 %v619_v37  ;;  %v560_v34 = vld [vmem:[#allocation6 + $0x7d8] sm:$0xff]  ;;  %v559_v37 = vld [vmem:[#allocation6 + $0x7d0] sm:$0xff] }
  0xf4   :  { %1038 = vmatprep.subr.mxu0 %v488_v38  ;;  %1109 = vmatprep.subr.mxu1 %v616_v26  ;;  %v688_v36 = vld [vmem:[#allocation6 + $0xbd8] sm:$0xff]  ;;  %v687_v38 = vld [vmem:[#allocation6 + $0xbd0] sm:$0xff] }
  0xf5   :  { %1039 = vmatpush1.msra.mxu0 %v487_v39  ;;  %1110 = vmatpush1.msra.mxu1 %v615_v40  ;;  %v556_v26 = vld [vmem:[#allocation6 + $0x7b8] sm:$0xff]  ;;  %v555_v40 = vld [vmem:[#allocation6 + $0x7b0] sm:$0xff] }
  0xf6   :  { %1040 = vmatprep.subr.mxu0 %v484_v24  ;;  %1111 = vmatprep.subr.mxu1 %v612_v41  ;;  %v684_v39 = vld [vmem:[#allocation6 + $0xbb8] sm:$0xff]  ;;  %v683_v24 = vld [vmem:[#allocation6 + $0xbb0] sm:$0xff] }
  0xf7   :  { %1041 = vmatpush1.msra.mxu0 %v483_v42  ;;  %1112 = vmatpush1.msra.mxu1 %v611_v43  ;;  %v552_v41 = vld [vmem:[#allocation6 + $0x798] sm:$0xff]  ;;  %v551_v43 = vld [vmem:[#allocation6 + $0x790] sm:$0xff] }
  0xf8   :  { %1042 = vmatprep.subr.mxu0 %v480_v44  ;;  %1113 = vmatprep.subr.mxu1 %v608_v45  ;;  %v680_v42 = vld [vmem:[#allocation6 + $0xb98] sm:$0xff]  ;;  %v679_v44 = vld [vmem:[#allocation6 + $0xb90] sm:$0xff] }
  0xf9   :  { %1043 = vmatpush1.msra.mxu0 %v479_v46  ;;  %1114 = vmatpush1.msra.mxu1 %v607_v47  ;;  %v548_v45 = vld [vmem:[#allocation6 + $0x778] sm:$0xff]  ;;  %v547_v47 = vld [vmem:[#allocation6 + $0x770] sm:$0xff] }
  0xfa   :  { %1044 = vmatprep.subr.mxu0 %v476_v48  ;;  %1115 = vmatprep.subr.mxu1 %v604_v49  ;;  %v676_v46 = vld [vmem:[#allocation6 + $0xb78] sm:$0xff]  ;;  %v675_v48 = vld [vmem:[#allocation6 + $0xb70] sm:$0xff] }
  0xfb   :  { %1045 = vmatpush1.msra.mxu0 %v475_v50  ;;  %1116 = vmatpush1.msra.mxu1 %v603_v51  ;;  %v544_v49 = vld [vmem:[#allocation6 + $0x758] sm:$0xff]  ;;  %v543_v51 = vld [vmem:[#allocation6 + $0x750] sm:$0xff] }
  0xfc   :  { %1046 = vmatprep.subr.mxu0 %v472_v52  ;;  %1117 = vmatprep.subr.mxu1 %v600_v53  ;;  %v672_v50 = vld [vmem:[#allocation6 + $0xb58] sm:$0xff]  ;;  %v671_v52 = vld [vmem:[#allocation6 + $0xb50] sm:$0xff] }
  0xfd   :  { %1047 = vmatpush1.msra.mxu0 %v471_v54  ;;  %1118 = vmatpush1.msra.mxu1 %v599_v55  ;;  %v540_v53 = vld [vmem:[#allocation6 + $0x738] sm:$0xff]  ;;  %v539_v55 = vld [vmem:[#allocation6 + $0x730] sm:$0xff] }
  0xfe   :  { %1048 = vmatprep.subr.mxu0 %v468_v56  ;;  %1119 = vmatprep.subr.mxu1 %v596_v57  ;;  %v668_v54 = vld [vmem:[#allocation6 + $0xb38] sm:$0xff]  ;;  %v667_v56 = vld [vmem:[#allocation6 + $0xb30] sm:$0xff] }
  0xff   :  { %1049 = vmatpush1.msra.mxu0 %v467_v58  ;;  %1120 = vmatpush1.msra.mxu1 %v595_v59  ;;  %v536_v57 = vld [vmem:[#allocation6 + $0x718] sm:$0xff]  ;;  %v535_v59 = vld [vmem:[#allocation6 + $0x710] sm:$0xff] }
 0x100   :  { %1050 = vmatprep.subr.mxu0 %v464_v60  ;;  %1121 = vmatprep.subr.mxu1 %v592_v61  ;;  %v664_v58 = vld [vmem:[#allocation6 + $0xb18] sm:$0xff]  ;;  %v663_v60 = vld [vmem:[#allocation6 + $0xb10] sm:$0xff] }
 0x101   :  { %1051 = vmatpush1.msra.mxu0 %v463_v62  ;;  %1122 = vmatpush1.msra.mxu1 %v591_v63  ;;  %v532_v61 = vld [vmem:[#allocation6 + $0x6f8] sm:$0xff]  ;;  %v531_v63 = vld [vmem:[#allocation6 + $0x6f0] sm:$0xff] }
 0x102   :  { %1052 = vmatprep.subr.mxu0 %v460_v0  ;;  %1123 = vmatprep.subr.mxu1 %v588_v1  ;;  %v660_v62 = vld [vmem:[#allocation6 + $0xaf8] sm:$0xff]  ;;  %v659_v0 = vld [vmem:[#allocation6 + $0xaf0] sm:$0xff] }
 0x103   :  { %1053 = vmatpush1.msra.mxu0 %v459_v2  ;;  %1124 = vmatpush1.msra.mxu1 %v587_v3  ;;  %v528_v1 = vld [vmem:[#allocation6 + $0x6d8] sm:$0xff]  ;;  %v527_v3 = vld [vmem:[#allocation6 + $0x6d0] sm:$0xff] }
 0x104   :  { %1054 = vmatprep.subr.mxu0 %v456_v4  ;;  %1125 = vmatprep.subr.mxu1 %v584_v5  ;;  %v656_v2 = vld [vmem:[#allocation6 + $0xad8] sm:$0xff]  ;;  %v655_v4 = vld [vmem:[#allocation6 + $0xad0] sm:$0xff] }
 0x105   :  { %1055 = vmatpush1.msra.mxu0 %v455_v6  ;;  %1126 = vmatpush1.msra.mxu1 %v583_v7  ;;  %v524_v5 = vld [vmem:[#allocation6 + $0x6b8] sm:$0xff]  ;;  %v523_v7 = vld [vmem:[#allocation6 + $0x6b0] sm:$0xff] }
 0x106   :  { %1056 = vmatprep.subr.mxu0 %v452_v8  ;;  %1127 = vmatprep.subr.mxu1 %v580_v10  ;;  %v652_v6 = vld [vmem:[#allocation6 + $0xab8] sm:$0xff]  ;;  %v651_v8 = vld [vmem:[#allocation6 + $0xab0] sm:$0xff] }
 0x107   :  { %1057 = vmatpush1.msra.mxu0 %v451_v11  ;;  %1128 = vmatpush1.msra.mxu1 %v579_v12  ;;  %v520_v10 = vld [vmem:[#allocation6 + $0x698] sm:$0xff]  ;;  %v519_v12 = vld [vmem:[#allocation6 + $0x690] sm:$0xff] }
 0x108   :  { %1058 = vmatprep.subr.mxu0 %v448_v13  ;;  %1129 = vmatprep.subr.mxu1 %v576_v14  ;;  %v648_v11 = vld [vmem:[#allocation6 + $0xa98] sm:$0xff]  ;;  %v647_v13 = vld [vmem:[#allocation6 + $0xa90] sm:$0xff] }
 0x109   :  { %1059 = vmatpush1.msra.mxu0 %v447_v15  ;;  %1130 = vmatpush1.msra.mxu1 %v575_v16  ;;  %v516_v14 = vld [vmem:[#allocation6 + $0x678] sm:$0xff]  ;;  %v515_v16 = vld [vmem:[#allocation6 + $0x670] sm:$0xff] }
 0x10a   :  { %1060 = vmatprep.subr.mxu0 %v444_v17  ;;  %1131 = vmatprep.subr.mxu1 %v572_v18  ;;  %v644_v15 = vld [vmem:[#allocation6 + $0xa78] sm:$0xff]  ;;  %v643_v17 = vld [vmem:[#allocation6 + $0xa70] sm:$0xff] }
 0x10b   :  { %1061 = vmatpush1.msra.mxu0 %v443_v19  ;;  %1132 = vmatpush1.msra.mxu1 %v571_v20  ;;  %v512_v18 = vld [vmem:[#allocation6 + $0x658] sm:$0xff]  ;;  %v511_v20 = vld [vmem:[#allocation6 + $0x650] sm:$0xff] }
 0x10c   :  { %1062 = vmatprep.subr.mxu0 %v440_v21  ;;  %1133 = vmatprep.subr.mxu1 %v568_v22  ;;  %v640_v19 = vld [vmem:[#allocation6 + $0xa58] sm:$0xff]  ;;  %v639_v21 = vld [vmem:[#allocation6 + $0xa50] sm:$0xff] }
 0x10d   :  { %1063 = vmatpush1.msra.mxu0 %v439_v25  ;;  %1134 = vmatpush1.msra.mxu1 %v567_v28  ;;  %v508_v22 = vld [vmem:[#allocation6 + $0x638] sm:$0xff]  ;;  %v507_v28 = vld [vmem:[#allocation6 + $0x630] sm:$0xff] }
 0x10e   :  { %1064 = vmatprep.subr.mxu0 %v564_v30  ;;  %1135 = vmatprep.subr.mxu1 %v692_v31  ;;  %v636_v25 = vld [vmem:[#allocation6 + $0xa38] sm:$0xff]  ;;  %v635_v30 = vld [vmem:[#allocation6 + $0xa30] sm:$0xff] }
 0x10f   :  { %1065 = vmatpush2.msra.mxu0 %v563_v32  ;;  %1136 = vmatpush2.msra.mxu1 %v691_v33  ;;  %v504_v31 = vld [vmem:[#allocation6 + $0x618] sm:$0xff]  ;;  %v503_v33 = vld [vmem:[#allocation6 + $0x610] sm:$0xff] }
 0x110   :  { %1066 = vmatprep.subr.mxu0 %v560_v34  ;;  %1137 = vmatprep.subr.mxu1 %v688_v36  ;;  %v632_v32 = vld [vmem:[#allocation6 + $0xa18] sm:$0xff]  ;;  %v631_v34 = vld [vmem:[#allocation6 + $0xa10] sm:$0xff] }
 0x111   :  { %1067 = vmatpush2.msra.mxu0 %v559_v37  ;;  %1138 = vmatpush2.msra.mxu1 %v687_v38  ;;  %v1209_v36 = vld [vmem:[#allocation9 + $0xf8] sm:$0xff]  ;;  %v1208_v37 = vld [vmem:[#allocation9 + $0xf0] sm:$0xff]  ;;  %v1207_v38 = vld [vmem:[#allocation9 + $0xe8] sm:$0xff] }
 0x112   :  { %1068 = vmatprep.subr.mxu0 %v556_v26  ;;  %1139 = vmatprep.subr.mxu1 %v684_v39  ;;  %v1206_v26 = vld [vmem:[#allocation9 + $0xe0] sm:$0xff]  ;;  %v1205_v39 = vld [vmem:[#allocation9 + $0xd8] sm:$0xff] }
 0x113   :  { %1069 = vmatpush2.msra.mxu0 %v555_v40  ;;  %1140 = vmatpush2.msra.mxu1 %v683_v24  ;;  %v1204_v40 = vld [vmem:[#allocation9 + $0xd0] sm:$0xff]  ;;  %v1203_v24 = vld [vmem:[#allocation9 + $0xc8] sm:$0xff] }
 0x114   :  { %1070 = vmatprep.subr.mxu0 %v552_v41  ;;  %1141 = vmatprep.subr.mxu1 %v680_v42  ;;  %v1202_v41 = vld [vmem:[#allocation9 + $0xc0] sm:$0xff]  ;;  %v1272_v42 = vld [vmem:[#allocation9 + $0x2f0] sm:$0xff] }
 0x115   :  { %1071 = vmatpush2.msra.mxu0 %v551_v43  ;;  %1142 = vmatpush2.msra.mxu1 %v679_v44  ;;  %v1271_v43 = vld [vmem:[#allocation9 + $0x2e8] sm:$0xff]  ;;  %v1269_v44 = vld [vmem:[#allocation9 + $0x2d8] sm:$0xff] }
 0x116   :  { %1072 = vmatprep.subr.mxu0 %v548_v45  ;;  %1143 = vmatprep.subr.mxu1 %v676_v46  ;;  %v1199_v45 = vld [vmem:[#allocation9 + $0xa8] sm:$0xff]  ;;  %v1268_v46 = vld [vmem:[#allocation9 + $0x2d0] sm:$0xff] }
 0x117   :  { %1073 = vmatpush2.msra.mxu0 %v547_v47  ;;  %1144 = vmatpush2.msra.mxu1 %v675_v48  ;;  %v1198_v47 = vld [vmem:[#allocation9 + $0xa0] sm:$0xff]  ;;  %v1267_v48 = vld [vmem:[#allocation9 + $0x2c8] sm:$0xff] }
 0x118   :  { %1074 = vmatprep.subr.mxu0 %v544_v49  ;;  %1145 = vmatprep.subr.mxu1 %v672_v50  ;;  %v1197_v49 = vld [vmem:[#allocation9 + $0x98] sm:$0xff]  ;;  %v1266_v50 = vld [vmem:[#allocation9 + $0x2c0] sm:$0xff] }
 0x119   :  { %1075 = vmatpush2.msra.mxu0 %v543_v51  ;;  %1146 = vmatpush2.msra.mxu1 %v671_v52  ;;  %v1196_v51 = vld [vmem:[#allocation9 + $0x90] sm:$0xff]  ;;  %v1265_v52 = vld [vmem:[#allocation9 + $0x2b8] sm:$0xff] }
 0x11a   :  { %1076 = vmatprep.subr.mxu0 %v540_v53  ;;  %1147 = vmatprep.subr.mxu1 %v668_v54  ;;  %v1195_v53 = vld [vmem:[#allocation9 + $0x88] sm:$0xff]  ;;  %v1264_v54 = vld [vmem:[#allocation9 + $0x2b0] sm:$0xff] }
 0x11b   :  { %1077 = vmatpush2.msra.mxu0 %v539_v55  ;;  %1148 = vmatpush2.msra.mxu1 %v667_v56  ;;  %v1194_v55 = vld [vmem:[#allocation9 + $0x80] sm:$0xff]  ;;  %v1263_v56 = vld [vmem:[#allocation9 + $0x2a8] sm:$0xff] }
 0x11c   :  { %1078 = vmatprep.subr.mxu0 %v536_v57  ;;  %1149 = vmatprep.subr.mxu1 %v664_v58  ;;  %v1193_v57 = vld [vmem:[#allocation9 + $0x78] sm:$0xff]  ;;  %v1262_v58 = vld [vmem:[#allocation9 + $0x2a0] sm:$0xff] }
 0x11d   :  { %1079 = vmatpush2.msra.mxu0 %v535_v59  ;;  %1150 = vmatpush2.msra.mxu1 %v663_v60  ;;  %v1192_v59 = vld [vmem:[#allocation9 + $0x70] sm:$0xff]  ;;  %v1261_v60 = vld [vmem:[#allocation9 + $0x298] sm:$0xff] }
 0x11e   :  { %1080 = vmatprep.subr.mxu0 %v532_v61  ;;  %1151 = vmatprep.subr.mxu1 %v660_v62  ;;  %v1191_v61 = vld [vmem:[#allocation9 + $0x68] sm:$0xff]  ;;  %v1260_v62 = vld [vmem:[#allocation9 + $0x290] sm:$0xff] }
 0x11f   :  { %1081 = vmatpush2.msra.mxu0 %v531_v63  ;;  %1152 = vmatpush2.msra.mxu1 %v659_v0  ;;  %v1190_v63 = vld [vmem:[#allocation9 + $0x60] sm:$0xff]  ;;  %v1259_v0 = vld [vmem:[#allocation9 + $0x288] sm:$0xff] }
 0x120   :  { %1082 = vmatprep.subr.mxu0 %v528_v1  ;;  %1153 = vmatprep.subr.mxu1 %v656_v2  ;;  %v1189_v1 = vld [vmem:[#allocation9 + $0x58] sm:$0xff]  ;;  %v1258_v2 = vld [vmem:[#allocation9 + $0x280] sm:$0xff] }
 0x121   :  { %1083 = vmatpush2.msra.mxu0 %v527_v3  ;;  %1154 = vmatpush2.msra.mxu1 %v655_v4  ;;  %v1188_v3 = vld [vmem:[#allocation9 + $0x50] sm:$0xff]  ;;  %v1257_v4 = vld [vmem:[#allocation9 + $0x278] sm:$0xff] }
 0x122   :  { %1084 = vmatprep.subr.mxu0 %v524_v5  ;;  %1155 = vmatprep.subr.mxu1 %v652_v6  ;;  %v1187_v5 = vld [vmem:[#allocation9 + $0x48] sm:$0xff]  ;;  %v1256_v6 = vld [vmem:[#allocation9 + $0x270] sm:$0xff] }
 0x123   :  { %1085 = vmatpush2.msra.mxu0 %v523_v7  ;;  %1156 = vmatpush2.msra.mxu1 %v651_v8  ;;  %v1186_v7 = vld [vmem:[#allocation9 + $0x40] sm:$0xff]  ;;  %v1255_v8 = vld [vmem:[#allocation9 + $0x268] sm:$0xff] }
 0x124   :  { %1086 = vmatprep.subr.mxu0 %v520_v10  ;;  %1157 = vmatprep.subr.mxu1 %v648_v11  ;;  %v1185_v10 = vld [vmem:[#allocation9 + $0x38] sm:$0xff]  ;;  %v1254_v11 = vld [vmem:[#allocation9 + $0x260] sm:$0xff] }
 0x125   :  { %1087 = vmatpush2.msra.mxu0 %v519_v12  ;;  %1158 = vmatpush2.msra.mxu1 %v647_v13  ;;  %v1184_v12 = vld [vmem:[#allocation9 + $0x30] sm:$0xff]  ;;  %v1253_v13 = vld [vmem:[#allocation9 + $0x258] sm:$0xff] }
 0x126   :  { %1088 = vmatprep.subr.mxu0 %v516_v14  ;;  %1159 = vmatprep.subr.mxu1 %v644_v15  ;;  %v1183_v14 = vld [vmem:[#allocation9 + $0x28] sm:$0xff]  ;;  %v1252_v15 = vld [vmem:[#allocation9 + $0x250] sm:$0xff] }
 0x127   :  { %1089 = vmatpush2.msra.mxu0 %v515_v16  ;;  %1160 = vmatpush2.msra.mxu1 %v643_v17  ;;  %v1182_v16 = vld [vmem:[#allocation9 + $0x20] sm:$0xff]  ;;  %v1251_v17 = vld [vmem:[#allocation9 + $0x248] sm:$0xff] }
 0x128   :  { %1090 = vmatprep.subr.mxu0 %v512_v18  ;;  %1161 = vmatprep.subr.mxu1 %v640_v19  ;;  %v1181_v18 = vld [vmem:[#allocation9 + $0x18] sm:$0xff]  ;;  %v1250_v19 = vld [vmem:[#allocation9 + $0x240] sm:$0xff] }
 0x129   :  { %1091 = vmatpush2.msra.mxu0 %v511_v20  ;;  %1162 = vmatpush2.msra.mxu1 %v639_v21  ;;  %v1180_v20 = vld [vmem:[#allocation9 + $0x10] sm:$0xff]  ;;  %v1249_v21 = vld [vmem:[#allocation9 + $0x238] sm:$0xff] }
 0x12a   :  { %1092 = vmatprep.subr.mxu0 %v508_v22  ;;  %1163 = vmatprep.subr.mxu1 %v636_v25  ;;  %v1179_v22 = vld [vmem:[#allocation9 + $0x8] sm:$0xff]  ;;  %v1248_v25 = vld [vmem:[#allocation9 + $0x230] sm:$0xff] }
 0x12b   :  { %1093 = vmatpush2.msra.mxu0 %v507_v28  ;;  %1164 = vmatpush2.msra.mxu1 %v635_v30  ;;  %v1178_v28 = vld [vmem:[#allocation9] sm:$0xff]  ;;  %v1247_v30 = vld [vmem:[#allocation9 + $0x228] sm:$0xff] }
 0x12c   :  { %1094 = vmatprep.subr.mxu0 %v504_v31  ;;  %1165 = vmatprep.subr.mxu1 %v632_v32  ;;  %v1241_v31 = vld [vmem:[#allocation9 + $0x1f8] sm:$0xff]  ;;  %v1246_v32 = vld [vmem:[#allocation9 + $0x220] sm:$0xff] }
 0x12d   :  { %1095 = vmatpush2.msra.mxu0 %v503_v33  ;;  %1096 = vmatprep.mubr.f32.mxu0 %v1919_v29  ;;  %v1273_v29 = vld [vmem:[#allocation9 + $0x2f8] sm:$0xff]  ;;  %v1240_v33 = vld [vmem:[#allocation9 + $0x1f0] sm:$0xff] }
 0x12e   :  { %1166 = vmatpush2.msra.mxu1 %v631_v34  ;;  %1167 = vmatprep.mubr.f32.mxu1 %v1935_v35  ;;  %v1201_v35 = vld [vmem:[#allocation9 + $0xb8] sm:$0xff] }
 0x12f   :  { %1097 = vmatmul.mubr.f32.vlgmr.msra.gmra.mxu0 %v1914_v27  ;;  %1168 = vmatmul.mubr.f32.vlgmr.msra.gmra.mxu1 %v1931_v9  ;;  %v1270_v27 = vld [vmem:[#allocation9 + $0x2e0] sm:$0xff]  ;;  %v1200_v9 = vld [vmem:[#allocation9 + $0xb0] sm:$0xff]  ;;  %v1245_v34 = vld [vmem:[#allocation9 + $0x218] sm:$0xff] }
 0x130   :  { %1318 = vmatprep.subr.mxu0 %v1209_v36  ;;  %1389 = vmatprep.subr.mxu1 %v1273_v29  ;;  %v1239_v36 = vld [vmem:[#allocation9 + $0x1e8] sm:$0xff] }
 0x131   :  { %1319 = vmatpush1.msra.mxu0 %v1208_v37  ;;  %1390 = vmatpush1.msra.mxu1 %v1272_v42  ;;  %v1244_v37 = vld [vmem:[#allocation9 + $0x210] sm:$0xff]  ;;  %v1235_v29 = vld [vmem:[#allocation9 + $0x1c8] sm:$0xff] }
 0x132   :  { %1320 = vmatprep.subr.mxu0 %v1207_v38  ;;  %1391 = vmatprep.subr.mxu1 %v1271_v43  ;;  %v1238_v38 = vld [vmem:[#allocation9 + $0x1e0] sm:$0xff]  ;;  %v1304_v42 = vld [vmem:[#allocation9 + $0x3f0] sm:$0xff] }
 0x133   :  { %1321 = vmatpush1.msra.mxu0 %v1206_v26  ;;  %1392 = vmatpush1.msra.mxu1 %v1270_v27  ;;  %v1243_v26 = vld [vmem:[#allocation9 + $0x208] sm:$0xff]  ;;  %v1234_v43 = vld [vmem:[#allocation9 + $0x1c0] sm:$0xff]  ;;  %v1233_v27 = vld [vmem:[#allocation9 + $0x1b8] sm:$0xff] }
 0x134   :  { %1322 = vmatprep.subr.mxu0 %v1205_v39  ;;  %1393 = vmatprep.subr.mxu1 %v1269_v44  ;;  %v1237_v39 = vld [vmem:[#allocation9 + $0x1d8] sm:$0xff]  ;;  %v1232_v44 = vld [vmem:[#allocation9 + $0x1b0] sm:$0xff] }
 0x135   :  { %1323 = vmatpush1.msra.mxu0 %v1204_v40  ;;  %1394 = vmatpush1.msra.mxu1 %v1268_v46  ;;  %v1242_v40 = vld [vmem:[#allocation9 + $0x200] sm:$0xff]  ;;  %v1231_v46 = vld [vmem:[#allocation9 + $0x1a8] sm:$0xff] }
 0x136   :  { %1324 = vmatprep.subr.mxu0 %v1203_v24  ;;  %1395 = vmatprep.subr.mxu1 %v1267_v48  ;;  %v1236_v24 = vld [vmem:[#allocation9 + $0x1d0] sm:$0xff]  ;;  %v1230_v48 = vld [vmem:[#allocation9 + $0x1a0] sm:$0xff] }
 0x137   :  { %1325 = vmatpush1.msra.mxu0 %v1202_v41  ;;  %1396 = vmatpush1.msra.mxu1 %v1266_v50  ;;  %v1305_v41 = vld [vmem:[#allocation9 + $0x3f8] sm:$0xff] }
 0x138   :  { %1326 = vmatprep.subr.mxu0 %v1201_v35  ;;  %1397 = vmatprep.subr.mxu1 %v1265_v52  ;;  %v1303_v35 = vld [vmem:[#allocation9 + $0x3e8] sm:$0xff]  ;;  %v1229_v50 = vld [vmem:[#allocation9 + $0x198] sm:$0xff]  ;;  %v1228_v52 = vld [vmem:[#allocation9 + $0x190] sm:$0xff] }
 0x139   :  { %1327 = vmatpush1.msra.mxu0 %v1200_v9  ;;  %1398 = vmatpush1.msra.mxu1 %v1264_v54  ;;  %v1302_v9 = vld [vmem:[#allocation9 + $0x3e0] sm:$0xff]  ;;  %v1227_v54 = vld [vmem:[#allocation9 + $0x188] sm:$0xff] }
 0x13a   :  { %1328 = vmatprep.subr.mxu0 %v1199_v45  ;;  %1399 = vmatprep.subr.mxu1 %v1263_v56  ;;  %v1301_v45 = vld [vmem:[#allocation9 + $0x3d8] sm:$0xff]  ;;  %v1226_v56 = vld [vmem:[#allocation9 + $0x180] sm:$0xff] }
 0x13b   :  { %1329 = vmatpush1.msra.mxu0 %v1198_v47  ;;  %1400 = vmatpush1.msra.mxu1 %v1262_v58  ;;  %v1300_v47 = vld [vmem:[#allocation9 + $0x3d0] sm:$0xff]  ;;  %v1225_v58 = vld [vmem:[#allocation9 + $0x178] sm:$0xff] }
 0x13c   :  { %1330 = vmatprep.subr.mxu0 %v1197_v49  ;;  %1401 = vmatprep.subr.mxu1 %v1261_v60  ;;  %v1299_v49 = vld [vmem:[#allocation9 + $0x3c8] sm:$0xff]  ;;  %v1224_v60 = vld [vmem:[#allocation9 + $0x170] sm:$0xff] }
 0x13d   :  { %1331 = vmatpush1.msra.mxu0 %v1196_v51  ;;  %1402 = vmatpush1.msra.mxu1 %v1260_v62  ;;  %v1298_v51 = vld [vmem:[#allocation9 + $0x3c0] sm:$0xff]  ;;  %v1223_v62 = vld [vmem:[#allocation9 + $0x168] sm:$0xff] }
 0x13e   :  { %1332 = vmatprep.subr.mxu0 %v1195_v53  ;;  %1403 = vmatprep.subr.mxu1 %v1259_v0  ;;  %v1297_v53 = vld [vmem:[#allocation9 + $0x3b8] sm:$0xff]  ;;  %v1222_v0 = vld [vmem:[#allocation9 + $0x160] sm:$0xff] }
 0x13f   :  { %1333 = vmatpush1.msra.mxu0 %v1194_v55  ;;  %1404 = vmatpush1.msra.mxu1 %v1258_v2  ;;  %v1296_v55 = vld [vmem:[#allocation9 + $0x3b0] sm:$0xff]  ;;  %v1221_v2 = vld [vmem:[#allocation9 + $0x158] sm:$0xff] }
 0x140   :  { %1334 = vmatprep.subr.mxu0 %v1193_v57  ;;  %1405 = vmatprep.subr.mxu1 %v1257_v4  ;;  %v1295_v57 = vld [vmem:[#allocation9 + $0x3a8] sm:$0xff]  ;;  %v1220_v4 = vld [vmem:[#allocation9 + $0x150] sm:$0xff] }
 0x141   :  { %1335 = vmatpush1.msra.mxu0 %v1192_v59  ;;  %1406 = vmatpush1.msra.mxu1 %v1256_v6  ;;  %v1294_v59 = vld [vmem:[#allocation9 + $0x3a0] sm:$0xff]  ;;  %v1219_v6 = vld [vmem:[#allocation9 + $0x148] sm:$0xff] }
 0x142   :  { %1336 = vmatprep.subr.mxu0 %v1191_v61  ;;  %1407 = vmatprep.subr.mxu1 %v1255_v8  ;;  %v1293_v61 = vld [vmem:[#allocation9 + $0x398] sm:$0xff]  ;;  %v1218_v8 = vld [vmem:[#allocation9 + $0x140] sm:$0xff] }
 0x143   :  { %1337 = vmatpush1.msra.mxu0 %v1190_v63  ;;  %1408 = vmatpush1.msra.mxu1 %v1254_v11  ;;  %v1292_v63 = vld [vmem:[#allocation9 + $0x390] sm:$0xff]  ;;  %v1217_v11 = vld [vmem:[#allocation9 + $0x138] sm:$0xff] }
 0x144   :  { %1338 = vmatprep.subr.mxu0 %v1189_v1  ;;  %1409 = vmatprep.subr.mxu1 %v1253_v13  ;;  %v1291_v1 = vld [vmem:[#allocation9 + $0x388] sm:$0xff]  ;;  %v1216_v13 = vld [vmem:[#allocation9 + $0x130] sm:$0xff] }
 0x145   :  { %1339 = vmatpush1.msra.mxu0 %v1188_v3  ;;  %1410 = vmatpush1.msra.mxu1 %v1252_v15  ;;  %v1290_v3 = vld [vmem:[#allocation9 + $0x380] sm:$0xff]  ;;  %v1215_v15 = vld [vmem:[#allocation9 + $0x128] sm:$0xff] }
 0x146   :  { %1340 = vmatprep.subr.mxu0 %v1187_v5  ;;  %1411 = vmatprep.subr.mxu1 %v1251_v17  ;;  %v1289_v5 = vld [vmem:[#allocation9 + $0x378] sm:$0xff]  ;;  %v1214_v17 = vld [vmem:[#allocation9 + $0x120] sm:$0xff] }
 0x147   :  { %1341 = vmatpush1.msra.mxu0 %v1186_v7  ;;  %1412 = vmatpush1.msra.mxu1 %v1250_v19  ;;  %v1288_v7 = vld [vmem:[#allocation9 + $0x370] sm:$0xff] }
 0x148   :  { %1342 = vmatprep.subr.mxu0 %v1185_v10  ;;  %1413 = vmatprep.subr.mxu1 %v1249_v21  ;;  %v1287_v10 = vld [vmem:[#allocation9 + $0x368] sm:$0xff]  ;;  %v1212_v19 = vld [vmem:[#allocation9 + $0x110] sm:$0xff]  ;;  %v1210_v21 = vld [vmem:[#allocation9 + $0x100] sm:$0xff] }
 0x149   :  { %1343 = vmatpush1.msra.mxu0 %v1184_v12  ;;  %1414 = vmatpush1.msra.mxu1 %v1248_v25  ;;  %v1286_v12 = vld [vmem:[#allocation9 + $0x360] sm:$0xff] }
 0x14a   :  { %1344 = vmatprep.subr.mxu0 %v1183_v14  ;;  %1415 = vmatprep.subr.mxu1 %v1247_v30  ;;  %v1285_v14 = vld [vmem:[#allocation9 + $0x358] sm:$0xff]  ;;  %v1282_v25 = vld [vmem:[#allocation9 + $0x340] sm:$0xff]  ;;  %v1280_v30 = vld [vmem:[#allocation9 + $0x330] sm:$0xff] }
 0x14b   :  { %1345 = vmatpush1.msra.mxu0 %v1182_v16  ;;  %1416 = vmatpush1.msra.mxu1 %v1246_v32  ;;  %v1284_v16 = vld [vmem:[#allocation9 + $0x350] sm:$0xff]  ;;  %v1278_v32 = vld [vmem:[#allocation9 + $0x320] sm:$0xff] }
 0x14c   :  { %1346 = vmatprep.subr.mxu0 %v1181_v18  ;;  %1417 = vmatprep.subr.mxu1 %v1245_v34  ;;  %v1213_v18 = vld [vmem:[#allocation9 + $0x118] sm:$0xff]  ;;  %v1276_v34 = vld [vmem:[#allocation9 + $0x310] sm:$0xff] }
 0x14d   :  { %1347 = vmatpush1.msra.mxu0 %v1180_v20  ;;  %1418 = vmatpush1.msra.mxu1 %v1244_v37  ;;  %v1211_v20 = vld [vmem:[#allocation9 + $0x108] sm:$0xff]  ;;  %v1274_v37 = vld [vmem:[#allocation9 + $0x300] sm:$0xff] }
 0x14e   :  { %1348 = vmatprep.subr.mxu0 %v1179_v22  ;;  %1419 = vmatprep.subr.mxu1 %v1243_v26  ;;  %v1283_v22 = vld [vmem:[#allocation9 + $0x348] sm:$0xff]  ;;  %v693_v26 = vld [vmem:[#allocation8] sm:$0xf] }
 0x14f   :  { %1349 = vmatpush1.msra.mxu0 %v1178_v28  ;;  %1420 = vmatpush1.msra.mxu1 %v1242_v40  ;;  %v1281_v28 = vld [vmem:[#allocation9 + $0x338] sm:$0xff] }
 0x150   :  { %1350 = vmatprep.subr.mxu0 %v1241_v31  ;;  %1421 = vmatprep.subr.mxu1 %v1305_v41  ;;  %v1279_v31 = vld [vmem:[#allocation9 + $0x328] sm:$0xff] }
 0x151   :  { %1351 = vmatpush2.msra.mxu0 %v1240_v33  ;;  %1422 = vmatpush2.msra.mxu1 %v1304_v42  ;;  %v1277_v33 = vld [vmem:[#allocation9 + $0x318] sm:$0xff] }
 0x152   :  { %1352 = vmatprep.subr.mxu0 %v1239_v36  ;;  %1423 = vmatprep.subr.mxu1 %v1303_v35  ;;  %v1275_v36 = vld [vmem:[#allocation9 + $0x308] sm:$0xff] }
 0x153   :  { %1353 = vmatpush2.msra.mxu0 %v1238_v38  ;;  %1424 = vmatpush2.msra.mxu1 %v1302_v9  ;;  %v697_v38 = vsub.s32 0, %v1893_v23 }
 0x154   :  { %1354 = vmatprep.subr.mxu0 %v1237_v39  ;;  %1425 = vmatprep.subr.mxu1 %v1301_v45  ;;  %v701_v39 = vsub.s32 1, %v1893_v23 }
 0x155   :  { %1355 = vmatpush2.msra.mxu0 %v1236_v24  ;;  %1426 = vmatpush2.msra.mxu1 %v1300_v47  ;;  %v698_v24 = vrot.slane %v693_v26, %v697_v38 }
 0x156   :  { %1356 = vmatprep.subr.mxu0 %v1235_v29  ;;  %1427 = vmatprep.subr.mxu1 %v1299_v49  ;;  %v702_v41 = vrot.slane %v693_v26, %v701_v39 }
 0x157   :  { %1357 = vmatpush2.msra.mxu0 %v1234_v43  ;;  %1428 = vmatpush2.msra.mxu1 %v1298_v51  ;;  %v705_v51 = vsub.s32 2, %v1893_v23 }
 0x158   :  { %1358 = vmatprep.subr.mxu0 %v1233_v27  ;;  %1429 = vmatprep.subr.mxu1 %v1297_v53 }
 0x159   :  { %1359 = vmatpush2.msra.mxu0 %v1232_v44  ;;  %1430 = vmatpush2.msra.mxu1 %v1296_v55 }
 0x15a   :  { %1360 = vmatprep.subr.mxu0 %v1231_v46  ;;  %1431 = vmatprep.subr.mxu1 %v1295_v57 }
 0x15b   :  { %1361 = vmatpush2.msra.mxu0 %v1230_v48  ;;  %1432 = vmatpush2.msra.mxu1 %v1294_v59 }
 0x15c   :  { %1362 = vmatprep.subr.mxu0 %v1229_v50  ;;  %1433 = vmatprep.subr.mxu1 %v1293_v61 }
 0x15d   :  { %1363 = vmatpush2.msra.mxu0 %v1228_v52  ;;  %1434 = vmatpush2.msra.mxu1 %v1292_v63  ;;  %v709_v52 = vsub.s32 3, %v1893_v23 }
 0x15e   :  { %1364 = vmatprep.subr.mxu0 %v1227_v54  ;;  %1435 = vmatprep.subr.mxu1 %v1291_v1  ;;  %v706_v54 = vrot.slane %v693_v26, %v705_v51 }
 0x15f   :  { %1365 = vmatpush2.msra.mxu0 %v1226_v56  ;;  %1436 = vmatpush2.msra.mxu1 %v1290_v3  ;;  %v710_v55 = vrot.slane %v693_v26, %v709_v52  ;;  %v1480_v26 = vld [vmem:[#allocation12 + $0x90] sm:$0xff] }
 0x160   :  { %1366 = vmatprep.subr.mxu0 %v1225_v58  ;;  %1437 = vmatprep.subr.mxu1 %v1289_v5  ;;  %v1493_v5 = vld [vmem:[#allocation12 + $0xf8] sm:$0xff] }
 0x161   :  { %1367 = vmatpush2.msra.mxu0 %v1224_v60  ;;  %1438 = vmatpush2.msra.mxu1 %v1288_v7  ;;  %v1492_v7 = vld [vmem:[#allocation12 + $0xf0] sm:$0xff] }
 0x162   :  { %1368 = vmatprep.subr.mxu0 %v1223_v62  ;;  %1439 = vmatprep.subr.mxu1 %v1287_v10  ;;  %v1491_v10 = vld [vmem:[#allocation12 + $0xe8] sm:$0xff] }
 0x163   :  { %1369 = vmatpush2.msra.mxu0 %v1222_v0  ;;  %1440 = vmatpush2.msra.mxu1 %v1286_v12  ;;  %v1490_v12 = vld [vmem:[#allocation12 + $0xe0] sm:$0xff] }
 0x164   :  { %1370 = vmatprep.subr.mxu0 %v1221_v2  ;;  %1441 = vmatprep.subr.mxu1 %v1285_v14  ;;  %v1489_v14 = vld [vmem:[#allocation12 + $0xd8] sm:$0xff] }
 0x165   :  { %1371 = vmatpush2.msra.mxu0 %v1220_v4  ;;  %1442 = vmatpush2.msra.mxu1 %v1284_v16  ;;  %v1488_v16 = vld [vmem:[#allocation12 + $0xd0] sm:$0xff] }
 0x166   :  { %1372 = vmatprep.subr.mxu0 %v1219_v6  ;;  %1443 = vmatprep.subr.mxu1 %v1283_v22  ;;  %v1477_v6 = vld [vmem:[#allocation12 + $0x78] sm:$0xff] }
 0x167   :  { %1373 = vmatpush2.msra.mxu0 %v1218_v8  ;;  %1444 = vmatpush2.msra.mxu1 %v1282_v25  ;;  %v1476_v8 = vld [vmem:[#allocation12 + $0x70] sm:$0xff]  ;;  %v1485_v22 = vld [vmem:[#allocation12 + $0xb8] sm:$0xff] }
 0x168   :  { %1374 = vmatprep.subr.mxu0 %v1217_v11  ;;  %1445 = vmatprep.subr.mxu1 %v1281_v28  ;;  %v1475_v11 = vld [vmem:[#allocation12 + $0x68] sm:$0xff]  ;;  %v1469_v25 = vld [vmem:[#allocation12 + $0x38] sm:$0xff]  ;;  %v1484_v28 = vld [vmem:[#allocation12 + $0xb0] sm:$0xff] }
 0x169   :  { %1375 = vmatpush2.msra.mxu0 %v1216_v13  ;;  %1446 = vmatpush2.msra.mxu1 %v1280_v30  ;;  %v1474_v13 = vld [vmem:[#allocation12 + $0x60] sm:$0xff]  ;;  %v1468_v30 = vld [vmem:[#allocation12 + $0x30] sm:$0xff] }
 0x16a   :  { %1376 = vmatprep.subr.mxu0 %v1215_v15  ;;  %1447 = vmatprep.subr.mxu1 %v1279_v31  ;;  %v1473_v15 = vld [vmem:[#allocation12 + $0x58] sm:$0xff]  ;;  %v1483_v31 = vld [vmem:[#allocation12 + $0xa8] sm:$0xff] }
 0x16b   :  { %1377 = vmatpush2.msra.mxu0 %v1214_v17  ;;  %1448 = vmatpush2.msra.mxu1 %v1278_v32  ;;  %v814_v40 = vpop.f32.mrf.mxu0  ;;  %v1472_v17 = vld [vmem:[#allocation12 + $0x50] sm:$0xff]  ;;  %v1467_v32 = vld [vmem:[#allocation12 + $0x28] sm:$0xff] }
 0x16c   :  { %1378 = vmatprep.subr.mxu0 %v1213_v18  ;;  %1449 = vmatprep.subr.mxu1 %v1277_v33  ;;  %v815_v43 = vadd.f32 %v814_v40, %v698_v24  ;;  %v1487_v18 = vld [vmem:[#allocation12 + $0xc8] sm:$0xff]  ;;  %v1482_v33 = vld [vmem:[#allocation12 + $0xa0] sm:$0xff]  ;;  %v1464_v40 = vld [vmem:[#allocation12 + $0x10] sm:$0xff] }
 0x16d   :  { %1379 = vmatpush2.msra.mxu0 %v1212_v19  ;;  %1450 = vmatpush2.msra.mxu1 %v1276_v34  ;;  %v885_v29 = vpop.f32.mrf.mxu1  ;;  %v816_v42 = vpop.f32.mrf.mxu0  ;;  %v1471_v19 = vld [vmem:[#allocation12 + $0x48] sm:$0xff]  ;;  %v1466_v34 = vld [vmem:[#allocation12 + $0x20] sm:$0xff] }
 0x16e   :  { %1380 = vmatprep.subr.mxu0 %v1211_v20  ;;  %1451 = vmatprep.subr.mxu1 %v1275_v36  ;;  %v817_v35 = vadd.f32 %v816_v42, %v702_v41  ;;  %v886_v9 = vadd.f32 %v885_v29, %v815_v43  ;;  %v1486_v20 = vld [vmem:[#allocation12 + $0xc0] sm:$0xff]  ;;  %v1481_v36 = vld [vmem:[#allocation12 + $0x98] sm:$0xff]  ;;  %v1479_v24 = vld [vmem:[#allocation12 + $0x88] sm:$0xff] }
 0x16f   :  { %1381 = vmatpush2.msra.mxu0 %v1210_v21  ;;  %1452 = vmatpush2.msra.mxu1 %v1274_v37  ;;  %v887_v27 = vpop.f32.mrf.mxu1  ;;  %v1470_v21 = vld [vmem:[#allocation12 + $0x40] sm:$0xff]  ;;  %v1465_v37 = vld [vmem:[#allocation12 + $0x18] sm:$0xff]  ;;  %v1463_v41 = vld [vmem:[#allocation12 + $0x8] sm:$0xff] }
 0x170   :  { %v888_v45 = vadd.f32 %v887_v27, %v817_v35  ;;  %1591 = vmatprep.subr.mxu0 %v1493_v5  ;;  %v1478_v29 = vld [vmem:[#allocation12 + $0x80] sm:$0xff]  ;;  %v1306_v43 = vld [vmem:[#allocation11] sm:$0x3] }
 0x171   :  { %v1462_v42 = vld [vmem:[#allocation12] sm:$0xff]  ;;  %v1311_v27 = vrot.slane %v1306_v43, %v697_v38 }
 0x1ac   :  { %v956_v44 = vpop.f32.mrf.mxu0 }
 0x1ad   :  { %v957_v46 = vadd.f32 %v956_v44, %v886_v9  ;;  %v1315_v9 = vrot.slane %v1306_v43, %v701_v39 }
 0x1ae   :  { %v958_v47 = vpop.f32.mrf.mxu0  ;;  %v1027_v53 = vpop.f32.mrf.mxu1 }
 0x1af   :  { %v959_v48 = vadd.f32 %v958_v47, %v888_v45  ;;  %v1174_v50 = vmax.f32 %v957_v46, 0.0  ;;  %v1028_v57 = vadd.f32 %v1027_v53, %v706_v54  ;;  %v1590_v54 = vld [vmem:[#allocation14] ss:$0 sm:$0xff] }
 0x1b0   :  { %v1029_v56 = vpop.f32.mrf.mxu1 }
 0x1b1   :  { %v1175_v49 = vmax.f32 %v959_v48, 0.0  ;;  %v1030_v60 = vadd.f32 %v1029_v56, %v710_v55 }
 0x1b3   :  { %1382 = vmatprep.mubr.f32.mxu0 %v1175_v49 }
 0x1b4   :  { %1383 = vmatmul.mubr.f32.vlgmr.msra.gmra.mxu0 %v1174_v50 }
 0x1b5   :  { %1592 = vmatpush3.msra.mxu0 %v1477_v6 }
 0x1b6   :  { %1593 = vmatprep.subr.mxu0 %v1492_v7 }
 0x1b7   :  { %1594 = vmatpush3.msra.mxu0 %v1476_v8 }
 0x1b8   :  { %1595 = vmatprep.subr.mxu0 %v1491_v10 }
 0x1b9   :  { %1596 = vmatpush3.msra.mxu0 %v1475_v11 }
 0x1ba   :  { %1597 = vmatprep.subr.mxu0 %v1490_v12 }
 0x1bb   :  { %1598 = vmatpush3.msra.mxu0 %v1474_v13 }
 0x1bc   :  { %1599 = vmatprep.subr.mxu0 %v1489_v14 }
 0x1bd   :  { %1600 = vmatpush3.msra.mxu0 %v1473_v15 }
 0x1be   :  { %1601 = vmatprep.subr.mxu0 %v1488_v16 }
 0x1bf   :  { %1602 = vmatpush3.msra.mxu0 %v1472_v17 }
 0x1c0   :  { %1603 = vmatprep.subr.mxu0 %v1487_v18 }
 0x1c1   :  { %1604 = vmatpush3.msra.mxu0 %v1471_v19 }
 0x1c2   :  { %1605 = vmatprep.subr.mxu0 %v1486_v20 }
 0x1c3   :  { %1606 = vmatpush3.msra.mxu0 %v1470_v21 }
 0x1c4   :  { %1607 = vmatprep.subr.mxu0 %v1485_v22 }
 0x1c5   :  { %1608 = vmatpush3.msra.mxu0 %v1469_v25 }
 0x1c6   :  { %1609 = vmatprep.subr.mxu0 %v1484_v28 }
 0x1c7   :  { %1610 = vmatpush3.msra.mxu0 %v1468_v30 }
 0x1c8   :  { %1611 = vmatprep.subr.mxu0 %v1483_v31 }
 0x1c9   :  { %1612 = vmatpush3.msra.mxu0 %v1467_v32 }
 0x1ca   :  { %1613 = vmatprep.subr.mxu0 %v1482_v33 }
 0x1cb   :  { %1614 = vmatpush3.msra.mxu0 %v1466_v34 }
 0x1cc   :  { %1615 = vmatprep.subr.mxu0 %v1481_v36 }
 0x1cd   :  { %1616 = vmatpush3.msra.mxu0 %v1465_v37 }
 0x1ce   :  { %1617 = vmatprep.subr.mxu0 %v1480_v26 }
 0x1cf   :  { %1618 = vmatpush3.msra.mxu0 %v1464_v40 }
 0x1d0   :  { %1619 = vmatprep.subr.mxu0 %v1479_v24 }
 0x1d1   :  { %1620 = vmatpush3.msra.mxu0 %v1463_v41 }
 0x1d2   :  { %1621 = vmatprep.subr.mxu0 %v1478_v29 }
 0x1d3   :  { %1622 = vmatpush3.msra.mxu0 %v1462_v42 }
 0x1ef   :  { %v1098_v58 = vpop.f32.mrf.mxu0  ;;  %v1169_v59 = vpop.f32.mrf.mxu1 }
 0x1f0   :  { %v1099_v61 = vadd.f32 %v1098_v58, %v1028_v57 }
 0x1f1   :  { %v1100_v62 = vpop.f32.mrf.mxu0  ;;  %v1171_v1 = vpop.f32.mrf.mxu1 }
 0x1f2   :  { %v1101_v63 = vadd.f32 %v1100_v62, %v1030_v60  ;;  %v1170_v0 = vadd.f32 %v1169_v59, %v1099_v61 }
 0x1f4   :  { %v1172_v2 = vadd.f32 %v1171_v1, %v1101_v63  ;;  %v1176_v4 = vmax.f32 %v1170_v0, 0.0 }
 0x1f6   :  { %v1177_v3 = vmax.f32 %v1172_v2, 0.0 }
 0x1f8   :  { %1453 = vmatprep.mubr.f32.mxu1 %v1177_v3 }
 0x1f9   :  { %1454 = vmatmul.mubr.f32.vlgmr.msra.gmra.mxu1 %v1176_v4 }
 0x274   :  { %v1384_v35 = vpop.f32.mrf.mxu0 }
 0x275   :  { %v1385_v45 = vadd.f32 %v1384_v35, %v1311_v27 }
 0x276   :  { %v1386_v44 = vpop.f32.mrf.mxu0 }
 0x277   :  { %v1387_v47 = vadd.f32 %v1386_v44, %v1315_v9 }
 0x2b9   :  { %v1455_v46 = vpop.f32.mrf.mxu1 }
 0x2ba   :  { %v1456_v48 = vadd.f32 %v1455_v46, %v1385_v45 }
 0x2bb   :  { %v1457_v49 = vpop.f32.mrf.mxu1 }
 0x2bc   :  { %v1458_v50 = vadd.f32 %v1457_v49, %v1387_v47  ;;  %v1460_v52 = vmax.f32 %v1456_v48, 0.0 }
 0x2be   :  { %v1461_v51 = vmax.f32 %v1458_v50, 0.0 }
 0x2c0   :  { %1565 = vmatprep.mubr.f32.mxu0 %v1461_v51 }
 0x2c1   :  { %1566 = vmatmul.mubr.f32.vlgmr.msra.gmra.mxu0 %v1460_v52 }
 0x381   :  { %v1623_v53 = vpop.f32.mrf.mxu0 }
 0x383   :  { %v1624_v55 = vpop.f32.mrf.mxu0 }
 0x384   :  { %v1625_v38 = vadd.f32 %v1624_v55, %v1623_v53 }
 0x386   :  { %v1568_v56 = vadd.f32 %v1625_v38, %v1590_v54 }
 0x388   :  { %1571 = vst [vmem:[#allocation15] sm:$0x3] %v1568_v56 }
 0x389   :  { %1795 = shalt.err (!%p1792_p11)
}
 0x38a   :  { %1581 = dma.vmem_to_hbm [thread:$0]  %s1579_s6, 32, %s1967_s7, [#allocation5]  }
 0x38b   :  { %1812 = dma.done.wait [#allocation5], 32  }
 0x38c   :  { %1813 = vsyncadd [#allocation5], 4294967264 }
 0x38d   :  { %1585 = vsyncpa [#allocation4], 1 }
 0x38e   :  { %1586 = vsyncpa [#allocation7], 1 }
 0x38f   :  { %1587 = vsyncpa [#allocation10], 1 }
 0x390   :  { %1588 = vsyncpa [#allocation13], 1 }
 0x391   :  { %1589 = vsyncpa [#allocation5], 1 }

</bundles_post_ra>
